<compile_context>
chip_gen: v7x
topology: tpu7x:2x2x1
jax: 0.10.0
libtpu: 0.0.40
codegen_flags: <defaults>
</compile_context>

<pallas_src>
import functools
import math

import jax
import jax.numpy as jnp
from jax.experimental import pallas as pl
from jax.experimental.pallas import tpu as pltpu


def _round_up(x, m):
    return ((x + m - 1) // m) * m


# ----------------------------- Pallas kernel ---------------------------------

def _kan_layer_compute(x, grid_t, base_wt, spline_w, *, spline_order, uniform_h,
                       use_bf16):
    """One KANLinear layer on in-VMEM values.

    x:        (B, IN)  f32
    grid_t:   (NK, IN) f32   knots, IN on the 128-lane axis
    base_wt:  (IN, OUT)      == base_weight.T      (bf16 if use_bf16)
    spline_w: (NB, IN, OUT)  scaled spline weights (bf16 if use_bf16)
    """
    # ---- base path: SiLU(x) @ base_weight.T (MXU, f32 accumulation) ---------
    silu = x * jax.nn.sigmoid(x)
    lhs = silu.astype(jnp.bfloat16) if use_bf16 else silu
    acc = jnp.dot(lhs, base_wt, preferred_element_type=jnp.float32)

    # ---- B-spline basis (Cox-de Boor), knot index on the LEADING axis -------
    xb = x[None, :, :]              # (1,  B, IN)
    g = grid_t[:, None, :]          # (NK, 1, IN)
    bases = jnp.logical_and(xb >= g[:-1], xb < g[1:]).astype(x.dtype)  # (NK-1,B,IN)
    for k in range(1, spline_order + 1):
        if uniform_h is not None:
            # Equispaced knots: denominators are exactly k*h (B-independent scalar).
            inv = jnp.float32(1.0 / (k * uniform_h))
            left = (xb - g[:-(k + 1)]) * inv
            right = (g[k + 1:] - xb) * inv
        else:
            den_l = grid_t[k:-1] - grid_t[:-(k + 1)]    # (NK-k-1, IN), B-independent
            den_r = grid_t[k + 1:] - grid_t[1:-k]
            inv_l = jnp.where(den_l == 0, 0.0, 1.0 / jnp.where(den_l == 0, 1.0, den_l))
            inv_r = jnp.where(den_r == 0, 0.0, 1.0 / jnp.where(den_r == 0, 1.0, den_r))
            left = (xb - g[:-(k + 1)]) * inv_l[:, None, :]
            right = (g[k + 1:] - xb) * inv_r[:, None, :]
        # Leading-axis slices: free plane selections, no sublane shift.
        bases = left * bases[:-1] + right * bases[1:]
    # bases: (NB, B, IN)

    # ---- spline path: unrolled sum of NB MXU matmuls (no reshape/relayout) --
    nb = bases.shape[0]
    for j in range(nb):
        bj = bases[j]
        if use_bf16:
            bj = bj.astype(jnp.bfloat16)
        acc = acc + jnp.dot(bj, spline_w[j], preferred_element_type=jnp.float32)
    return acc


def kan_fused_kernel(*refs, num_layers, spline_order, uniform_hs, use_bf16):
    """refs = (x, [grid_t, base_wt, spline_w] * num_layers, out)."""
    x_ref = refs[0]
    out_ref = refs[1 + 3 * num_layers]
    x = x_ref[...].astype(jnp.float32)
    for l in range(num_layers):
        g = refs[1 + 3 * l][...]
        bw = refs[2 + 3 * l][...]
        sw = refs[3 + 3 * l][...]
        x = _kan_layer_compute(x, g, bw, sw, spline_order=spline_order,
                               uniform_h=uniform_hs[l], use_bf16=use_bf16)
    out_ref[...] = x.astype(out_ref.dtype)


# ------------------------------- wrapper --------------------------------------

def _choose_batch_tiling(batch, b_tile_max):
    """Batch tile: multiple of 8 (sublane); prefer MXU-row widths; guarantee
    >= 2 grid steps for batch >= 256 so v7x megacore ('parallel') has work."""
    if batch >= 2 * b_tile_max:
        b_tile = b_tile_max
    elif batch >= 256:
        b_tile = min(b_tile_max, _round_up((batch + 1) // 2, 128))
    else:
        b_tile = _round_up(max(batch, 8), 8)
    b_pad = _round_up(batch, b_tile)
    return b_tile, b_pad


def kan_forward(x, params, *, spline_order=3, use_bf16=False, b_tile_max=None):
    """Full KAN forward: x (..., in0) -> (..., out_last). One pallas_call."""
    num_layers = len(params)
    in0 = params[0]["base_weight_t"].shape[0]
    out_last = params[-1]["base_weight_t"].shape[1]

    lead_shape = x.shape[:-1]
    x2d = x.reshape(-1, in0).astype(jnp.float32)
    batch = x2d.shape[0]

    # ---- chip info (VMEM capacity drives limits & tile caps) ----------------
    try:
        vmem_cap = int(pltpu.get_tpu_info().vmem_capacity_bytes)
    except Exception:
        vmem_cap = 64 * 1024 * 1024  # conservative (v7x per-TC VMEM)
    if b_tile_max is None:
        b_tile_max = 1024 if vmem_cap >= 96 * 1024 * 1024 else 512

    # ---- batch tiling --------------------------------------------------------
    b_tile, b_pad = _choose_batch_tiling(batch, b_tile_max)

    # ---- pad ALL layer widths to lane-dense multiples of 128 -----------------
    w_dtype = jnp.bfloat16 if use_bf16 else jnp.float32
    flat_params = []
    uniform_hs = []
    padded_dims = []
    for p in params:
        g, bw, sw = p["grid_t"], p["base_weight_t"], p["spline_w"]
        in_f, out_f = bw.shape
        in_p, out_p = _round_up(in_f, 128), _round_up(out_f, 128)
        if in_p != in_f:
            g = jnp.pad(g, ((0, 0), (0, in_p - in_f)), mode="edge")
            bw = jnp.pad(bw, ((0, in_p - in_f), (0, 0)))
            # Padded-input spline rows MUST be zero: B-spline bases of the padded
            # x=0 inputs are nonzero (SiLU(0)=0 keeps the base path safe).
            sw = jnp.pad(sw, ((0, 0), (0, in_p - in_f), (0, 0)))
        if out_p != out_f:
            bw = jnp.pad(bw, ((0, 0), (0, out_p - out_f)))
            sw = jnp.pad(sw, ((0, 0), (0, 0), (0, out_p - out_f)))
        flat_params += [g.astype(jnp.float32), bw.astype(w_dtype), sw.astype(w_dtype)]
        uniform_hs.append(p.get("uniform_h", None))
        padded_dims.append((in_p, out_p, sw.shape[0], g.shape[0]))
    in0_p = padded_dims[0][0]
    out_last_p = padded_dims[-1][1]

    # ---- pad input (zeros: padded features contribute exactly 0) -------------
    x2d = jnp.pad(x2d, ((0, b_pad - batch), (0, in0_p - in0)))

    # ---- VMEM budgeting -------------------------------------------------------
    weight_bytes = sum(int(a.size) * a.dtype.itemsize for a in flat_params)
    max_dim = max(max(ip, op) for ip, op, _, _ in padded_dims)
    max_nk = max(nk for _, _, _, nk in padded_dims)
    io_bytes = 2 * b_tile * (in0_p + out_last_p) * 4            # double-buffered x/out
    work_bytes = (3 * (max_nk - 1) + 4) * b_tile * max_dim * 4  # bases temps + acts

    def _vmem_limit(wbuf):
        need = wbuf * weight_bytes + io_bytes + work_bytes
        return int(min(max(2 * need, 32 * 1024 * 1024),
                       max(vmem_cap - 8 * 1024 * 1024, 32 * 1024 * 1024)))

    # ---- advisory cost estimate ----------------------------------------------
    flops = 0
    transcendentals = 0
    for (in_p, out_p, nb, nk) in padded_dims:
        flops += 2 * b_pad * in_p * out_p               # base matmul
        flops += 2 * b_pad * nb * in_p * out_p          # spline matmuls
        flops += 8 * b_pad * in_p * nk * spline_order   # basis recursion (approx)
        transcendentals += b_pad * in_p                 # sigmoid
    bytes_accessed = x2d.size * 4 + b_pad * out_last_p * 4 + weight_bytes
    cost = pl.CostEstimate(flops=int(flops), transcendentals=int(transcendentals),
                           bytes_accessed=int(bytes_accessed))

    kernel = functools.partial(kan_fused_kernel, num_layers=num_layers,
                               spline_order=spline_order,
                               uniform_hs=tuple(uniform_hs), use_bf16=use_bf16)

    def build_call(single_buffer_weights):
        in_specs = [pl.BlockSpec((b_tile, in0_p), lambda i: (i, 0))]
        for arr in flat_params:
            kwargs = {}
            if single_buffer_weights:
                # Constant index_map -> one resident copy is enough (halves weight VMEM).
                kwargs["pipeline_mode"] = pl.Buffered(1)
            if arr.ndim == 2:
                in_specs.append(pl.BlockSpec(arr.shape, lambda i: (0, 0), **kwargs))
            else:
                in_specs.append(pl.BlockSpec(arr.shape, lambda i: (0, 0, 0), **kwargs))
        out_spec = pl.BlockSpec((b_tile, out_last_p), lambda i: (i, 0))
        wbuf = 1 if single_buffer_weights else 2
        return pl.pallas_call(
            kernel,
            out_shape=jax.ShapeDtypeStruct((b_pad, out_last_p), jnp.float32),
            grid=(b_pad // b_tile,),
            in_specs=in_specs,
            out_specs=out_spec,
            compiler_params=pltpu.CompilerParams(
                dimension_semantics=("parallel",),
                vmem_limit_bytes=_vmem_limit(wbuf)),
            cost_estimate=cost,
        )

    # TODO(synk): layers whose single-buffered weights still exceed VMEM would need a
    # weight-streaming path (spline_w in HBM via memory_space=pl.ANY + emit_pipeline).
    try:
        out = jax.block_until_ready(build_call(True)(x2d, *flat_params))
    except Exception:
        # pipeline_mode=pl.Buffered(1) unsupported here -> fall back to default buffering.
        out = build_call(False)(x2d, *flat_params)

    return out[:batch, :out_last].reshape(*lead_shape, out_last)


# --------------------------- parameter construction --------------------------

def init_kan_layer(key, in_features, out_features, *, grid_size=5, spline_order=3,
                   scale_noise=0.1, scale_base=1.0, scale_spline=1.0,
                   grid_range=(-1.0, 1.0)):
    h = (grid_range[1] - grid_range[0]) / grid_size
    knots = jnp.arange(-spline_order, grid_size + spline_order + 1,
                       dtype=jnp.float32) * h + grid_range[0]
    # (NK, IN): knot axis first so in_features rides the 128-lane axis in-kernel.
    grid_t = jnp.broadcast_to(knots[:, None], (knots.shape[0], in_features))

    k1, k2, k3 = jax.random.split(key, 3)

    # kaiming_uniform_(a=sqrt(5)*scale): bound = sqrt(2/(1+a^2)) * sqrt(3/fan_in)
    a_b = math.sqrt(5.0) * scale_base
    bound_b = math.sqrt(2.0 / (1.0 + a_b * a_b)) * math.sqrt(3.0 / in_features)
    base_weight = jax.random.uniform(k1, (out_features, in_features), jnp.float32,
                                     -bound_b, bound_b)

    # TODO(synk): reset_parameters derives spline_weight via curve2coeff (regularized
    # lstsq of uniform noise); we use scaled uniform noise of the same shape instead.
    n_bases = grid_size + spline_order
    spline_weight = (jax.random.uniform(k2, (out_features, in_features, n_bases),
                                        jnp.float32) - 0.5) * scale_noise / grid_size

    a_s = math.sqrt(5.0) * scale_spline
    bound_s = math.sqrt(2.0 / (1.0 + a_s * a_s)) * math.sqrt(3.0 / in_features)
    spline_scaler = jax.random.uniform(k3, (out_features, in_features), jnp.float32,
                                       -bound_s, bound_s)

    # Fold the standalone spline scaler in host-side and lay out as (NB, IN, OUT)
    # so the in-kernel spline contraction is an unrolled sum of per-j matmuls.
    scaled = spline_weight * spline_scaler[:, :, None]     # (OUT, IN, NB)
    spline_w = jnp.transpose(scaled, (2, 1, 0))            # (NB, IN, OUT)

    return {
        "grid_t": grid_t,                    # (NK, IN)
        "base_weight_t": base_weight.T,      # (IN, OUT)
        "spline_w": spline_w,                # (NB, IN, OUT), scaler folded in
        # Knots are equispaced at construction; set to None after any update_grid.
        "uniform_h": float(h),
    }


def init_kan(key, layers_hidden, **kwargs):
    params = []
    for fin, fout in zip(layers_hidden, layers_hidden[1:]):
        key, sub = jax.random.split(key)
        params.append(init_kan_layer(sub, fin, fout, **kwargs))
    return params


# ------------------------------ pure-JAX reference ---------------------------

def _ref_layer(x, p, spline_order):
    grid = p["grid_t"].T                     # (IN, NK), torch-style layout
    bwt = p["base_weight_t"]                 # (IN, OUT)
    w = p["spline_w"]                        # (NB, IN, OUT)

    silu = x * jax.nn.sigmoid(x)
    base = silu @ bwt
    xe = x[:, :, None]
    g = grid[None, :, :]
    bases = ((xe >= g[:, :, :-1]) & (xe < g[:, :, 1:])).astype(x.dtype)
    for k in range(1, spline_order + 1):
        bases = ((xe - g[:, :, :-(k + 1)]) / (g[:, :, k:-1] - g[:, :, :-(k + 1)]) * bases[:, :, :-1]
                 + (g[:, :, k + 1:] - xe) / (g[:, :, k + 1:] - g[:, :, 1:-k]) * bases[:, :, 1:])
    spline = jnp.einsum("bin,nio->bo", bases, w)
    return base + spline


def kan_reference(x, params, spline_order=3):
    for p in params:
        x = _ref_layer(x, p, spline_order)
    return x


# ----------------------------------- main -------------------------------------

if __name__ == "__main__":
    # TODO(synk): update_grid (data-adaptive knot refit via lstsq) and
    # regularization_loss are not part of the forward pass and are not implemented.
    key = jax.random.PRNGKey(0)
    kx, kp = jax.random.split(key)

    layers_hidden = [16, 32, 8]
    grid_size, spline_order = 5, 3
    batch = 8

    x = jax.random.normal(kx, (batch, layers_hidden[0]), dtype=jnp.float32)
    params = init_kan(kp, layers_hidden, grid_size=grid_size, spline_order=spline_order)

    out = kan_forward(x, params, spline_order=spline_order, use_bf16=False)
    out = jax.block_until_ready(out)

    ref = kan_reference(x, params, spline_order=spline_order)
    assert out.shape == (batch, layers_hidden[-1])
    assert jnp.allclose(out, ref, rtol=1e-4, atol=1e-5), "Pallas KAN mismatch vs JAX reference"

    print("KERNEL_OK")
</pallas_src>

<mosaic_0001>
module attributes {stable_mosaic.version = 11 : i64} {
  func.func @kan_fused_kernel(%arg0: i32, %arg1: memref<8x128xf32, #tpu.memory_space<vmem>>, %arg2: memref<12x128xf32, #tpu.memory_space<vmem>>, %arg3: memref<128x128xf32, #tpu.memory_space<vmem>>, %arg4: memref<8x128x128xf32, #tpu.memory_space<vmem>>, %arg5: memref<12x128xf32, #tpu.memory_space<vmem>>, %arg6: memref<128x128xf32, #tpu.memory_space<vmem>>, %arg7: memref<8x128x128xf32, #tpu.memory_space<vmem>>, %arg8: memref<8x128xf32, #tpu.memory_space<vmem>>) attributes {dimension_semantics = [#tpu.dimension_semantics<parallel>], iteration_bounds = array<i64: 1>, scalar_prefetch = 0 : i64, scratch_operands = 0 : i64, tpu.core_type = #tpu.core_type<tc>, window_params = [{transform_indices = @transform_0, window_bounds = array<i64: 8, 128>}, {pipeline_mode = #tpu.pipeline_mode<synchronous>, transform_indices = @transform_1, window_bounds = array<i64: 12, 128>}, {pipeline_mode = #tpu.pipeline_mode<synchronous>, transform_indices = @transform_2, window_bounds = array<i64: 128, 128>}, {pipeline_mode = #tpu.pipeline_mode<synchronous>, transform_indices = @transform_3, window_bounds = array<i64: 8, 128, 128>}, {pipeline_mode = #tpu.pipeline_mode<synchronous>, transform_indices = @transform_4, window_bounds = array<i64: 12, 128>}, {pipeline_mode = #tpu.pipeline_mode<synchronous>, transform_indices = @transform_5, window_bounds = array<i64: 128, 128>}, {pipeline_mode = #tpu.pipeline_mode<synchronous>, transform_indices = @transform_6, window_bounds = array<i64: 8, 128, 128>}, {transform_indices = @transform_7, window_bounds = array<i64: 8, 128>}]} {
    %c0 = arith.constant 0 : index
    %c0_0 = arith.constant 0 : index
    %0 = vector.load %arg1[%c0, %c0_0] : memref<8x128xf32, #tpu.memory_space<vmem>>, vector<8x128xf32>
    %c0_1 = arith.constant 0 : index
    %c0_2 = arith.constant 0 : index
    %1 = vector.load %arg2[%c0_1, %c0_2] : memref<12x128xf32, #tpu.memory_space<vmem>>, vector<12x128xf32>
    %c0_3 = arith.constant 0 : index
    %c0_4 = arith.constant 0 : index
    %2 = vector.load %arg3[%c0_3, %c0_4] : memref<128x128xf32, #tpu.memory_space<vmem>>, vector<128x128xf32>
    %c0_5 = arith.constant 0 : index
    %c0_6 = arith.constant 0 : index
    %c0_7 = arith.constant 0 : index
    %3 = vector.load %arg4[%c0_5, %c0_6, %c0_7] : memref<8x128x128xf32, #tpu.memory_space<vmem>>, vector<8x128x128xf32>
    %4 = arith.negf %0 : vector<8x128xf32>
    %5 = math.exp %4 : vector<8x128xf32>
    %cst = arith.constant 1.000000e+00 : f32
    %6 = vector.broadcast %cst : f32 to vector<8x128xf32>
    %7 = arith.addf %6, %5 : vector<8x128xf32>
    %8 = arith.divf %6, %7 : vector<8x128xf32>
    %9 = arith.mulf %0, %8 : vector<8x128xf32>
    %cst_8 = arith.constant dense<0.000000e+00> : vector<8x128xf32>
    %10 = tpu.matmul %9, %2, %cst_8 {dimension_numbers = #tpu.dot_dimension_numbers<[1], [0], [0], [1], [0, 0, 1, 1], [], []>} : vector<8x128xf32>, vector<128x128xf32>, vector<8x128xf32> -> vector<8x128xf32>
    %11 = vector.shape_cast %0 : vector<8x128xf32> to vector<1x8x128xf32>
    %12 = vector.shape_cast %1 : vector<12x128xf32> to vector<12x1x128xf32>
    %13 = vector.extract_strided_slice %12 {offsets = [0, 0, 0], sizes = [11, 1, 128], strides = [1, 1, 1]} : vector<12x1x128xf32> to vector<11x1x128xf32>
    %14 = vector.broadcast %11 : vector<1x8x128xf32> to vector<11x8x128xf32>
    %15 = vector.broadcast %13 : vector<11x1x128xf32> to vector<11x8x128xf32>
    %16 = arith.cmpf oge, %14, %15 : vector<11x8x128xf32>
    %17 = vector.extract_strided_slice %12 {offsets = [1, 0, 0], sizes = [11, 1, 128], strides = [1, 1, 1]} : vector<12x1x128xf32> to vector<11x1x128xf32>
    %18 = vector.broadcast %11 : vector<1x8x128xf32> to vector<11x8x128xf32>
    %19 = vector.broadcast %17 : vector<11x1x128xf32> to vector<11x8x128xf32>
    %20 = arith.cmpf olt, %18, %19 : vector<11x8x128xf32>
    %21 = arith.andi %16, %20 : vector<11x8x128xi1>
    %22 = arith.extui %21 : vector<11x8x128xi1> to vector<11x8x128xi32>
    %23 = arith.sitofp %22 : vector<11x8x128xi32> to vector<11x8x128xf32>
    %24 = vector.extract_strided_slice %12 {offsets = [0, 0, 0], sizes = [10, 1, 128], strides = [1, 1, 1]} : vector<12x1x128xf32> to vector<10x1x128xf32>
    %25 = vector.broadcast %11 : vector<1x8x128xf32> to vector<10x8x128xf32>
    %26 = vector.broadcast %24 : vector<10x1x128xf32> to vector<10x8x128xf32>
    %27 = arith.subf %25, %26 : vector<10x8x128xf32>
    %cst_9 = arith.constant 2.500000e+00 : f32
    %28 = vector.broadcast %cst_9 : f32 to vector<10x8x128xf32>
    %29 = arith.mulf %27, %28 : vector<10x8x128xf32>
    %30 = vector.extract_strided_slice %12 {offsets = [2, 0, 0], sizes = [10, 1, 128], strides = [1, 1, 1]} : vector<12x1x128xf32> to vector<10x1x128xf32>
    %31 = vector.broadcast %30 : vector<10x1x128xf32> to vector<10x8x128xf32>
    %32 = vector.broadcast %11 : vector<1x8x128xf32> to vector<10x8x128xf32>
    %33 = arith.subf %31, %32 : vector<10x8x128xf32>
    %cst_10 = arith.constant 2.500000e+00 : f32
    %34 = vector.broadcast %cst_10 : f32 to vector<10x8x128xf32>
    %35 = arith.mulf %33, %34 : vector<10x8x128xf32>
    %36 = vector.extract_strided_slice %23 {offsets = [0, 0, 0], sizes = [10, 8, 128], strides = [1, 1, 1]} : vector<11x8x128xf32> to vector<10x8x128xf32>
    %37 = arith.mulf %29, %36 : vector<10x8x128xf32>
    %38 = vector.extract_strided_slice %23 {offsets = [1, 0, 0], sizes = [10, 8, 128], strides = [1, 1, 1]} : vector<11x8x128xf32> to vector<10x8x128xf32>
    %39 = arith.mulf %35, %38 : vector<10x8x128xf32>
    %40 = arith.addf %37, %39 : vector<10x8x128xf32>
    %41 = vector.extract_strided_slice %12 {offsets = [0, 0, 0], sizes = [9, 1, 128], strides = [1, 1, 1]} : vector<12x1x128xf32> to vector<9x1x128xf32>
    %42 = vector.broadcast %11 : vector<1x8x128xf32> to vector<9x8x128xf32>
    %43 = vector.broadcast %41 : vector<9x1x128xf32> to vector<9x8x128xf32>
    %44 = arith.subf %42, %43 : vector<9x8x128xf32>
    %cst_11 = arith.constant 1.250000e+00 : f32
    %45 = vector.broadcast %cst_11 : f32 to vector<9x8x128xf32>
    %46 = arith.mulf %44, %45 : vector<9x8x128xf32>
    %47 = vector.extract_strided_slice %12 {offsets = [3, 0, 0], sizes = [9, 1, 128], strides = [1, 1, 1]} : vector<12x1x128xf32> to vector<9x1x128xf32>
    %48 = vector.broadcast %47 : vector<9x1x128xf32> to vector<9x8x128xf32>
    %49 = vector.broadcast %11 : vector<1x8x128xf32> to vector<9x8x128xf32>
    %50 = arith.subf %48, %49 : vector<9x8x128xf32>
    %cst_12 = arith.constant 1.250000e+00 : f32
    %51 = vector.broadcast %cst_12 : f32 to vector<9x8x128xf32>
    %52 = arith.mulf %50, %51 : vector<9x8x128xf32>
    %53 = vector.extract_strided_slice %40 {offsets = [0, 0, 0], sizes = [9, 8, 128], strides = [1, 1, 1]} : vector<10x8x128xf32> to vector<9x8x128xf32>
    %54 = arith.mulf %46, %53 : vector<9x8x128xf32>
    %55 = vector.extract_strided_slice %40 {offsets = [1, 0, 0], sizes = [9, 8, 128], strides = [1, 1, 1]} : vector<10x8x128xf32> to vector<9x8x128xf32>
    %56 = arith.mulf %52, %55 : vector<9x8x128xf32>
    %57 = arith.addf %54, %56 : vector<9x8x128xf32>
    %58 = vector.extract_strided_slice %12 {offsets = [0, 0, 0], sizes = [8, 1, 128], strides = [1, 1, 1]} : vector<12x1x128xf32> to vector<8x1x128xf32>
    %59 = vector.broadcast %11 : vector<1x8x128xf32> to vector<8x8x128xf32>
    %60 = vector.broadcast %58 : vector<8x1x128xf32> to vector<8x8x128xf32>
    %61 = arith.subf %59, %60 : vector<8x8x128xf32>
    %cst_13 = arith.constant 0.833333313 : f32
    %62 = vector.broadcast %cst_13 : f32 to vector<8x8x128xf32>
    %63 = arith.mulf %61, %62 : vector<8x8x128xf32>
    %64 = vector.extract_strided_slice %12 {offsets = [4, 0, 0], sizes = [8, 1, 128], strides = [1, 1, 1]} : vector<12x1x128xf32> to vector<8x1x128xf32>
    %65 = vector.broadcast %64 : vector<8x1x128xf32> to vector<8x8x128xf32>
    %66 = vector.broadcast %11 : vector<1x8x128xf32> to vector<8x8x128xf32>
    %67 = arith.subf %65, %66 : vector<8x8x128xf32>
    %cst_14 = arith.constant 0.833333313 : f32
    %68 = vector.broadcast %cst_14 : f32 to vector<8x8x128xf32>
    %69 = arith.mulf %67, %68 : vector<8x8x128xf32>
    %70 = vector.extract_strided_slice %57 {offsets = [0, 0, 0], sizes = [8, 8, 128], strides = [1, 1, 1]} : vector<9x8x128xf32> to vector<8x8x128xf32>
    %71 = arith.mulf %63, %70 : vector<8x8x128xf32>
    %72 = vector.extract_strided_slice %57 {offsets = [1, 0, 0], sizes = [8, 8, 128], strides = [1, 1, 1]} : vector<9x8x128xf32> to vector<8x8x128xf32>
    %73 = arith.mulf %69, %72 : vector<8x8x128xf32>
    %74 = arith.addf %71, %73 : vector<8x8x128xf32>
    %75 = vector.extract_strided_slice %74 {offsets = [0, 0, 0], sizes = [1, 8, 128], strides = [1, 1, 1]} : vector<8x8x128xf32> to vector<1x8x128xf32>
    %76 = vector.shape_cast %75 : vector<1x8x128xf32> to vector<8x128xf32>
    %77 = vector.extract_strided_slice %3 {offsets = [0, 0, 0], sizes = [1, 128, 128], strides = [1, 1, 1]} : vector<8x128x128xf32> to vector<1x128x128xf32>
    %78 = vector.shape_cast %77 : vector<1x128x128xf32> to vector<128x128xf32>
    %cst_15 = arith.constant dense<0.000000e+00> : vector<8x128xf32>
    %79 = tpu.matmul %76, %78, %cst_15 {dimension_numbers = #tpu.dot_dimension_numbers<[1], [0], [0], [1], [0, 0, 1, 1], [], []>} : vector<8x128xf32>, vector<128x128xf32>, vector<8x128xf32> -> vector<8x128xf32>
    %80 = arith.addf %10, %79 : vector<8x128xf32>
    %81 = vector.extract_strided_slice %74 {offsets = [1, 0, 0], sizes = [1, 8, 128], strides = [1, 1, 1]} : vector<8x8x128xf32> to vector<1x8x128xf32>
    %82 = vector.shape_cast %81 : vector<1x8x128xf32> to vector<8x128xf32>
    %83 = vector.extract_strided_slice %3 {offsets = [1, 0, 0], sizes = [1, 128, 128], strides = [1, 1, 1]} : vector<8x128x128xf32> to vector<1x128x128xf32>
    %84 = vector.shape_cast %83 : vector<1x128x128xf32> to vector<128x128xf32>
    %cst_16 = arith.constant dense<0.000000e+00> : vector<8x128xf32>
    %85 = tpu.matmul %82, %84, %cst_16 {dimension_numbers = #tpu.dot_dimension_numbers<[1], [0], [0], [1], [0, 0, 1, 1], [], []>} : vector<8x128xf32>, vector<128x128xf32>, vector<8x128xf32> -> vector<8x128xf32>
    %86 = arith.addf %80, %85 : vector<8x128xf32>
    %87 = vector.extract_strided_slice %74 {offsets = [2, 0, 0], sizes = [1, 8, 128], strides = [1, 1, 1]} : vector<8x8x128xf32> to vector<1x8x128xf32>
    %88 = vector.shape_cast %87 : vector<1x8x128xf32> to vector<8x128xf32>
    %89 = vector.extract_strided_slice %3 {offsets = [2, 0, 0], sizes = [1, 128, 128], strides = [1, 1, 1]} : vector<8x128x128xf32> to vector<1x128x128xf32>
    %90 = vector.shape_cast %89 : vector<1x128x128xf32> to vector<128x128xf32>
    %cst_17 = arith.constant dense<0.000000e+00> : vector<8x128xf32>
    %91 = tpu.matmul %88, %90, %cst_17 {dimension_numbers = #tpu.dot_dimension_numbers<[1], [0], [0], [1], [0, 0, 1, 1], [], []>} : vector<8x128xf32>, vector<128x128xf32>, vector<8x128xf32> -> vector<8x128xf32>
    %92 = arith.addf %86, %91 : vector<8x128xf32>
    %93 = vector.extract_strided_slice %74 {offsets = [3, 0, 0], sizes = [1, 8, 128], strides = [1, 1, 1]} : vector<8x8x128xf32> to vector<1x8x128xf32>
    %94 = vector.shape_cast %93 : vector<1x8x128xf32> to vector<8x128xf32>
    %95 = vector.extract_strided_slice %3 {offsets = [3, 0, 0], sizes = [1, 128, 128], strides = [1, 1, 1]} : vector<8x128x128xf32> to vector<1x128x128xf32>
    %96 = vector.shape_cast %95 : vector<1x128x128xf32> to vector<128x128xf32>
    %cst_18 = arith.constant dense<0.000000e+00> : vector<8x128xf32>
    %97 = tpu.matmul %94, %96, %cst_18 {dimension_numbers = #tpu.dot_dimension_numbers<[1], [0], [0], [1], [0, 0, 1, 1], [], []>} : vector<8x128xf32>, vector<128x128xf32>, vector<8x128xf32> -> vector<8x128xf32>
    %98 = arith.addf %92, %97 : vector<8x128xf32>
    %99 = vector.extract_strided_slice %74 {offsets = [4, 0, 0], sizes = [1, 8, 128], strides = [1, 1, 1]} : vector<8x8x128xf32> to vector<1x8x128xf32>
    %100 = vector.shape_cast %99 : vector<1x8x128xf32> to vector<8x128xf32>
    %101 = vector.extract_strided_slice %3 {offsets = [4, 0, 0], sizes = [1, 128, 128], strides = [1, 1, 1]} : vector<8x128x128xf32> to vector<1x128x128xf32>
    %102 = vector.shape_cast %101 : vector<1x128x128xf32> to vector<128x128xf32>
    %cst_19 = arith.constant dense<0.000000e+00> : vector<8x128xf32>
    %103 = tpu.matmul %100, %102, %cst_19 {dimension_numbers = #tpu.dot_dimension_numbers<[1], [0], [0], [1], [0, 0, 1, 1], [], []>} : vector<8x128xf32>, vector<128x128xf32>, vector<8x128xf32> -> vector<8x128xf32>
    %104 = arith.addf %98, %103 : vector<8x128xf32>
    %105 = vector.extract_strided_slice %74 {offsets = [5, 0, 0], sizes = [1, 8, 128], strides = [1, 1, 1]} : vector<8x8x128xf32> to vector<1x8x128xf32>
    %106 = vector.shape_cast %105 : vector<1x8x128xf32> to vector<8x128xf32>
    %107 = vector.extract_strided_slice %3 {offsets = [5, 0, 0], sizes = [1, 128, 128], strides = [1, 1, 1]} : vector<8x128x128xf32> to vector<1x128x128xf32>
    %108 = vector.shape_cast %107 : vector<1x128x128xf32> to vector<128x128xf32>
    %cst_20 = arith.constant dense<0.000000e+00> : vector<8x128xf32>
    %109 = tpu.matmul %106, %108, %cst_20 {dimension_numbers = #tpu.dot_dimension_numbers<[1], [0], [0], [1], [0, 0, 1, 1], [], []>} : vector<8x128xf32>, vector<128x128xf32>, vector<8x128xf32> -> vector<8x128xf32>
    %110 = arith.addf %104, %109 : vector<8x128xf32>
    %111 = vector.extract_strided_slice %74 {offsets = [6, 0, 0], sizes = [1, 8, 128], strides = [1, 1, 1]} : vector<8x8x128xf32> to vector<1x8x128xf32>
    %112 = vector.shape_cast %111 : vector<1x8x128xf32> to vector<8x128xf32>
    %113 = vector.extract_strided_slice %3 {offsets = [6, 0, 0], sizes = [1, 128, 128], strides = [1, 1, 1]} : vector<8x128x128xf32> to vector<1x128x128xf32>
    %114 = vector.shape_cast %113 : vector<1x128x128xf32> to vector<128x128xf32>
    %cst_21 = arith.constant dense<0.000000e+00> : vector<8x128xf32>
    %115 = tpu.matmul %112, %114, %cst_21 {dimension_numbers = #tpu.dot_dimension_numbers<[1], [0], [0], [1], [0, 0, 1, 1], [], []>} : vector<8x128xf32>, vector<128x128xf32>, vector<8x128xf32> -> vector<8x128xf32>
    %116 = arith.addf %110, %115 : vector<8x128xf32>
    %117 = vector.extract_strided_slice %74 {offsets = [7, 0, 0], sizes = [1, 8, 128], strides = [1, 1, 1]} : vector<8x8x128xf32> to vector<1x8x128xf32>
    %118 = vector.shape_cast %117 : vector<1x8x128xf32> to vector<8x128xf32>
    %119 = vector.extract_strided_slice %3 {offsets = [7, 0, 0], sizes = [1, 128, 128], strides = [1, 1, 1]} : vector<8x128x128xf32> to vector<1x128x128xf32>
    %120 = vector.shape_cast %119 : vector<1x128x128xf32> to vector<128x128xf32>
    %cst_22 = arith.constant dense<0.000000e+00> : vector<8x128xf32>
    %121 = tpu.matmul %118, %120, %cst_22 {dimension_numbers = #tpu.dot_dimension_numbers<[1], [0], [0], [1], [0, 0, 1, 1], [], []>} : vector<8x128xf32>, vector<128x128xf32>, vector<8x128xf32> -> vector<8x128xf32>
    %122 = arith.addf %116, %121 : vector<8x128xf32>
    %c0_23 = arith.constant 0 : index
    %c0_24 = arith.constant 0 : index
    %123 = vector.load %arg5[%c0_23, %c0_24] : memref<12x128xf32, #tpu.memory_space<vmem>>, vector<12x128xf32>
    %c0_25 = arith.constant 0 : index
    %c0_26 = arith.constant 0 : index
    %124 = vector.load %arg6[%c0_25, %c0_26] : memref<128x128xf32, #tpu.memory_space<vmem>>, vector<128x128xf32>
    %c0_27 = arith.constant 0 : index
    %c0_28 = arith.constant 0 : index
    %c0_29 = arith.constant 0 : index
    %125 = vector.load %arg7[%c0_27, %c0_28, %c0_29] : memref<8x128x128xf32, #tpu.memory_space<vmem>>, vector<8x128x128xf32>
    %126 = arith.negf %122 : vector<8x128xf32>
    %127 = math.exp %126 : vector<8x128xf32>
    %cst_30 = arith.constant 1.000000e+00 : f32
    %128 = vector.broadcast %cst_30 : f32 to vector<8x128xf32>
    %129 = arith.addf %128, %127 : vector<8x128xf32>
    %130 = arith.divf %128, %129 : vector<8x128xf32>
    %131 = arith.mulf %122, %130 : vector<8x128xf32>
    %cst_31 = arith.constant dense<0.000000e+00> : vector<8x128xf32>
    %132 = tpu.matmul %131, %124, %cst_31 {dimension_numbers = #tpu.dot_dimension_numbers<[1], [0], [0], [1], [0, 0, 1, 1], [], []>} : vector<8x128xf32>, vector<128x128xf32>, vector<8x128xf32> -> vector<8x128xf32>
    %133 = vector.shape_cast %122 : vector<8x128xf32> to vector<1x8x128xf32>
    %134 = vector.shape_cast %123 : vector<12x128xf32> to vector<12x1x128xf32>
    %135 = vector.extract_strided_slice %134 {offsets = [0, 0, 0], sizes = [11, 1, 128], strides = [1, 1, 1]} : vector<12x1x128xf32> to vector<11x1x128xf32>
    %136 = vector.broadcast %133 : vector<1x8x128xf32> to vector<11x8x128xf32>
    %137 = vector.broadcast %135 : vector<11x1x128xf32> to vector<11x8x128xf32>
    %138 = arith.cmpf oge, %136, %137 : vector<11x8x128xf32>
    %139 = vector.extract_strided_slice %134 {offsets = [1, 0, 0], sizes = [11, 1, 128], strides = [1, 1, 1]} : vector<12x1x128xf32> to vector<11x1x128xf32>
    %140 = vector.broadcast %133 : vector<1x8x128xf32> to vector<11x8x128xf32>
    %141 = vector.broadcast %139 : vector<11x1x128xf32> to vector<11x8x128xf32>
    %142 = arith.cmpf olt, %140, %141 : vector<11x8x128xf32>
    %143 = arith.andi %138, %142 : vector<11x8x128xi1>
    %144 = arith.extui %143 : vector<11x8x128xi1> to vector<11x8x128xi32>
    %145 = arith.sitofp %144 : vector<11x8x128xi32> to vector<11x8x128xf32>
    %146 = vector.extract_strided_slice %134 {offsets = [0, 0, 0], sizes = [10, 1, 128], strides = [1, 1, 1]} : vector<12x1x128xf32> to vector<10x1x128xf32>
    %147 = vector.broadcast %133 : vector<1x8x128xf32> to vector<10x8x128xf32>
    %148 = vector.broadcast %146 : vector<10x1x128xf32> to vector<10x8x128xf32>
    %149 = arith.subf %147, %148 : vector<10x8x128xf32>
    %cst_32 = arith.constant 2.500000e+00 : f32
    %150 = vector.broadcast %cst_32 : f32 to vector<10x8x128xf32>
    %151 = arith.mulf %149, %150 : vector<10x8x128xf32>
    %152 = vector.extract_strided_slice %134 {offsets = [2, 0, 0], sizes = [10, 1, 128], strides = [1, 1, 1]} : vector<12x1x128xf32> to vector<10x1x128xf32>
    %153 = vector.broadcast %152 : vector<10x1x128xf32> to vector<10x8x128xf32>
    %154 = vector.broadcast %133 : vector<1x8x128xf32> to vector<10x8x128xf32>
    %155 = arith.subf %153, %154 : vector<10x8x128xf32>
    %cst_33 = arith.constant 2.500000e+00 : f32
    %156 = vector.broadcast %cst_33 : f32 to vector<10x8x128xf32>
    %157 = arith.mulf %155, %156 : vector<10x8x128xf32>
    %158 = vector.extract_strided_slice %145 {offsets = [0, 0, 0], sizes = [10, 8, 128], strides = [1, 1, 1]} : vector<11x8x128xf32> to vector<10x8x128xf32>
    %159 = arith.mulf %151, %158 : vector<10x8x128xf32>
    %160 = vector.extract_strided_slice %145 {offsets = [1, 0, 0], sizes = [10, 8, 128], strides = [1, 1, 1]} : vector<11x8x128xf32> to vector<10x8x128xf32>
    %161 = arith.mulf %157, %160 : vector<10x8x128xf32>
    %162 = arith.addf %159, %161 : vector<10x8x128xf32>
    %163 = vector.extract_strided_slice %134 {offsets = [0, 0, 0], sizes = [9, 1, 128], strides = [1, 1, 1]} : vector<12x1x128xf32> to vector<9x1x128xf32>
    %164 = vector.broadcast %133 : vector<1x8x128xf32> to vector<9x8x128xf32>
    %165 = vector.broadcast %163 : vector<9x1x128xf32> to vector<9x8x128xf32>
    %166 = arith.subf %164, %165 : vector<9x8x128xf32>
    %cst_34 = arith.constant 1.250000e+00 : f32
    %167 = vector.broadcast %cst_34 : f32 to vector<9x8x128xf32>
    %168 = arith.mulf %166, %167 : vector<9x8x128xf32>
    %169 = vector.extract_strided_slice %134 {offsets = [3, 0, 0], sizes = [9, 1, 128], strides = [1, 1, 1]} : vector<12x1x128xf32> to vector<9x1x128xf32>
    %170 = vector.broadcast %169 : vector<9x1x128xf32> to vector<9x8x128xf32>
    %171 = vector.broadcast %133 : vector<1x8x128xf32> to vector<9x8x128xf32>
    %172 = arith.subf %170, %171 : vector<9x8x128xf32>
    %cst_35 = arith.constant 1.250000e+00 : f32
    %173 = vector.broadcast %cst_35 : f32 to vector<9x8x128xf32>
    %174 = arith.mulf %172, %173 : vector<9x8x128xf32>
    %175 = vector.extract_strided_slice %162 {offsets = [0, 0, 0], sizes = [9, 8, 128], strides = [1, 1, 1]} : vector<10x8x128xf32> to vector<9x8x128xf32>
    %176 = arith.mulf %168, %175 : vector<9x8x128xf32>
    %177 = vector.extract_strided_slice %162 {offsets = [1, 0, 0], sizes = [9, 8, 128], strides = [1, 1, 1]} : vector<10x8x128xf32> to vector<9x8x128xf32>
    %178 = arith.mulf %174, %177 : vector<9x8x128xf32>
    %179 = arith.addf %176, %178 : vector<9x8x128xf32>
    %180 = vector.extract_strided_slice %134 {offsets = [0, 0, 0], sizes = [8, 1, 128], strides = [1, 1, 1]} : vector<12x1x128xf32> to vector<8x1x128xf32>
    %181 = vector.broadcast %133 : vector<1x8x128xf32> to vector<8x8x128xf32>
    %182 = vector.broadcast %180 : vector<8x1x128xf32> to vector<8x8x128xf32>
    %183 = arith.subf %181, %182 : vector<8x8x128xf32>
    %cst_36 = arith.constant 0.833333313 : f32
    %184 = vector.broadcast %cst_36 : f32 to vector<8x8x128xf32>
    %185 = arith.mulf %183, %184 : vector<8x8x128xf32>
    %186 = vector.extract_strided_slice %134 {offsets = [4, 0, 0], sizes = [8, 1, 128], strides = [1, 1, 1]} : vector<12x1x128xf32> to vector<8x1x128xf32>
    %187 = vector.broadcast %186 : vector<8x1x128xf32> to vector<8x8x128xf32>
    %188 = vector.broadcast %133 : vector<1x8x128xf32> to vector<8x8x128xf32>
    %189 = arith.subf %187, %188 : vector<8x8x128xf32>
    %cst_37 = arith.constant 0.833333313 : f32
    %190 = vector.broadcast %cst_37 : f32 to vector<8x8x128xf32>
    %191 = arith.mulf %189, %190 : vector<8x8x128xf32>
    %192 = vector.extract_strided_slice %179 {offsets = [0, 0, 0], sizes = [8, 8, 128], strides = [1, 1, 1]} : vector<9x8x128xf32> to vector<8x8x128xf32>
    %193 = arith.mulf %185, %192 : vector<8x8x128xf32>
    %194 = vector.extract_strided_slice %179 {offsets = [1, 0, 0], sizes = [8, 8, 128], strides = [1, 1, 1]} : vector<9x8x128xf32> to vector<8x8x128xf32>
    %195 = arith.mulf %191, %194 : vector<8x8x128xf32>
    %196 = arith.addf %193, %195 : vector<8x8x128xf32>
    %197 = vector.extract_strided_slice %196 {offsets = [0, 0, 0], sizes = [1, 8, 128], strides = [1, 1, 1]} : vector<8x8x128xf32> to vector<1x8x128xf32>
    %198 = vector.shape_cast %197 : vector<1x8x128xf32> to vector<8x128xf32>
    %199 = vector.extract_strided_slice %125 {offsets = [0, 0, 0], sizes = [1, 128, 128], strides = [1, 1, 1]} : vector<8x128x128xf32> to vector<1x128x128xf32>
    %200 = vector.shape_cast %199 : vector<1x128x128xf32> to vector<128x128xf32>
    %cst_38 = arith.constant dense<0.000000e+00> : vector<8x128xf32>
    %201 = tpu.matmul %198, %200, %cst_38 {dimension_numbers = #tpu.dot_dimension_numbers<[1], [0], [0], [1], [0, 0, 1, 1], [], []>} : vector<8x128xf32>, vector<128x128xf32>, vector<8x128xf32> -> vector<8x128xf32>
    %202 = arith.addf %132, %201 : vector<8x128xf32>
    %203 = vector.extract_strided_slice %196 {offsets = [1, 0, 0], sizes = [1, 8, 128], strides = [1, 1, 1]} : vector<8x8x128xf32> to vector<1x8x128xf32>
    %204 = vector.shape_cast %203 : vector<1x8x128xf32> to vector<8x128xf32>
    %205 = vector.extract_strided_slice %125 {offsets = [1, 0, 0], sizes = [1, 128, 128], strides = [1, 1, 1]} : vector<8x128x128xf32> to vector<1x128x128xf32>
    %206 = vector.shape_cast %205 : vector<1x128x128xf32> to vector<128x128xf32>
    %cst_39 = arith.constant dense<0.000000e+00> : vector<8x128xf32>
    %207 = tpu.matmul %204, %206, %cst_39 {dimension_numbers = #tpu.dot_dimension_numbers<[1], [0], [0], [1], [0, 0, 1, 1], [], []>} : vector<8x128xf32>, vector<128x128xf32>, vector<8x128xf32> -> vector<8x128xf32>
    %208 = arith.addf %202, %207 : vector<8x128xf32>
    %209 = vector.extract_strided_slice %196 {offsets = [2, 0, 0], sizes = [1, 8, 128], strides = [1, 1, 1]} : vector<8x8x128xf32> to vector<1x8x128xf32>
    %210 = vector.shape_cast %209 : vector<1x8x128xf32> to vector<8x128xf32>
    %211 = vector.extract_strided_slice %125 {offsets = [2, 0, 0], sizes = [1, 128, 128], strides = [1, 1, 1]} : vector<8x128x128xf32> to vector<1x128x128xf32>
    %212 = vector.shape_cast %211 : vector<1x128x128xf32> to vector<128x128xf32>
    %cst_40 = arith.constant dense<0.000000e+00> : vector<8x128xf32>
    %213 = tpu.matmul %210, %212, %cst_40 {dimension_numbers = #tpu.dot_dimension_numbers<[1], [0], [0], [1], [0, 0, 1, 1], [], []>} : vector<8x128xf32>, vector<128x128xf32>, vector<8x128xf32> -> vector<8x128xf32>
    %214 = arith.addf %208, %213 : vector<8x128xf32>
    %215 = vector.extract_strided_slice %196 {offsets = [3, 0, 0], sizes = [1, 8, 128], strides = [1, 1, 1]} : vector<8x8x128xf32> to vector<1x8x128xf32>
    %216 = vector.shape_cast %215 : vector<1x8x128xf32> to vector<8x128xf32>
    %217 = vector.extract_strided_slice %125 {offsets = [3, 0, 0], sizes = [1, 128, 128], strides = [1, 1, 1]} : vector<8x128x128xf32> to vector<1x128x128xf32>
    %218 = vector.shape_cast %217 : vector<1x128x128xf32> to vector<128x128xf32>
    %cst_41 = arith.constant dense<0.000000e+00> : vector<8x128xf32>
    %219 = tpu.matmul %216, %218, %cst_41 {dimension_numbers = #tpu.dot_dimension_numbers<[1], [0], [0], [1], [0, 0, 1, 1], [], []>} : vector<8x128xf32>, vector<128x128xf32>, vector<8x128xf32> -> vector<8x128xf32>
    %220 = arith.addf %214, %219 : vector<8x128xf32>
    %221 = vector.extract_strided_slice %196 {offsets = [4, 0, 0], sizes = [1, 8, 128], strides = [1, 1, 1]} : vector<8x8x128xf32> to vector<1x8x128xf32>
    %222 = vector.shape_cast %221 : vector<1x8x128xf32> to vector<8x128xf32>
    %223 = vector.extract_strided_slice %125 {offsets = [4, 0, 0], sizes = [1, 128, 128], strides = [1, 1, 1]} : vector<8x128x128xf32> to vector<1x128x128xf32>
    %224 = vector.shape_cast %223 : vector<1x128x128xf32> to vector<128x128xf32>
    %cst_42 = arith.constant dense<0.000000e+00> : vector<8x128xf32>
    %225 = tpu.matmul %222, %224, %cst_42 {dimension_numbers = #tpu.dot_dimension_numbers<[1], [0], [0], [1], [0, 0, 1, 1], [], []>} : vector<8x128xf32>, vector<128x128xf32>, vector<8x128xf32> -> vector<8x128xf32>
    %226 = arith.addf %220, %225 : vector<8x128xf32>
    %227 = vector.extract_strided_slice %196 {offsets = [5, 0, 0], sizes = [1, 8, 128], strides = [1, 1, 1]} : vector<8x8x128xf32> to vector<1x8x128xf32>
    %228 = vector.shape_cast %227 : vector<1x8x128xf32> to vector<8x128xf32>
    %229 = vector.extract_strided_slice %125 {offsets = [5, 0, 0], sizes = [1, 128, 128], strides = [1, 1, 1]} : vector<8x128x128xf32> to vector<1x128x128xf32>
    %230 = vector.shape_cast %229 : vector<1x128x128xf32> to vector<128x128xf32>
    %cst_43 = arith.constant dense<0.000000e+00> : vector<8x128xf32>
    %231 = tpu.matmul %228, %230, %cst_43 {dimension_numbers = #tpu.dot_dimension_numbers<[1], [0], [0], [1], [0, 0, 1, 1], [], []>} : vector<8x128xf32>, vector<128x128xf32>, vector<8x128xf32> -> vector<8x128xf32>
    %232 = arith.addf %226, %231 : vector<8x128xf32>
    %233 = vector.extract_strided_slice %196 {offsets = [6, 0, 0], sizes = [1, 8, 128], strides = [1, 1, 1]} : vector<8x8x128xf32> to vector<1x8x128xf32>
    %234 = vector.shape_cast %233 : vector<1x8x128xf32> to vector<8x128xf32>
    %235 = vector.extract_strided_slice %125 {offsets = [6, 0, 0], sizes = [1, 128, 128], strides = [1, 1, 1]} : vector<8x128x128xf32> to vector<1x128x128xf32>
    %236 = vector.shape_cast %235 : vector<1x128x128xf32> to vector<128x128xf32>
    %cst_44 = arith.constant dense<0.000000e+00> : vector<8x128xf32>
    %237 = tpu.matmul %234, %236, %cst_44 {dimension_numbers = #tpu.dot_dimension_numbers<[1], [0], [0], [1], [0, 0, 1, 1], [], []>} : vector<8x128xf32>, vector<128x128xf32>, vector<8x128xf32> -> vector<8x128xf32>
    %238 = arith.addf %232, %237 : vector<8x128xf32>
    %239 = vector.extract_strided_slice %196 {offsets = [7, 0, 0], sizes = [1, 8, 128], strides = [1, 1, 1]} : vector<8x8x128xf32> to vector<1x8x128xf32>
    %240 = vector.shape_cast %239 : vector<1x8x128xf32> to vector<8x128xf32>
    %241 = vector.extract_strided_slice %125 {offsets = [7, 0, 0], sizes = [1, 128, 128], strides = [1, 1, 1]} : vector<8x128x128xf32> to vector<1x128x128xf32>
    %242 = vector.shape_cast %241 : vector<1x128x128xf32> to vector<128x128xf32>
    %cst_45 = arith.constant dense<0.000000e+00> : vector<8x128xf32>
    %243 = tpu.matmul %240, %242, %cst_45 {dimension_numbers = #tpu.dot_dimension_numbers<[1], [0], [0], [1], [0, 0, 1, 1], [], []>} : vector<8x128xf32>, vector<128x128xf32>, vector<8x128xf32> -> vector<8x128xf32>
    %244 = arith.addf %238, %243 : vector<8x128xf32>
    %c0_46 = arith.constant 0 : index
    %c0_47 = arith.constant 0 : index
    %245 = vector.load %arg8[%c0_46, %c0_47] : memref<8x128xf32, #tpu.memory_space<vmem>>, vector<8x128xf32>
    tpu.vector_store %arg8[%c0_46, %c0_47], %244 {strides = array<i32>} : memref<8x128xf32, #tpu.memory_space<vmem>>, vector<8x128xf32>,
    return
  }
  func.func @transform_0(%arg0: i32) -> (i32, i32) {
    %c0_i32 = arith.constant 0 : i32
    %c0_i32_0 = arith.constant 0 : i32
    return %arg0, %c0_i32 : i32, i32
  }
  func.func @transform_1(%arg0: i32) -> (i32, i32) {
    %c0_i32 = arith.constant 0 : i32
    %c0_i32_0 = arith.constant 0 : i32
    %c0_i32_1 = arith.constant 0 : i32
    return %c0_i32, %c0_i32_0 : i32, i32
  }
  func.func @transform_2(%arg0: i32) -> (i32, i32) {
    %c0_i32 = arith.constant 0 : i32
    %c0_i32_0 = arith.constant 0 : i32
    %c0_i32_1 = arith.constant 0 : i32
    return %c0_i32, %c0_i32_0 : i32, i32
  }
  func.func @transform_3(%arg0: i32) -> (i32, i32, i32) {
    %c0_i32 = arith.constant 0 : i32
    %c0_i32_0 = arith.constant 0 : i32
    %c0_i32_1 = arith.constant 0 : i32
    %c0_i32_2 = arith.constant 0 : i32
    return %c0_i32, %c0_i32_0, %c0_i32_1 : i32, i32, i32
  }
  func.func @transform_4(%arg0: i32) -> (i32, i32) {
    %c0_i32 = arith.constant 0 : i32
    %c0_i32_0 = arith.constant 0 : i32
    %c0_i32_1 = arith.constant 0 : i32
    return %c0_i32, %c0_i32_0 : i32, i32
  }
  func.func @transform_5(%arg0: i32) -> (i32, i32) {
    %c0_i32 = arith.constant 0 : i32
    %c0_i32_0 = arith.constant 0 : i32
    %c0_i32_1 = arith.constant 0 : i32
    return %c0_i32, %c0_i32_0 : i32, i32
  }
  func.func @transform_6(%arg0: i32) -> (i32, i32, i32) {
    %c0_i32 = arith.constant 0 : i32
    %c0_i32_0 = arith.constant 0 : i32
    %c0_i32_1 = arith.constant 0 : i32
    %c0_i32_2 = arith.constant 0 : i32
    return %c0_i32, %c0_i32_0, %c0_i32_1 : i32, i32, i32
  }
  func.func @transform_7(%arg0: i32) -> (i32, i32) {
    %c0_i32 = arith.constant 0 : i32
    %c0_i32_0 = arith.constant 0 : i32
    return %arg0, %c0_i32 : i32, i32
  }
}

module attributes {stable_mosaic.version = 11 : i64} {
  func.func @kan_fused_kernel(%arg0: i32, %arg1: memref<8x128xf32, #tpu.memory_space<vmem>>, %arg2: memref<12x128xf32, #tpu.memory_space<vmem>>, %arg3: memref<128x128xf32, #tpu.memory_space<vmem>>, %arg4: memref<8x128x128xf32, #tpu.memory_space<vmem>>, %arg5: memref<12x128xf32, #tpu.memory_space<vmem>>, %arg6: memref<128x128xf32, #tpu.memory_space<vmem>>, %arg7: memref<8x128x128xf32, #tpu.memory_space<vmem>>, %arg8: memref<8x128xf32, #tpu.memory_space<vmem>>) attributes {dimension_semantics = [#tpu.dimension_semantics<parallel>], iteration_bounds = array<i64: 1>, scalar_prefetch = 0 : i64, scratch_operands = 0 : i64, tpu.core_type = #tpu.core_type<tc>, window_params = [{transform_indices = @transform_0, window_bounds = array<i64: 8, 128>}, {pipeline_mode = #tpu.pipeline_mode<synchronous>, transform_indices = @transform_1, window_bounds = array<i64: 12, 128>}, {pipeline_mode = #tpu.pipeline_mode<synchronous>, transform_indices = @transform_2, window_bounds = array<i64: 128, 128>}, {pipeline_mode = #tpu.pipeline_mode<synchronous>, transform_indices = @transform_3, window_bounds = array<i64: 8, 128, 128>}, {pipeline_mode = #tpu.pipeline_mode<synchronous>, transform_indices = @transform_4, window_bounds = array<i64: 12, 128>}, {pipeline_mode = #tpu.pipeline_mode<synchronous>, transform_indices = @transform_5, window_bounds = array<i64: 128, 128>}, {pipeline_mode = #tpu.pipeline_mode<synchronous>, transform_indices = @transform_6, window_bounds = array<i64: 8, 128, 128>}, {transform_indices = @transform_7, window_bounds = array<i64: 8, 128>}]} {
    %c0 = arith.constant 0 : index
    %c0_0 = arith.constant 0 : index
    %0 = vector.load %arg1[%c0, %c0_0] : memref<8x128xf32, #tpu.memory_space<vmem>>, vector<8x128xf32>
    %c0_1 = arith.constant 0 : index
    %c0_2 = arith.constant 0 : index
    %1 = vector.load %arg2[%c0_1, %c0_2] : memref<12x128xf32, #tpu.memory_space<vmem>>, vector<12x128xf32>
    %c0_3 = arith.constant 0 : index
    %c0_4 = arith.constant 0 : index
    %2 = vector.load %arg3[%c0_3, %c0_4] : memref<128x128xf32, #tpu.memory_space<vmem>>, vector<128x128xf32>
    %c0_5 = arith.constant 0 : index
    %c0_6 = arith.constant 0 : index
    %c0_7 = arith.constant 0 : index
    %3 = vector.load %arg4[%c0_5, %c0_6, %c0_7] : memref<8x128x128xf32, #tpu.memory_space<vmem>>, vector<8x128x128xf32>
    %4 = arith.negf %0 : vector<8x128xf32>
    %5 = math.exp %4 : vector<8x128xf32>
    %cst = arith.constant 1.000000e+00 : f32
    %6 = vector.broadcast %cst : f32 to vector<8x128xf32>
    %7 = arith.addf %6, %5 : vector<8x128xf32>
    %8 = arith.divf %6, %7 : vector<8x128xf32>
    %9 = arith.mulf %0, %8 : vector<8x128xf32>
    %cst_8 = arith.constant dense<0.000000e+00> : vector<8x128xf32>
    %10 = tpu.matmul %9, %2, %cst_8 {dimension_numbers = #tpu.dot_dimension_numbers<[1], [0], [0], [1], [0, 0, 1, 1], [], []>} : vector<8x128xf32>, vector<128x128xf32>, vector<8x128xf32> -> vector<8x128xf32>
    %11 = vector.shape_cast %0 : vector<8x128xf32> to vector<1x8x128xf32>
    %12 = vector.shape_cast %1 : vector<12x128xf32> to vector<12x1x128xf32>
    %13 = vector.extract_strided_slice %12 {offsets = [0, 0, 0], sizes = [11, 1, 128], strides = [1, 1, 1]} : vector<12x1x128xf32> to vector<11x1x128xf32>
    %14 = vector.broadcast %11 : vector<1x8x128xf32> to vector<11x8x128xf32>
    %15 = vector.broadcast %13 : vector<11x1x128xf32> to vector<11x8x128xf32>
    %16 = arith.cmpf oge, %14, %15 : vector<11x8x128xf32>
    %17 = vector.extract_strided_slice %12 {offsets = [1, 0, 0], sizes = [11, 1, 128], strides = [1, 1, 1]} : vector<12x1x128xf32> to vector<11x1x128xf32>
    %18 = vector.broadcast %11 : vector<1x8x128xf32> to vector<11x8x128xf32>
    %19 = vector.broadcast %17 : vector<11x1x128xf32> to vector<11x8x128xf32>
    %20 = arith.cmpf olt, %18, %19 : vector<11x8x128xf32>
    %21 = arith.andi %16, %20 : vector<11x8x128xi1>
    %22 = arith.extui %21 : vector<11x8x128xi1> to vector<11x8x128xi32>
    %23 = arith.sitofp %22 : vector<11x8x128xi32> to vector<11x8x128xf32>
    %24 = vector.extract_strided_slice %12 {offsets = [0, 0, 0], sizes = [10, 1, 128], strides = [1, 1, 1]} : vector<12x1x128xf32> to vector<10x1x128xf32>
    %25 = vector.broadcast %11 : vector<1x8x128xf32> to vector<10x8x128xf32>
    %26 = vector.broadcast %24 : vector<10x1x128xf32> to vector<10x8x128xf32>
    %27 = arith.subf %25, %26 : vector<10x8x128xf32>
    %cst_9 = arith.constant 2.500000e+00 : f32
    %28 = vector.broadcast %cst_9 : f32 to vector<10x8x128xf32>
    %29 = arith.mulf %27, %28 : vector<10x8x128xf32>
    %30 = vector.extract_strided_slice %12 {offsets = [2, 0, 0], sizes = [10, 1, 128], strides = [1, 1, 1]} : vector<12x1x128xf32> to vector<10x1x128xf32>
    %31 = vector.broadcast %30 : vector<10x1x128xf32> to vector<10x8x128xf32>
    %32 = vector.broadcast %11 : vector<1x8x128xf32> to vector<10x8x128xf32>
    %33 = arith.subf %31, %32 : vector<10x8x128xf32>
    %cst_10 = arith.constant 2.500000e+00 : f32
    %34 = vector.broadcast %cst_10 : f32 to vector<10x8x128xf32>
    %35 = arith.mulf %33, %34 : vector<10x8x128xf32>
    %36 = vector.extract_strided_slice %23 {offsets = [0, 0, 0], sizes = [10, 8, 128], strides = [1, 1, 1]} : vector<11x8x128xf32> to vector<10x8x128xf32>
    %37 = arith.mulf %29, %36 : vector<10x8x128xf32>
    %38 = vector.extract_strided_slice %23 {offsets = [1, 0, 0], sizes = [10, 8, 128], strides = [1, 1, 1]} : vector<11x8x128xf32> to vector<10x8x128xf32>
    %39 = arith.mulf %35, %38 : vector<10x8x128xf32>
    %40 = arith.addf %37, %39 : vector<10x8x128xf32>
    %41 = vector.extract_strided_slice %12 {offsets = [0, 0, 0], sizes = [9, 1, 128], strides = [1, 1, 1]} : vector<12x1x128xf32> to vector<9x1x128xf32>
    %42 = vector.broadcast %11 : vector<1x8x128xf32> to vector<9x8x128xf32>
    %43 = vector.broadcast %41 : vector<9x1x128xf32> to vector<9x8x128xf32>
    %44 = arith.subf %42, %43 : vector<9x8x128xf32>
    %cst_11 = arith.constant 1.250000e+00 : f32
    %45 = vector.broadcast %cst_11 : f32 to vector<9x8x128xf32>
    %46 = arith.mulf %44, %45 : vector<9x8x128xf32>
    %47 = vector.extract_strided_slice %12 {offsets = [3, 0, 0], sizes = [9, 1, 128], strides = [1, 1, 1]} : vector<12x1x128xf32> to vector<9x1x128xf32>
    %48 = vector.broadcast %47 : vector<9x1x128xf32> to vector<9x8x128xf32>
    %49 = vector.broadcast %11 : vector<1x8x128xf32> to vector<9x8x128xf32>
    %50 = arith.subf %48, %49 : vector<9x8x128xf32>
    %cst_12 = arith.constant 1.250000e+00 : f32
    %51 = vector.broadcast %cst_12 : f32 to vector<9x8x128xf32>
    %52 = arith.mulf %50, %51 : vector<9x8x128xf32>
    %53 = vector.extract_strided_slice %40 {offsets = [0, 0, 0], sizes = [9, 8, 128], strides = [1, 1, 1]} : vector<10x8x128xf32> to vector<9x8x128xf32>
    %54 = arith.mulf %46, %53 : vector<9x8x128xf32>
    %55 = vector.extract_strided_slice %40 {offsets = [1, 0, 0], sizes = [9, 8, 128], strides = [1, 1, 1]} : vector<10x8x128xf32> to vector<9x8x128xf32>
    %56 = arith.mulf %52, %55 : vector<9x8x128xf32>
    %57 = arith.addf %54, %56 : vector<9x8x128xf32>
    %58 = vector.extract_strided_slice %12 {offsets = [0, 0, 0], sizes = [8, 1, 128], strides = [1, 1, 1]} : vector<12x1x128xf32> to vector<8x1x128xf32>
    %59 = vector.broadcast %11 : vector<1x8x128xf32> to vector<8x8x128xf32>
    %60 = vector.broadcast %58 : vector<8x1x128xf32> to vector<8x8x128xf32>
    %61 = arith.subf %59, %60 : vector<8x8x128xf32>
    %cst_13 = arith.constant 0.833333313 : f32
    %62 = vector.broadcast %cst_13 : f32 to vector<8x8x128xf32>
    %63 = arith.mulf %61, %62 : vector<8x8x128xf32>
    %64 = vector.extract_strided_slice %12 {offsets = [4, 0, 0], sizes = [8, 1, 128], strides = [1, 1, 1]} : vector<12x1x128xf32> to vector<8x1x128xf32>
    %65 = vector.broadcast %64 : vector<8x1x128xf32> to vector<8x8x128xf32>
    %66 = vector.broadcast %11 : vector<1x8x128xf32> to vector<8x8x128xf32>
    %67 = arith.subf %65, %66 : vector<8x8x128xf32>
    %cst_14 = arith.constant 0.833333313 : f32
    %68 = vector.broadcast %cst_14 : f32 to vector<8x8x128xf32>
    %69 = arith.mulf %67, %68 : vector<8x8x128xf32>
    %70 = vector.extract_strided_slice %57 {offsets = [0, 0, 0], sizes = [8, 8, 128], strides = [1, 1, 1]} : vector<9x8x128xf32> to vector<8x8x128xf32>
    %71 = arith.mulf %63, %70 : vector<8x8x128xf32>
    %72 = vector.extract_strided_slice %57 {offsets = [1, 0, 0], sizes = [8, 8, 128], strides = [1, 1, 1]} : vector<9x8x128xf32> to vector<8x8x128xf32>
    %73 = arith.mulf %69, %72 : vector<8x8x128xf32>
    %74 = arith.addf %71, %73 : vector<8x8x128xf32>
    %75 = vector.extract_strided_slice %74 {offsets = [0, 0, 0], sizes = [1, 8, 128], strides = [1, 1, 1]} : vector<8x8x128xf32> to vector<1x8x128xf32>
    %76 = vector.shape_cast %75 : vector<1x8x128xf32> to vector<8x128xf32>
    %77 = vector.extract_strided_slice %3 {offsets = [0, 0, 0], sizes = [1, 128, 128], strides = [1, 1, 1]} : vector<8x128x128xf32> to vector<1x128x128xf32>
    %78 = vector.shape_cast %77 : vector<1x128x128xf32> to vector<128x128xf32>
    %cst_15 = arith.constant dense<0.000000e+00> : vector<8x128xf32>
    %79 = tpu.matmul %76, %78, %cst_15 {dimension_numbers = #tpu.dot_dimension_numbers<[1], [0], [0], [1], [0, 0, 1, 1], [], []>} : vector<8x128xf32>, vector<128x128xf32>, vector<8x128xf32> -> vector<8x128xf32>
    %80 = arith.addf %10, %79 : vector<8x128xf32>
    %81 = vector.extract_strided_slice %74 {offsets = [1, 0, 0], sizes = [1, 8, 128], strides = [1, 1, 1]} : vector<8x8x128xf32> to vector<1x8x128xf32>
    %82 = vector.shape_cast %81 : vector<1x8x128xf32> to vector<8x128xf32>
    %83 = vector.extract_strided_slice %3 {offsets = [1, 0, 0], sizes = [1, 128, 128], strides = [1, 1, 1]} : vector<8x128x128xf32> to vector<1x128x128xf32>
    %84 = vector.shape_cast %83 : vector<1x128x128xf32> to vector<128x128xf32>
    %cst_16 = arith.constant dense<0.000000e+00> : vector<8x128xf32>
    %85 = tpu.matmul %82, %84, %cst_16 {dimension_numbers = #tpu.dot_dimension_numbers<[1], [0], [0], [1], [0, 0, 1, 1], [], []>} : vector<8x128xf32>, vector<128x128xf32>, vector<8x128xf32> -> vector<8x128xf32>
    %86 = arith.addf %80, %85 : vector<8x128xf32>
    %87 = vector.extract_strided_slice %74 {offsets = [2, 0, 0], sizes = [1, 8, 128], strides = [1, 1, 1]} : vector<8x8x128xf32> to vector<1x8x128xf32>
    %88 = vector.shape_cast %87 : vector<1x8x128xf32> to vector<8x128xf32>
    %89 = vector.extract_strided_slice %3 {offsets = [2, 0, 0], sizes = [1, 128, 128], strides = [1, 1, 1]} : vector<8x128x128xf32> to vector<1x128x128xf32>
    %90 = vector.shape_cast %89 : vector<1x128x128xf32> to vector<128x128xf32>
    %cst_17 = arith.constant dense<0.000000e+00> : vector<8x128xf32>
    %91 = tpu.matmul %88, %90, %cst_17 {dimension_numbers = #tpu.dot_dimension_numbers<[1], [0], [0], [1], [0, 0, 1, 1], [], []>} : vector<8x128xf32>, vector<128x128xf32>, vector<8x128xf32> -> vector<8x128xf32>
    %92 = arith.addf %86, %91 : vector<8x128xf32>
    %93 = vector.extract_strided_slice %74 {offsets = [3, 0, 0], sizes = [1, 8, 128], strides = [1, 1, 1]} : vector<8x8x128xf32> to vector<1x8x128xf32>
    %94 = vector.shape_cast %93 : vector<1x8x128xf32> to vector<8x128xf32>
    %95 = vector.extract_strided_slice %3 {offsets = [3, 0, 0], sizes = [1, 128, 128], strides = [1, 1, 1]} : vector<8x128x128xf32> to vector<1x128x128xf32>
    %96 = vector.shape_cast %95 : vector<1x128x128xf32> to vector<128x128xf32>
    %cst_18 = arith.constant dense<0.000000e+00> : vector<8x128xf32>
    %97 = tpu.matmul %94, %96, %cst_18 {dimension_numbers = #tpu.dot_dimension_numbers<[1], [0], [0], [1], [0, 0, 1, 1], [], []>} : vector<8x128xf32>, vector<128x128xf32>, vector<8x128xf32> -> vector<8x128xf32>
    %98 = arith.addf %92, %97 : vector<8x128xf32>
    %99 = vector.extract_strided_slice %74 {offsets = [4, 0, 0], sizes = [1, 8, 128], strides = [1, 1, 1]} : vector<8x8x128xf32> to vector<1x8x128xf32>
    %100 = vector.shape_cast %99 : vector<1x8x128xf32> to vector<8x128xf32>
    %101 = vector.extract_strided_slice %3 {offsets = [4, 0, 0], sizes = [1, 128, 128], strides = [1, 1, 1]} : vector<8x128x128xf32> to vector<1x128x128xf32>
    %102 = vector.shape_cast %101 : vector<1x128x128xf32> to vector<128x128xf32>
    %cst_19 = arith.constant dense<0.000000e+00> : vector<8x128xf32>
    %103 = tpu.matmul %100, %102, %cst_19 {dimension_numbers = #tpu.dot_dimension_numbers<[1], [0], [0], [1], [0, 0, 1, 1], [], []>} : vector<8x128xf32>, vector<128x128xf32>, vector<8x128xf32> -> vector<8x128xf32>
    %104 = arith.addf %98, %103 : vector<8x128xf32>
    %105 = vector.extract_strided_slice %74 {offsets = [5, 0, 0], sizes = [1, 8, 128], strides = [1, 1, 1]} : vector<8x8x128xf32> to vector<1x8x128xf32>
    %106 = vector.shape_cast %105 : vector<1x8x128xf32> to vector<8x128xf32>
    %107 = vector.extract_strided_slice %3 {offsets = [5, 0, 0], sizes = [1, 128, 128], strides = [1, 1, 1]} : vector<8x128x128xf32> to vector<1x128x128xf32>
    %108 = vector.shape_cast %107 : vector<1x128x128xf32> to vector<128x128xf32>
    %cst_20 = arith.constant dense<0.000000e+00> : vector<8x128xf32>
    %109 = tpu.matmul %106, %108, %cst_20 {dimension_numbers = #tpu.dot_dimension_numbers<[1], [0], [0], [1], [0, 0, 1, 1], [], []>} : vector<8x128xf32>, vector<128x128xf32>, vector<8x128xf32> -> vector<8x128xf32>
    %110 = arith.addf %104, %109 : vector<8x128xf32>
    %111 = vector.extract_strided_slice %74 {offsets = [6, 0, 0], sizes = [1, 8, 128], strides = [1, 1, 1]} : vector<8x8x128xf32> to vector<1x8x128xf32>
    %112 = vector.shape_cast %111 : vector<1x8x128xf32> to vector<8x128xf32>
    %113 = vector.extract_strided_slice %3 {offsets = [6, 0, 0], sizes = [1, 128, 128], strides = [1, 1, 1]} : vector<8x128x128xf32> to vector<1x128x128xf32>
    %114 = vector.shape_cast %113 : vector<1x128x128xf32> to vector<128x128xf32>
    %cst_21 = arith.constant dense<0.000000e+00> : vector<8x128xf32>
    %115 = tpu.matmul %112, %114, %cst_21 {dimension_numbers = #tpu.dot_dimension_numbers<[1], [0], [0], [1], [0, 0, 1, 1], [], []>} : vector<8x128xf32>, vector<128x128xf32>, vector<8x128xf32> -> vector<8x128xf32>
    %116 = arith.addf %110, %115 : vector<8x128xf32>
    %117 = vector.extract_strided_slice %74 {offsets = [7, 0, 0], sizes = [1, 8, 128], strides = [1, 1, 1]} : vector<8x8x128xf32> to vector<1x8x128xf32>
    %118 = vector.shape_cast %117 : vector<1x8x128xf32> to vector<8x128xf32>
    %119 = vector.extract_strided_slice %3 {offsets = [7, 0, 0], sizes = [1, 128, 128], strides = [1, 1, 1]} : vector<8x128x128xf32> to vector<1x128x128xf32>
    %120 = vector.shape_cast %119 : vector<1x128x128xf32> to vector<128x128xf32>
    %cst_22 = arith.constant dense<0.000000e+00> : vector<8x128xf32>
    %121 = tpu.matmul %118, %120, %cst_22 {dimension_numbers = #tpu.dot_dimension_numbers<[1], [0], [0], [1], [0, 0, 1, 1], [], []>} : vector<8x128xf32>, vector<128x128xf32>, vector<8x128xf32> -> vector<8x128xf32>
    %122 = arith.addf %116, %121 : vector<8x128xf32>
    %c0_23 = arith.constant 0 : index
    %c0_24 = arith.constant 0 : index
    %123 = vector.load %arg5[%c0_23, %c0_24] : memref<12x128xf32, #tpu.memory_space<vmem>>, vector<12x128xf32>
    %c0_25 = arith.constant 0 : index
    %c0_26 = arith.constant 0 : index
    %124 = vector.load %arg6[%c0_25, %c0_26] : memref<128x128xf32, #tpu.memory_space<vmem>>, vector<128x128xf32>
    %c0_27 = arith.constant 0 : index
    %c0_28 = arith.constant 0 : index
    %c0_29 = arith.constant 0 : index
    %125 = vector.load %arg7[%c0_27, %c0_28, %c0_29] : memref<8x128x128xf32, #tpu.memory_space<vmem>>, vector<8x128x128xf32>
    %126 = arith.negf %122 : vector<8x128xf32>
    %127 = math.exp %126 : vector<8x128xf32>
    %cst_30 = arith.constant 1.000000e+00 : f32
    %128 = vector.broadcast %cst_30 : f32 to vector<8x128xf32>
    %129 = arith.addf %128, %127 : vector<8x128xf32>
    %130 = arith.divf %128, %129 : vector<8x128xf32>
    %131 = arith.mulf %122, %130 : vector<8x128xf32>
    %cst_31 = arith.constant dense<0.000000e+00> : vector<8x128xf32>
    %132 = tpu.matmul %131, %124, %cst_31 {dimension_numbers = #tpu.dot_dimension_numbers<[1], [0], [0], [1], [0, 0, 1, 1], [], []>} : vector<8x128xf32>, vector<128x128xf32>, vector<8x128xf32> -> vector<8x128xf32>
    %133 = vector.shape_cast %122 : vector<8x128xf32> to vector<1x8x128xf32>
    %134 = vector.shape_cast %123 : vector<12x128xf32> to vector<12x1x128xf32>
    %135 = vector.extract_strided_slice %134 {offsets = [0, 0, 0], sizes = [11, 1, 128], strides = [1, 1, 1]} : vector<12x1x128xf32> to vector<11x1x128xf32>
    %136 = vector.broadcast %133 : vector<1x8x128xf32> to vector<11x8x128xf32>
    %137 = vector.broadcast %135 : vector<11x1x128xf32> to vector<11x8x128xf32>
    %138 = arith.cmpf oge, %136, %137 : vector<11x8x128xf32>
    %139 = vector.extract_strided_slice %134 {offsets = [1, 0, 0], sizes = [11, 1, 128], strides = [1, 1, 1]} : vector<12x1x128xf32> to vector<11x1x128xf32>
    %140 = vector.broadcast %133 : vector<1x8x128xf32> to vector<11x8x128xf32>
    %141 = vector.broadcast %139 : vector<11x1x128xf32> to vector<11x8x128xf32>
    %142 = arith.cmpf olt, %140, %141 : vector<11x8x128xf32>
    %143 = arith.andi %138, %142 : vector<11x8x128xi1>
    %144 = arith.extui %143 : vector<11x8x128xi1> to vector<11x8x128xi32>
    %145 = arith.sitofp %144 : vector<11x8x128xi32> to vector<11x8x128xf32>
    %146 = vector.extract_strided_slice %134 {offsets = [0, 0, 0], sizes = [10, 1, 128], strides = [1, 1, 1]} : vector<12x1x128xf32> to vector<10x1x128xf32>
    %147 = vector.broadcast %133 : vector<1x8x128xf32> to vector<10x8x128xf32>
    %148 = vector.broadcast %146 : vector<10x1x128xf32> to vector<10x8x128xf32>
    %149 = arith.subf %147, %148 : vector<10x8x128xf32>
    %cst_32 = arith.constant 2.500000e+00 : f32
    %150 = vector.broadcast %cst_32 : f32 to vector<10x8x128xf32>
    %151 = arith.mulf %149, %150 : vector<10x8x128xf32>
    %152 = vector.extract_strided_slice %134 {offsets = [2, 0, 0], sizes = [10, 1, 128], strides = [1, 1, 1]} : vector<12x1x128xf32> to vector<10x1x128xf32>
    %153 = vector.broadcast %152 : vector<10x1x128xf32> to vector<10x8x128xf32>
    %154 = vector.broadcast %133 : vector<1x8x128xf32> to vector<10x8x128xf32>
    %155 = arith.subf %153, %154 : vector<10x8x128xf32>
    %cst_33 = arith.constant 2.500000e+00 : f32
    %156 = vector.broadcast %cst_33 : f32 to vector<10x8x128xf32>
    %157 = arith.mulf %155, %156 : vector<10x8x128xf32>
    %158 = vector.extract_strided_slice %145 {offsets = [0, 0, 0], sizes = [10, 8, 128], strides = [1, 1, 1]} : vector<11x8x128xf32> to vector<10x8x128xf32>
    %159 = arith.mulf %151, %158 : vector<10x8x128xf32>
    %160 = vector.extract_strided_slice %145 {offsets = [1, 0, 0], sizes = [10, 8, 128], strides = [1, 1, 1]} : vector<11x8x128xf32> to vector<10x8x128xf32>
    %161 = arith.mulf %157, %160 : vector<10x8x128xf32>
    %162 = arith.addf %159, %161 : vector<10x8x128xf32>
    %163 = vector.extract_strided_slice %134 {offsets = [0, 0, 0], sizes = [9, 1, 128], strides = [1, 1, 1]} : vector<12x1x128xf32> to vector<9x1x128xf32>
    %164 = vector.broadcast %133 : vector<1x8x128xf32> to vector<9x8x128xf32>
    %165 = vector.broadcast %163 : vector<9x1x128xf32> to vector<9x8x128xf32>
    %166 = arith.subf %164, %165 : vector<9x8x128xf32>
    %cst_34 = arith.constant 1.250000e+00 : f32
    %167 = vector.broadcast %cst_34 : f32 to vector<9x8x128xf32>
    %168 = arith.mulf %166, %167 : vector<9x8x128xf32>
    %169 = vector.extract_strided_slice %134 {offsets = [3, 0, 0], sizes = [9, 1, 128], strides = [1, 1, 1]} : vector<12x1x128xf32> to vector<9x1x128xf32>
    %170 = vector.broadcast %169 : vector<9x1x128xf32> to vector<9x8x128xf32>
    %171 = vector.broadcast %133 : vector<1x8x128xf32> to vector<9x8x128xf32>
    %172 = arith.subf %170, %171 : vector<9x8x128xf32>
    %cst_35 = arith.constant 1.250000e+00 : f32
    %173 = vector.broadcast %cst_35 : f32 to vector<9x8x128xf32>
    %174 = arith.mulf %172, %173 : vector<9x8x128xf32>
    %175 = vector.extract_strided_slice %162 {offsets = [0, 0, 0], sizes = [9, 8, 128], strides = [1, 1, 1]} : vector<10x8x128xf32> to vector<9x8x128xf32>
    %176 = arith.mulf %168, %175 : vector<9x8x128xf32>
    %177 = vector.extract_strided_slice %162 {offsets = [1, 0, 0], sizes = [9, 8, 128], strides = [1, 1, 1]} : vector<10x8x128xf32> to vector<9x8x128xf32>
    %178 = arith.mulf %174, %177 : vector<9x8x128xf32>
    %179 = arith.addf %176, %178 : vector<9x8x128xf32>
    %180 = vector.extract_strided_slice %134 {offsets = [0, 0, 0], sizes = [8, 1, 128], strides = [1, 1, 1]} : vector<12x1x128xf32> to vector<8x1x128xf32>
    %181 = vector.broadcast %133 : vector<1x8x128xf32> to vector<8x8x128xf32>
    %182 = vector.broadcast %180 : vector<8x1x128xf32> to vector<8x8x128xf32>
    %183 = arith.subf %181, %182 : vector<8x8x128xf32>
    %cst_36 = arith.constant 0.833333313 : f32
    %184 = vector.broadcast %cst_36 : f32 to vector<8x8x128xf32>
    %185 = arith.mulf %183, %184 : vector<8x8x128xf32>
    %186 = vector.extract_strided_slice %134 {offsets = [4, 0, 0], sizes = [8, 1, 128], strides = [1, 1, 1]} : vector<12x1x128xf32> to vector<8x1x128xf32>
    %187 = vector.broadcast %186 : vector<8x1x128xf32> to vector<8x8x128xf32>
    %188 = vector.broadcast %133 : vector<1x8x128xf32> to vector<8x8x128xf32>
    %189 = arith.subf %187, %188 : vector<8x8x128xf32>
    %cst_37 = arith.constant 0.833333313 : f32
    %190 = vector.broadcast %cst_37 : f32 to vector<8x8x128xf32>
    %191 = arith.mulf %189, %190 : vector<8x8x128xf32>
    %192 = vector.extract_strided_slice %179 {offsets = [0, 0, 0], sizes = [8, 8, 128], strides = [1, 1, 1]} : vector<9x8x128xf32> to vector<8x8x128xf32>
    %193 = arith.mulf %185, %192 : vector<8x8x128xf32>
    %194 = vector.extract_strided_slice %179 {offsets = [1, 0, 0], sizes = [8, 8, 128], strides = [1, 1, 1]} : vector<9x8x128xf32> to vector<8x8x128xf32>
    %195 = arith.mulf %191, %194 : vector<8x8x128xf32>
    %196 = arith.addf %193, %195 : vector<8x8x128xf32>
    %197 = vector.extract_strided_slice %196 {offsets = [0, 0, 0], sizes = [1, 8, 128], strides = [1, 1, 1]} : vector<8x8x128xf32> to vector<1x8x128xf32>
    %198 = vector.shape_cast %197 : vector<1x8x128xf32> to vector<8x128xf32>
    %199 = vector.extract_strided_slice %125 {offsets = [0, 0, 0], sizes = [1, 128, 128], strides = [1, 1, 1]} : vector<8x128x128xf32> to vector<1x128x128xf32>
    %200 = vector.shape_cast %199 : vector<1x128x128xf32> to vector<128x128xf32>
    %cst_38 = arith.constant dense<0.000000e+00> : vector<8x128xf32>
    %201 = tpu.matmul %198, %200, %cst_38 {dimension_numbers = #tpu.dot_dimension_numbers<[1], [0], [0], [1], [0, 0, 1, 1], [], []>} : vector<8x128xf32>, vector<128x128xf32>, vector<8x128xf32> -> vector<8x128xf32>
    %202 = arith.addf %132, %201 : vector<8x128xf32>
    %203 = vector.extract_strided_slice %196 {offsets = [1, 0, 0], sizes = [1, 8, 128], strides = [1, 1, 1]} : vector<8x8x128xf32> to vector<1x8x128xf32>
    %204 = vector.shape_cast %203 : vector<1x8x128xf32> to vector<8x128xf32>
    %205 = vector.extract_strided_slice %125 {offsets = [1, 0, 0], sizes = [1, 128, 128], strides = [1, 1, 1]} : vector<8x128x128xf32> to vector<1x128x128xf32>
    %206 = vector.shape_cast %205 : vector<1x128x128xf32> to vector<128x128xf32>
    %cst_39 = arith.constant dense<0.000000e+00> : vector<8x128xf32>
    %207 = tpu.matmul %204, %206, %cst_39 {dimension_numbers = #tpu.dot_dimension_numbers<[1], [0], [0], [1], [0, 0, 1, 1], [], []>} : vector<8x128xf32>, vector<128x128xf32>, vector<8x128xf32> -> vector<8x128xf32>
    %208 = arith.addf %202, %207 : vector<8x128xf32>
    %209 = vector.extract_strided_slice %196 {offsets = [2, 0, 0], sizes = [1, 8, 128], strides = [1, 1, 1]} : vector<8x8x128xf32> to vector<1x8x128xf32>
    %210 = vector.shape_cast %209 : vector<1x8x128xf32> to vector<8x128xf32>
    %211 = vector.extract_strided_slice %125 {offsets = [2, 0, 0], sizes = [1, 128, 128], strides = [1, 1, 1]} : vector<8x128x128xf32> to vector<1x128x128xf32>
    %212 = vector.shape_cast %211 : vector<1x128x128xf32> to vector<128x128xf32>
    %cst_40 = arith.constant dense<0.000000e+00> : vector<8x128xf32>
    %213 = tpu.matmul %210, %212, %cst_40 {dimension_numbers = #tpu.dot_dimension_numbers<[1], [0], [0], [1], [0, 0, 1, 1], [], []>} : vector<8x128xf32>, vector<128x128xf32>, vector<8x128xf32> -> vector<8x128xf32>
    %214 = arith.addf %208, %213 : vector<8x128xf32>
    %215 = vector.extract_strided_slice %196 {offsets = [3, 0, 0], sizes = [1, 8, 128], strides = [1, 1, 1]} : vector<8x8x128xf32> to vector<1x8x128xf32>
    %216 = vector.shape_cast %215 : vector<1x8x128xf32> to vector<8x128xf32>
    %217 = vector.extract_strided_slice %125 {offsets = [3, 0, 0], sizes = [1, 128, 128], strides = [1, 1, 1]} : vector<8x128x128xf32> to vector<1x128x128xf32>
    %218 = vector.shape_cast %217 : vector<1x128x128xf32> to vector<128x128xf32>
    %cst_41 = arith.constant dense<0.000000e+00> : vector<8x128xf32>
    %219 = tpu.matmul %216, %218, %cst_41 {dimension_numbers = #tpu.dot_dimension_numbers<[1], [0], [0], [1], [0, 0, 1, 1], [], []>} : vector<8x128xf32>, vector<128x128xf32>, vector<8x128xf32> -> vector<8x128xf32>
    %220 = arith.addf %214, %219 : vector<8x128xf32>
    %221 = vector.extract_strided_slice %196 {offsets = [4, 0, 0], sizes = [1, 8, 128], strides = [1, 1, 1]} : vector<8x8x128xf32> to vector<1x8x128xf32>
    %222 = vector.shape_cast %221 : vector<1x8x128xf32> to vector<8x128xf32>
    %223 = vector.extract_strided_slice %125 {offsets = [4, 0, 0], sizes = [1, 128, 128], strides = [1, 1, 1]} : vector<8x128x128xf32> to vector<1x128x128xf32>
    %224 = vector.shape_cast %223 : vector<1x128x128xf32> to vector<128x128xf32>
    %cst_42 = arith.constant dense<0.000000e+00> : vector<8x128xf32>
    %225 = tpu.matmul %222, %224, %cst_42 {dimension_numbers = #tpu.dot_dimension_numbers<[1], [0], [0], [1], [0, 0, 1, 1], [], []>} : vector<8x128xf32>, vector<128x128xf32>, vector<8x128xf32> -> vector<8x128xf32>
    %226 = arith.addf %220, %225 : vector<8x128xf32>
    %227 = vector.extract_strided_slice %196 {offsets = [5, 0, 0], sizes = [1, 8, 128], strides = [1, 1, 1]} : vector<8x8x128xf32> to vector<1x8x128xf32>
    %228 = vector.shape_cast %227 : vector<1x8x128xf32> to vector<8x128xf32>
    %229 = vector.extract_strided_slice %125 {offsets = [5, 0, 0], sizes = [1, 128, 128], strides = [1, 1, 1]} : vector<8x128x128xf32> to vector<1x128x128xf32>
    %230 = vector.shape_cast %229 : vector<1x128x128xf32> to vector<128x128xf32>
    %cst_43 = arith.constant dense<0.000000e+00> : vector<8x128xf32>
    %231 = tpu.matmul %228, %230, %cst_43 {dimension_numbers = #tpu.dot_dimension_numbers<[1], [0], [0], [1], [0, 0, 1, 1], [], []>} : vector<8x128xf32>, vector<128x128xf32>, vector<8x128xf32> -> vector<8x128xf32>
    %232 = arith.addf %226, %231 : vector<8x128xf32>
    %233 = vector.extract_strided_slice %196 {offsets = [6, 0, 0], sizes = [1, 8, 128], strides = [1, 1, 1]} : vector<8x8x128xf32> to vector<1x8x128xf32>
    %234 = vector.shape_cast %233 : vector<1x8x128xf32> to vector<8x128xf32>
    %235 = vector.extract_strided_slice %125 {offsets = [6, 0, 0], sizes = [1, 128, 128], strides = [1, 1, 1]} : vector<8x128x128xf32> to vector<1x128x128xf32>
    %236 = vector.shape_cast %235 : vector<1x128x128xf32> to vector<128x128xf32>
    %cst_44 = arith.constant dense<0.000000e+00> : vector<8x128xf32>
    %237 = tpu.matmul %234, %236, %cst_44 {dimension_numbers = #tpu.dot_dimension_numbers<[1], [0], [0], [1], [0, 0, 1, 1], [], []>} : vector<8x128xf32>, vector<128x128xf32>, vector<8x128xf32> -> vector<8x128xf32>
    %238 = arith.addf %232, %237 : vector<8x128xf32>
    %239 = vector.extract_strided_slice %196 {offsets = [7, 0, 0], sizes = [1, 8, 128], strides = [1, 1, 1]} : vector<8x8x128xf32> to vector<1x8x128xf32>
    %240 = vector.shape_cast %239 : vector<1x8x128xf32> to vector<8x128xf32>
    %241 = vector.extract_strided_slice %125 {offsets = [7, 0, 0], sizes = [1, 128, 128], strides = [1, 1, 1]} : vector<8x128x128xf32> to vector<1x128x128xf32>
    %242 = vector.shape_cast %241 : vector<1x128x128xf32> to vector<128x128xf32>
    %cst_45 = arith.constant dense<0.000000e+00> : vector<8x128xf32>
    %243 = tpu.matmul %240, %242, %cst_45 {dimension_numbers = #tpu.dot_dimension_numbers<[1], [0], [0], [1], [0, 0, 1, 1], [], []>} : vector<8x128xf32>, vector<128x128xf32>, vector<8x128xf32> -> vector<8x128xf32>
    %244 = arith.addf %238, %243 : vector<8x128xf32>
    %c0_46 = arith.constant 0 : index
    %c0_47 = arith.constant 0 : index
    %245 = vector.load %arg8[%c0_46, %c0_47] : memref<8x128xf32, #tpu.memory_space<vmem>>, vector<8x128xf32>
    tpu.vector_store %arg8[%c0_46, %c0_47], %244 {strides = array<i32>} : memref<8x128xf32, #tpu.memory_space<vmem>>, vector<8x128xf32>,
    return
  }
  func.func @transform_0(%arg0: i32) -> (i32, i32) {
    %c0_i32 = arith.constant 0 : i32
    %c0_i32_0 = arith.constant 0 : i32
    return %arg0, %c0_i32 : i32, i32
  }
  func.func @transform_1(%arg0: i32) -> (i32, i32) {
    %c0_i32 = arith.constant 0 : i32
    %c0_i32_0 = arith.constant 0 : i32
    %c0_i32_1 = arith.constant 0 : i32
    return %c0_i32, %c0_i32_0 : i32, i32
  }
  func.func @transform_2(%arg0: i32) -> (i32, i32) {
    %c0_i32 = arith.constant 0 : i32
    %c0_i32_0 = arith.constant 0 : i32
    %c0_i32_1 = arith.constant 0 : i32
    return %c0_i32, %c0_i32_0 : i32, i32
  }
  func.func @transform_3(%arg0: i32) -> (i32, i32, i32) {
    %c0_i32 = arith.constant 0 : i32
    %c0_i32_0 = arith.constant 0 : i32
    %c0_i32_1 = arith.constant 0 : i32
    %c0_i32_2 = arith.constant 0 : i32
    return %c0_i32, %c0_i32_0, %c0_i32_1 : i32, i32, i32
  }
  func.func @transform_4(%arg0: i32) -> (i32, i32) {
    %c0_i32 = arith.constant 0 : i32
    %c0_i32_0 = arith.constant 0 : i32
    %c0_i32_1 = arith.constant 0 : i32
    return %c0_i32, %c0_i32_0 : i32, i32
  }
  func.func @transform_5(%arg0: i32) -> (i32, i32) {
    %c0_i32 = arith.constant 0 : i32
    %c0_i32_0 = arith.constant 0 : i32
    %c0_i32_1 = arith.constant 0 : i32
    return %c0_i32, %c0_i32_0 : i32, i32
  }
  func.func @transform_6(%arg0: i32) -> (i32, i32, i32) {
    %c0_i32 = arith.constant 0 : i32
    %c0_i32_0 = arith.constant 0 : i32
    %c0_i32_1 = arith.constant 0 : i32
    %c0_i32_2 = arith.constant 0 : i32
    return %c0_i32, %c0_i32_0, %c0_i32_1 : i32, i32, i32
  }
  func.func @transform_7(%arg0: i32) -> (i32, i32) {
    %c0_i32 = arith.constant 0 : i32
    %c0_i32_0 = arith.constant 0 : i32
    return %arg0, %c0_i32 : i32, i32
  }
}

</mosaic_0001>

<bundles_post_ra>
// kernel: tpu_custom_call.1
= control target key start
LH: loop header
LB: loop body
LE: loop exit
PB: predicated region body
PF: predicated region fallthrough
CT: control target
= control target key end

     0   :  { %12 = vsyncpa [#allocation3], 0  ;;  %s4871_s0 = inlined_call_operand.hbm [shape: f32[8,128], index: 0, kind: input, shape index: {}]   ;;  %s4872_s1 = inlined_call_operand.hbm [shape: f32[12,128], index: 1, kind: input, shape index: {}]   ;;  %s4873_s2 = inlined_call_operand.hbm [shape: f32[128,128], index: 2, kind: input, shape index: {}]   ;;  %s4874_s3 = inlined_call_operand.hbm [shape: f32[8,128,128], index: 3, kind: input, shape index: {}]   ;;  %s4875_s4 = inlined_call_operand.hbm [shape: f32[12,128], index: 4, kind: input, shape index: {}]   ;;  %s4876_s5 = inlined_call_operand.hbm [shape: f32[128,128], index: 5, kind: input, shape index: {}]   ;;  %s4877_s6 = inlined_call_operand.hbm [shape: f32[8,128,128], index: 6, kind: input, shape index: {}]   ;;  %s4878_s7 = inlined_call_operand.hbm [shape: f32[8,128], index: 7, kind: output, shape index: {}]  }
   0x1   :  { %13 = vsyncpa [#allocation6], 0 }
   0x2   :  { %14 = vsyncpa [#allocation9], 0 }
   0x3   :  { %15 = vsyncpa [#allocation12], 0 }
   0x4   :  { %16 = vsyncpa [#allocation4], 0  ;;  %s4046_s24 = smov [#allocation5]   ;;  %s3860_s28 = scalar_lea.hbm %s4872_s1, 256 }
   0x5   :  { %s32_s25 = sshll.u32 %s4046_s24, 4  ;;  %p3861_p0 = scmp.ne.s32.totalorder %s4872_s1, %s3860_s28  ;;  %s33_s25 = int_to_ptr.vmem [resolvable:$true] %s32_s25 }
   0x6   :  { %p3864_p1 = scmp.lt.u32.totalorder %s3860_s28, %s4872_s1 }
   0x8   :  { %p3866_p2 = pnand %p3864_p1, %p3861_p0 }
   0xa   :  { %3869 = shalt.err (!%p3866_p2)
}
   0xb   :  { %s3870_s10 = scalar_lea.vmem %s33_s25, 256  ;;  %p3875_p4 = scmp.lt.s32.totalorder %s33_s25, %s33_s25 }
   0xc   :  { %p3871_p3 = scmp.ne.s32.totalorder %s33_s25, %s3870_s10  ;;  %p3876_p5 = scmp.lt.s32.totalorder %s3870_s10, %s3870_s10 }
   0xe   :  { %p3877_p6 = por %p3876_p5, %p3875_p4 }
  0x10   :  { %p3878_p7 = pnand %p3877_p6, %p3871_p3 }
  0x12   :  { %3881 = shalt.err (!%p3878_p7)
}
  0x13   :  { %s4047_s11 = smov 128   ;;  %s4048_s12 = smov 8  }
  0x14   :  { %38 = dma.hbm_to_vmem [thread:$0]  %s4872_s1, 256, %s33_s25, [#allocation6], %s4047_s11, %s4047_s11, %s4048_s12  }
  0x15   :  { %s4049_s15 = smov [#allocation8]   ;;  %s4050_s17 = smov [#allocation11]  }
  0x16   :  { %s56_s16 = sshll.u32 %s4049_s15, 4  ;;  %s80_s18 = sshll.u32 %s4050_s17, 4  ;;  %s57_s16 = int_to_ptr.vmem [resolvable:$true] %s56_s16  ;;  %s81_s18 = int_to_ptr.vmem [resolvable:$true] %s80_s18 }
  0x17   :  { %s3882_s21 = scalar_lea.hbm %s4874_s3, 16384 }
  0x18   :  { %p3883_p8 = scmp.ne.s32.totalorder %s4874_s3, %s3882_s21  ;;  %p3886_p9 = scmp.lt.u32.totalorder %s3882_s21, %s4874_s3 }
  0x1a   :  { %p3888_p10 = pnand %p3886_p9, %p3883_p8 }
  0x1c   :  { %3891 = shalt.err (!%p3888_p10)
}
  0x1d   :  { %s3892_s1 = scalar_lea.vmem %s57_s16, 16384  ;;  %p3897_p12 = scmp.lt.s32.totalorder %s57_s16, %s57_s16 }
  0x1e   :  { %p3893_p11 = scmp.ne.s32.totalorder %s57_s16, %s3892_s1  ;;  %p3898_p13 = scmp.lt.s32.totalorder %s3892_s1, %s3892_s1 }
  0x20   :  { %p3899_p0 = por %p3898_p13, %p3897_p12 }
  0x22   :  { %p3900_p1 = pnand %p3899_p0, %p3893_p11 }
  0x24   :  { %3903 = shalt.err (!%p3900_p1)
}
  0x25   :  { %62 = dma.hbm_to_vmem [thread:$0]  %s4874_s3, 16384, %s57_s16, [#allocation9], %s4047_s11, %s4047_s11, %s4048_s12  }
  0x26   :  { %s3904_s30 = scalar_lea.hbm %s4876_s5, 2048 }
  0x27   :  { %p3905_p2 = scmp.ne.s32.totalorder %s4876_s5, %s3904_s30  ;;  %p3908_p3 = scmp.lt.u32.totalorder %s3904_s30, %s4876_s5 }
  0x29   :  { %p3910_p4 = pnand %p3908_p3, %p3905_p2 }
  0x2b   :  { %3913 = shalt.err (!%p3910_p4)
}
  0x2c   :  { %s3914_s14 = scalar_lea.vmem %s81_s18, 2048  ;;  %p3919_p6 = scmp.lt.s32.totalorder %s81_s18, %s81_s18 }
  0x2d   :  { %p3915_p5 = scmp.ne.s32.totalorder %s81_s18, %s3914_s14  ;;  %p3920_p7 = scmp.lt.s32.totalorder %s3914_s14, %s3914_s14 }
  0x2f   :  { %p3921_p8 = por %p3920_p7, %p3919_p6 }
  0x31   :  { %p3922_p9 = pnand %p3921_p8, %p3915_p5 }
  0x33   :  { %3925 = shalt.err (!%p3922_p9)
}
  0x34   :  { %86 = dma.hbm_to_vmem [thread:$0]  %s4876_s5, 2048, %s81_s18, [#allocation12], %s4047_s11, %s4047_s11, %s4048_s12  }
  0x35   :  { %s4051_s16 = smov [#allocation2]   ;;  %s4052_s19 = smov [#allocation7]  }
  0x36   :  { %s23_s17 = sshll.u32 %s4051_s16, 4  ;;  %s44_s20 = sshll.u32 %s4052_s19, 4  ;;  %s24_s17 = int_to_ptr.vmem [resolvable:$true] %s23_s17  ;;  %s45_s20 = int_to_ptr.vmem [resolvable:$true] %s44_s20 }
  0x37   :  { %s3926_s23 = scalar_lea.hbm %s4871_s0, 128 }
  0x38   :  { %p3927_p10 = scmp.ne.s32.totalorder %s4871_s0, %s3926_s23  ;;  %p3930_p11 = scmp.lt.u32.totalorder %s3926_s23, %s4871_s0 }
  0x3a   :  { %p3932_p12 = pnand %p3930_p11, %p3927_p10 }
  0x3c   :  { %3935 = shalt.err (!%p3932_p12)
}
  0x3d   :  { %s3936_s5 = scalar_lea.vmem %s24_s17, 128  ;;  %p3941_p0 = scmp.lt.s32.totalorder %s24_s17, %s24_s17 }
  0x3e   :  { %p3937_p13 = scmp.ne.s32.totalorder %s24_s17, %s3936_s5  ;;  %p3942_p1 = scmp.lt.s32.totalorder %s3936_s5, %s3936_s5 }
  0x40   :  { %p3943_p2 = por %p3942_p1, %p3941_p0 }
  0x42   :  { %p3944_p3 = pnand %p3943_p2, %p3937_p13 }
  0x44   :  { %3947 = shalt.err (!%p3944_p3)
}
  0x45   :  { %26 = dma.hbm_to_vmem [thread:$0]  %s4871_s0, 128, %s24_s17, [#allocation3]  }
  0x46   :  { %s3948_s30 = scalar_lea.hbm %s4873_s2, 2048 }
  0x47   :  { %p3949_p4 = scmp.ne.s32.totalorder %s4873_s2, %s3948_s30  ;;  %p3952_p5 = scmp.lt.u32.totalorder %s3948_s30, %s4873_s2 }
  0x49   :  { %p3954_p6 = pnand %p3952_p5, %p3949_p4 }
  0x4b   :  { %3957 = shalt.err (!%p3954_p6)
}
  0x4c   :  { %s3958_s14 = scalar_lea.vmem %s45_s20, 2048  ;;  %p3963_p8 = scmp.lt.s32.totalorder %s45_s20, %s45_s20 }
  0x4d   :  { %p3959_p7 = scmp.ne.s32.totalorder %s45_s20, %s3958_s14  ;;  %p3964_p9 = scmp.lt.s32.totalorder %s3958_s14, %s3958_s14 }
  0x4f   :  { %p3965_p10 = por %p3964_p9, %p3963_p8 }
  0x51   :  { %p3966_p11 = pnand %p3965_p10, %p3959_p7 }
  0x53   :  { %3969 = shalt.err (!%p3966_p11)
}
  0x54   :  { %50 = dma.hbm_to_vmem [thread:$0]  %s4873_s2, 2048, %s45_s20, [#allocation6], %s4047_s11, %s4047_s11, %s4048_s12  }
  0x55   :  { %s4053_s15 = smov [#allocation10]   ;;  %s4054_s17 = smov [#allocation13]  }
  0x56   :  { %s68_s16 = sshll.u32 %s4053_s15, 4  ;;  %s92_s19 = sshll.u32 %s4054_s17, 4  ;;  %s69_s16 = int_to_ptr.vmem [resolvable:$true] %s68_s16  ;;  %s93_s19 = int_to_ptr.vmem [resolvable:$true] %s92_s19 }
  0x57   :  { %s3970_s23 = scalar_lea.hbm %s4875_s4, 256 }
  0x58   :  { %p3971_p12 = scmp.ne.s32.totalorder %s4875_s4, %s3970_s23  ;;  %p3974_p13 = scmp.lt.u32.totalorder %s3970_s23, %s4875_s4 }
  0x5a   :  { %p3976_p0 = pnand %p3974_p13, %p3971_p12 }
  0x5c   :  { %3979 = shalt.err (!%p3976_p0)
}
  0x5d   :  { %s3980_s2 = scalar_lea.vmem %s69_s16, 256  ;;  %p3985_p2 = scmp.lt.s32.totalorder %s69_s16, %s69_s16 }
  0x5e   :  { %p3981_p1 = scmp.ne.s32.totalorder %s69_s16, %s3980_s2  ;;  %p3986_p3 = scmp.lt.s32.totalorder %s3980_s2, %s3980_s2 }
  0x60   :  { %p3987_p4 = por %p3986_p3, %p3985_p2 }
  0x62   :  { %p3988_p5 = pnand %p3987_p4, %p3981_p1 }
  0x64   :  { %3991 = shalt.err (!%p3988_p5)
}
  0x65   :  { %74 = dma.hbm_to_vmem [thread:$0]  %s4875_s4, 256, %s69_s16, [#allocation9], %s4047_s11, %s4047_s11, %s4048_s12  }
  0x66   :  { %s3992_s28 = scalar_lea.hbm %s4877_s6, 16384 }
  0x67   :  { %p3993_p6 = scmp.ne.s32.totalorder %s4877_s6, %s3992_s28  ;;  %p3996_p7 = scmp.lt.u32.totalorder %s3992_s28, %s4877_s6 }
  0x69   :  { %p3998_p8 = pnand %p3996_p7, %p3993_p6 }
  0x6b   :  { %4001 = shalt.err (!%p3998_p8)
}
  0x6c   :  { %s4002_s10 = scalar_lea.vmem %s93_s19, 16384  ;;  %p4007_p10 = scmp.lt.s32.totalorder %s93_s19, %s93_s19 }
  0x6d   :  { %p4003_p9 = scmp.ne.s32.totalorder %s93_s19, %s4002_s10  ;;  %p4008_p11 = scmp.lt.s32.totalorder %s4002_s10, %s4002_s10 }
  0x6f   :  { %p4009_p12 = por %p4008_p11, %p4007_p10 }
  0x71   :  { %p4010_p13 = pnand %p4009_p12, %p4003_p9 }
  0x73   :  { %4013 = shalt.err (!%p4010_p13)
}
  0x74   :  { %98 = dma.hbm_to_vmem [thread:$0]  %s4877_s6, 16384, %s93_s19, [#allocation12], %s4047_s11, %s4047_s11, %s4048_s12  }
  0x75   :  { %4036 = dma.done.wait [#allocation3], 128  }
  0x76   :  { %4037 = vsyncadd [#allocation3], 4294967168 }
  0x77   :  { %4038 = dma.done.wait [#allocation6], 2304  }
  0x78   :  { %4039 = vsyncadd [#allocation6], 4294964992 }
  0x79   :  { %4040 = dma.done.wait [#allocation9], 16640  }
  0x7a   :  { %4041 = vsyncadd [#allocation9], 4294950656 }
  0x7b   :  { %4042 = dma.done.wait [#allocation12], 18432  }
  0x7c   :  { %4043 = vsyncadd [#allocation12], 4294948864  ;;  %v4055_v0 = vmov 0.0|0.0   ;;  %vm4056_vm0 = vmmov 0   ;;  %v4057_v1 = vmov 0.0   ;;  %v280_v2 = vlaneseq  ;;  %v139_v7 = vld [vmem:[#allocation8] sm:$0xff] }
  0x7d   :  { %3372 = vmatprep.subr.bf16.mxu0 %v4055_v0  ;;  %2774 = vmatprep.mubr.msk.f32.mxu0 %vm4056_vm0, %v4057_v1  ;;  %v4058_v3 = vmov 1966171168   ;;  %v140_v8 = vld [vmem:[#allocation8 + $0x8] sm:$0xff]  ;;  %v141_v9 = vld [vmem:[#allocation8 + $0x10] sm:$0xff]  ;;  %v142_v11 = vld [vmem:[#allocation8 + $0x18] sm:$0xff]  ;;  %s4059_s6 = smov [#allocation14]  }
  0x7e   :  { %v278_v4 = vunpack.c.l.s4 %v4058_v3  ;;  %3588 = vmatprep.subr.bf16.mxu1 %v4055_v0  ;;  %3089 = vmatprep.mubr.msk.f32.mxu1 %vm4056_vm0, %v4057_v1  ;;  %v281_v6 = vshrl.u32 %v280_v2, 7  ;;  %v3373_v10 = vpack.c.bf16 %v140_v8, %v139_v7  ;;  %v3376_v13 = vpack.c.bf16 %v142_v11, %v141_v9  ;;  %v143_v14 = vld [vmem:[#allocation8 + $0x20] sm:$0xff]  ;;  %v144_v15 = vld [vmem:[#allocation8 + $0x28] sm:$0xff]  ;;  %v121_v16 = vld [vmem:[#allocation5] sm:$0xff]  ;;  %s2398_s11 = sshll.u32 %s4059_s6, 4  ;;  %s2399_s11 = int_to_ptr.vmem [resolvable:$true] %s2398_s11 }
  0x7f   :  { %v276_v17 = vcombine.high %v121_v16, %v121_v16  ;;  %v3379_v19 = vpack.c.bf16 %v144_v15, %v143_v14  ;;  %v145_v21 = vld [vmem:[#allocation8 + $0x30] sm:$0xff]  ;;  %v146_v22 = vld [vmem:[#allocation8 + $0x38] sm:$0xff]  ;;  %v147_v26 = vld [vmem:[#allocation8 + $0x40] sm:$0xff]  ;;  %s4014_s12 = scalar_lea.vmem %s2399_s11, 128  ;;  %p4019_p1 = scmp.lt.s32.totalorder %s2399_s11, %s2399_s11 }
  0x80   :  { %v279_v5 = vunpack.c.0.s8 %v278_v4  ;;  %3374 = vmatpush3.bf16.msra.mxu0 %v3373_v10  ;;  %v4212_v20 = vsub.s32 0, %v281_v6  ;;  %v148_v27 = vld [vmem:[#allocation8 + $0x48] sm:$0xff]  ;;  %v3382_v32 = vpack.c.bf16 %v146_v22, %v145_v21  ;;  %v149_v43 = vld [vmem:[#allocation8 + $0x50] sm:$0xff]  ;;  %v150_v44 = vld [vmem:[#allocation8 + $0x58] sm:$0xff]  ;;  %p4015_p0 = scmp.ne.s32.totalorder %s2399_s11, %s4014_s12  ;;  %p4020_p2 = scmp.lt.s32.totalorder %s4014_s12, %s4014_s12 }
  0x81   :  { %3375 = vmatprep.subr.bf16.mxu0 %v4055_v0  ;;  %v4219_v28 = vld [vmem:[#allocation2] sm:$0xff]  ;;  %v3385_v37 = vpack.c.bf16 %v148_v27, %v147_v26  ;;  %v3388_v55 = vpack.c.bf16 %v150_v44, %v149_v43  ;;  %v151_v59 = vld [vmem:[#allocation8 + $0x60] sm:$0xff]  ;;  %v153_v15 = vld [vmem:[#allocation8 + $0x70] sm:$0xff] }
  0x82   :  { %v4208_v12 = vsub.s32 %v279_v5, %v281_v6  ;;  %v152_v60 = vld [vmem:[#allocation8 + $0x68] sm:$0xff]  ;;  %p4021_p3 = por %p4020_p2, %p4019_p1 }
  0x83   :  { %v3391_v10 = vpack.c.bf16 %v152_v60, %v151_v59 }
  0x84   :  { %v283_v18 = vrot.slane %v121_v16, %v4208_v12  ;;  %3377 = vmatpush3.bf16.msra.mxu0 %v3376_v13  ;;  %v4216_v23 = vrot.slane %v276_v17, %v4208_v12  ;;  %v154_v16 = vld [vmem:[#allocation8 + $0x78] sm:$0xff]  ;;  %p4022_p4 = pnand %p4021_p3, %p4015_p0 }
  0x85   :  { %3378 = vmatprep.subr.bf16.mxu0 %v4055_v0  ;;  %v3394_v26 = vpack.c.bf16 %v154_v16, %v153_v15 }
  0x86   :  { %v291_v24 = vcombine.high %v283_v18, %v283_v18  ;;  %v299_v25 = vrot.slane %v283_v18, %v4208_v12  ;;  %v4223_v29 = vrot.slane %v4216_v23, %v4208_v12  ;;  %v292_v11 = vcombine.high %v4216_v23, %v4216_v23 }
  0x88   :  { %v313_v30 = vrot.slane %v291_v24, %v4208_v12  ;;  %v321_v31 = vcombine.high %v299_v25, %v299_v25  ;;  %3380 = vmatpush3.bf16.msra.mxu0 %v3379_v19  ;;  %v352_v33 = vrot.slane %v299_v25, %v4212_v20  ;;  %v4232_v38 = vrot.slane %v4223_v29, %v4212_v20 }
  0x89   :  { %3381 = vmatprep.subr.bf16.mxu0 %v4055_v0 }
  0x8a   :  { %v323_v34 = vcombine.high %v313_v30, %v313_v30  ;;  %v356_v35 = vrot.slane %v313_v30, %v4212_v20  ;;  %v360_v36 = vrot.slane %v321_v31, %v4212_v20  ;;  %vm404_vm1 = vcmp.ge.f32.partialorder %v4219_v28, %v352_v33 }
  0x8b   :  { %v464_v39 = vsub.f32 %v4219_v28, %v352_v33  ;;  %vm423_vm6 = vcmp.lt.f32.partialorder %v4219_v28, %v4232_v38  ;;  %v486_v57 = vsub.f32 %v4232_v38, %v4219_v28  ;;  %v4275_v31 = vrot.slane %v292_v11, %v4208_v12 }
  0x8c   :  { %v364_v40 = vrot.slane %v323_v34, %v4212_v20  ;;  %vm405_vm2 = vcmp.ge.f32.partialorder %v4219_v28, %v356_v35  ;;  %vm406_vm3 = vcmp.ge.f32.partialorder %v4219_v28, %v360_v36  ;;  %vm420_vm4 = vcmp.lt.f32.partialorder %v4219_v28, %v356_v35  ;;  %3383 = vmatpush3.bf16.msra.mxu0 %v3382_v32 }
  0x8d   :  { %vm421_vm5 = vcmp.lt.f32.partialorder %v4219_v28, %v360_v36  ;;  %vm431_vm7 = vmand %vm404_vm1, %vm420_vm4  ;;  %v465_v41 = vsub.f32 %v4219_v28, %v356_v35  ;;  %v4245_v42 = vsub.f32 %v4219_v28, %v360_v36  ;;  %3384 = vmatprep.subr.bf16.mxu0 %v4055_v0  ;;  %v474_v48 = vmul.f32 2.5, %v464_v39  ;;  %v123_v35 = vld [vmem:[#allocation7] sm:$0xff] }
  0x8e   :  { %vm407_vm8 = vcmp.ge.f32.partialorder %v4219_v28, %v364_v40  ;;  %vm422_vm9 = vcmp.lt.f32.partialorder %v4219_v28, %v364_v40  ;;  %vm432_vm10 = vmand %vm405_vm2, %vm421_vm5  ;;  %v2412_v45 = vsel %vm431_vm7, 1.0, %v4057_v1  ;;  %v4252_v46 = vsub.f32 %v4219_v28, %v364_v40 }
  0x8f   :  { %vm433_vm11 = vmand %vm406_vm3, %vm422_vm9  ;;  %v2413_v47 = vsel %vm432_vm10, 1.0, %v4057_v1  ;;  %v475_v49 = vmul.f32 2.5, %v465_v41  ;;  %v476_v50 = vmul.f32 2.5, %v4245_v42  ;;  %v484_v53 = vsub.f32 %v360_v36, %v4219_v28  ;;  %v124_v36 = vld [vmem:[#allocation7 + $0x8] sm:$0xff] }
  0x90   :  { %vm434_vm12 = vmand %vm407_vm8, %vm423_vm6  ;;  %v2414_v51 = vsel %vm433_vm11, 1.0, %v4057_v1  ;;  %v477_v52 = vmul.f32 2.5, %v4252_v46  ;;  %v485_v54 = vsub.f32 %v364_v40, %v4219_v28  ;;  %3386 = vmatpush3.bf16.msra.mxu0 %v3385_v37  ;;  %v504_v58 = vmul.f32 %v2412_v45, %v474_v48 }
  0x91   :  { %v2415_v56 = vsel %vm434_vm12, 1.0, %v4057_v1  ;;  %3387 = vmatprep.subr.bf16.mxu0 %v4055_v0  ;;  %v494_v61 = vmul.f32 2.5, %v484_v53  ;;  %v505_v63 = vmul.f32 %v2413_v47, %v475_v49  ;;  %v496_v3 = vmul.f32 2.5, %v486_v57 }
  0x92   :  { %v495_v62 = vmul.f32 2.5, %v485_v54  ;;  %v4269_v2 = vmul.f32 %v2415_v56, %v477_v52  ;;  %v506_v4 = vmul.f32 %v2414_v51, %v476_v50  ;;  %v534_v5 = vmul.f32 1.25, %v464_v39  ;;  %v125_v50 = vld [vmem:[#allocation7 + $0x10] sm:$0xff] }
  0x93   :  { %v514_v6 = vmul.f32 %v2413_v47, %v494_v61  ;;  %v535_v8 = vmul.f32 1.25, %v465_v41  ;;  %v543_v9 = vmul.f32 1.25, %v485_v54  ;;  %v516_v13 = vmul.f32 %v2415_v56, %v496_v3  ;;  %v128_v61 = vld [vmem:[#allocation7 + $0x28] sm:$0xff] }
  0x94   :  { %v515_v7 = vmul.f32 %v2414_v51, %v495_v62  ;;  %3389 = vmatpush3.bf16.msra.mxu0 %v3388_v55  ;;  %v544_v14 = vmul.f32 1.25, %v486_v57  ;;  %v579_v25 = vmul.f32 0.8333333, %v464_v39  ;;  %v587_v30 = vmul.f32 0.8333333, %v486_v57  ;;  %v126_v51 = vld [vmem:[#allocation7 + $0x18] sm:$0xff] }
  0x95   :  { %3390 = vmatprep.subr.bf16.mxu0 %v4055_v0  ;;  %v524_v17 = vadd.f32 %v514_v6, %v504_v58  ;;  %v526_v19 = vadd.f32 %v516_v13, %v506_v4  ;;  %v536_v32 = vmul.f32 1.25, %v4245_v42  ;;  %v580_v33 = vmul.f32 0.8333333, %v465_v41  ;;  %v130_v6 = vld [vmem:[#allocation7 + $0x38] sm:$0xff] }
  0x96   :  { %v525_v18 = vadd.f32 %v515_v7, %v505_v63  ;;  %v2410_v37 = vmul.f32 -1.442695, %v4219_v28  ;;  %v372_v39 = vrot.slane %v4275_v31, %v4212_v20  ;;  %vm408_vm13 = vcmp.ge.f32.partialorder %v4219_v28, %v4232_v38 }
  0x97   :  { %v552_v21 = vmul.f32 %v534_v5, %v524_v17  ;;  %v562_v27 = vmul.f32 %v544_v14, %v526_v19  ;;  %v322_v40 = vcombine.high %v4223_v29, %v4223_v29  ;;  %v554_v44 = vmul.f32 %v536_v32, %v526_v19  ;;  %v129_v5 = vld [vmem:[#allocation7 + $0x30] sm:$0xff]  ;;  %v132_v32 = vld [vmem:[#allocation7 + $0x48] sm:$0xff] }
  0x98   :  { %v553_v22 = vmul.f32 %v535_v8, %v525_v18  ;;  %v561_v24 = vmul.f32 %v543_v9, %v525_v18  ;;  %3392 = vmatpush3.bf16.msra.mxu0 %v3391_v10  ;;  %vm424_vm14 = vcmp.lt.f32.partialorder %v4219_v28, %v372_v39  ;;  %v487_v41 = vsub.f32 %v372_v39, %v4219_v28 }
  0x99   :  { %3393 = vmatprep.subr.bf16.mxu0 %v4055_v0  ;;  %v3397_v48 = vpack.c.bf16 %v124_v36, %v123_v35  ;;  %vm435_vm15 = vmand %vm408_vm13, %vm424_vm14  ;;  %3852 = vpow2.f32 %v2410_v37  ;;  %v4291_v53 = vrot.slane %v322_v40, %v4212_v20  ;;  %vm409_vm1 = vcmp.ge.f32.partialorder %v4219_v28, %v372_v39 }
  0x9a   :  { %v570_v23 = vadd.f32 %v561_v24, %v552_v21  ;;  %v571_v34 = vadd.f32 %v562_v27, %v553_v22  ;;  %v2416_v52 = vsel %vm435_vm15, 1.0, %v4057_v1  ;;  %v497_v29 = vmul.f32 2.5, %v487_v41 }
  0x9b   :  { %v4296_v54 = vsub.f32 %v4219_v28, %v4232_v38  ;;  %v545_v56 = vmul.f32 1.25, %v487_v41  ;;  %v537_v57 = vmul.f32 1.25, %v4252_v46  ;;  %v3400_v58 = vpack.c.bf16 %v126_v51, %v125_v50  ;;  %v127_v38 = vld [vmem:[#allocation7 + $0x20] sm:$0xff] }
  0x9c   :  { %v595_v43 = vmul.f32 %v579_v25, %v570_v23  ;;  %3395 = vmatpush3.bf16.msra.mxu0 %v3394_v26  ;;  %v603_v45 = vmul.f32 %v587_v30, %v571_v34  ;;  %v596_v47 = vmul.f32 %v580_v33, %v571_v34  ;;  %v517_v55 = vmul.f32 %v2416_v52, %v497_v29  ;;  %v131_v23 = vld [vmem:[#allocation7 + $0x40] sm:$0xff] }
  0x9d   :  { %3396 = vmatprep.subr.bf16.mxu0 %v4055_v0  ;;  %vm425_vm2 = vcmp.lt.f32.partialorder %v4219_v28, %v4291_v53  ;;  %v478_v59 = vmul.f32 2.5, %v4296_v54  ;;  %v488_v60 = vsub.f32 %v4291_v53, %v4219_v28  ;;  %v588_v8 = vmul.f32 0.8333333, %v487_v41  ;;  %v133_v41 = vld [vmem:[#allocation7 + $0x50] sm:$0xff] }
  0x9e   :  { %v611_v49 = vadd.f32 %v603_v45, %v595_v43  ;;  %v527_v62 = vadd.f32 %v517_v55, %v4269_v2  ;;  %vm436_vm3 = vmand %vm409_vm1, %vm425_vm2  ;;  %v581_v10 = vmul.f32 0.8333333, %v4245_v42  ;;  %v3403_v11 = vpack.c.bf16 %v128_v61, %v127_v38  ;;  %v4337_v45 = vld.sshfl [vmem:[#allocation5 + $0x8] sm:$0x33 pattern:$0x75316420] }
  0x9f   :  { %v2417_v63 = vsel %vm436_vm3, 1.0, %v4057_v1  ;;  %v498_v3 = vmul.f32 2.5, %v488_v60  ;;  %v508_v4 = vmul.f32 %v2416_v52, %v478_v59  ;;  %v546_v14 = vmul.f32 1.25, %v488_v60  ;;  %v136_v59 = vld [vmem:[#allocation7 + $0x68] sm:$0xff] }
  0xa0   :  { %2775 = vmatmul.mubr.f32.vlgmr.msra.gmra.mrb[0].mxu0 %v611_v49  ;;  %v563_v7 = vmul.f32 %v545_v56, %v527_v62  ;;  %v555_v9 = vmul.f32 %v537_v57, %v527_v62  ;;  %v324_v15 = vcombine.high %v4275_v31, %v4275_v31  ;;  %v4316_v16 = vsub.f32 %v4219_v28, %v372_v39 }
  0xa1   :  { %3398 = vmatpush3.bf16.msra.mxu0 %v3397_v48  ;;  %2809 = vmatprep.mubr.msk.f32.mxu0 %vm4056_vm0, %v4057_v1  ;;  %v518_v13 = vmul.f32 %v2417_v63, %v498_v3  ;;  %v3406_v17 = vpack.c.bf16 %v130_v6, %v129_v5  ;;  %vm410_vm4 = vcmp.ge.f32.partialorder %v4219_v28, %v4291_v53  ;;  %v538_v42 = vmul.f32 1.25, %v4296_v54  ;;  %v137_v5 = vld [vmem:[#allocation7 + $0x70] sm:$0xff]  ;;  %v138_v6 = vld [vmem:[#allocation7 + $0x78] sm:$0xff] }
  0xa2   :  { %3399 = vmatprep.subr.bf16.mxu0 %v4055_v0  ;;  %v572_v2 = vadd.f32 %v563_v7, %v554_v44  ;;  %v4322_v24 = vrot.slane %v324_v15, %v4212_v20  ;;  %v479_v25 = vmul.f32 2.5, %v4316_v16  ;;  %v589_v27 = vmul.f32 0.8333333, %v488_v60 }
  0xa3   :  { %v528_v18 = vadd.f32 %v518_v13, %v508_v4  ;;  %v3853_v19 = vpop.eup %3852  ;;  %v582_v31 = vmul.f32 0.8333333, %v4252_v46  ;;  %v3409_v40 = vpack.c.bf16 %v132_v32, %v131_v23  ;;  %v4342_v50 = vrot.slane %v4337_v45, %v4208_v12 }
  0xa4   :  { %v604_v21 = vmul.f32 %v588_v8, %v572_v2  ;;  %v597_v22 = vmul.f32 %v581_v10, %v572_v2  ;;  %vm426_vm5 = vcmp.lt.f32.partialorder %v4219_v28, %v4322_v24  ;;  %v489_v34 = vsub.f32 %v4322_v24, %v4219_v28 }
  0xa5   :  { %3401 = vmatpush3.bf16.msra.mxu0 %v3400_v58  ;;  %v564_v26 = vmul.f32 %v546_v14, %v528_v18  ;;  %v556_v30 = vmul.f32 %v538_v42, %v528_v18  ;;  %v509_v35 = vmul.f32 %v2417_v63, %v479_v25  ;;  %v270_v36 = vadd.f32 1.0, %v3853_v19  ;;  %vm437_vm6 = vmand %vm410_vm4, %vm426_vm5  ;;  %v135_v58 = vld [vmem:[#allocation7 + $0x60] sm:$0xff]  ;;  %v156_v18 = vld [vmem:[#allocation8 + $0x88] sm:$0xff] }
  0xa6   :  { %3402 = vmatprep.subr.bf16.mxu0 %v4055_v0  ;;  %v4327_v33 = vadd.f32 %v604_v21, %v596_v47  ;;  %v2418_v46 = vsel %vm437_vm6, 1.0, %v4057_v1  ;;  %v499_v39 = vmul.f32 2.5, %v489_v34  ;;  %v134_v47 = vld [vmem:[#allocation7 + $0x58] sm:$0xff]  ;;  %v547_v49 = vmul.f32 1.25, %v489_v34 }
  0xa7   :  { %v573_v37 = vadd.f32 %v564_v26, %v555_v9  ;;  %3854 = vrcp.f32 %v270_v36  ;;  %v4348_v29 = vrot.slane %v4342_v50, %v4212_v20  ;;  %v3412_v55 = vpack.c.bf16 %v134_v47, %v133_v41 }
  0xa8   :  { %v519_v48 = vmul.f32 %v2418_v46, %v499_v39  ;;  %v590_v56 = vmul.f32 0.8333333, %v489_v34  ;;  %v4352_v57 = vsub.f32 %v4219_v28, %v4291_v53  ;;  %vm411_vm7 = vcmp.ge.f32.partialorder %v4219_v28, %v4322_v24 }
  0xa9   :  { %3404 = vmatpush3.bf16.msra.mxu0 %v3403_v11  ;;  %v605_v43 = vmul.f32 %v589_v27, %v573_v37  ;;  %v598_v44 = vmul.f32 %v582_v31, %v573_v37  ;;  %vm427_vm8 = vcmp.lt.f32.partialorder %v4219_v28, %v4348_v29  ;;  %v490_v38 = vsub.f32 %v4348_v29, %v4219_v28  ;;  %v158_v31 = vld [vmem:[#allocation8 + $0x98] sm:$0xff]  ;;  %v161_v37 = vld [vmem:[#allocation8 + $0xb0] sm:$0xff] }
  0xaa   :  { %3405 = vmatprep.subr.bf16.mxu0 %v4055_v0  ;;  %v529_v52 = vadd.f32 %v519_v48, %v509_v35  ;;  %vm438_vm9 = vmand %vm411_vm7, %vm427_vm8  ;;  %v480_v61 = vmul.f32 2.5, %v4352_v57  ;;  %v3415_v3 = vpack.c.bf16 %v136_v59, %v135_v58  ;;  %v539_v9 = vmul.f32 1.25, %v4316_v16  ;;  %v160_v35 = vld [vmem:[#allocation8 + $0xa8] sm:$0xff]  ;;  %v165_v48 = vld [vmem:[#allocation8 + $0xd0] sm:$0xff] }
  0xab   :  { %v4344_v51 = vadd.f32 %v605_v43, %v597_v22  ;;  %v4363_v53 = vsel %vm438_vm9, 1.0, %v4057_v1  ;;  %v500_v63 = vmul.f32 2.5, %v490_v38  ;;  %v548_v10 = vmul.f32 1.25, %v490_v38  ;;  %v164_v43 = vld [vmem:[#allocation8 + $0xc8] sm:$0xff]  ;;  %v167_v58 = vld [vmem:[#allocation8 + $0xe0] sm:$0xff] }
  0xac   :  { %v565_v60 = vmul.f32 %v547_v49, %v529_v52  ;;  %v510_v4 = vmul.f32 %v2418_v46, %v480_v61  ;;  %v3418_v2 = vpack.c.bf16 %v138_v6, %v137_v5  ;;  %v557_v15 = vmul.f32 %v539_v9, %v529_v52  ;;  %v162_v46 = vld [vmem:[#allocation8 + $0xb8] sm:$0xff]  ;;  %v168_v59 = vld [vmem:[#allocation8 + $0xe8] sm:$0xff] }
  0xad   :  { %3407 = vmatpush3.bf16.msra.mxu0 %v3406_v17  ;;  %v520_v8 = vmul.f32 %v4363_v53, %v500_v63  ;;  %v155_v17 = vld [vmem:[#allocation8 + $0x80] sm:$0xff]  ;;  %v583_v19 = vmul.f32 0.8333333, %v4296_v54  ;;  %v591_v21 = vmul.f32 0.8333333, %v490_v38  ;;  %v3430_v39 = vpack.c.bf16 %v162_v46, %v161_v37  ;;  %v166_v49 = vld [vmem:[#allocation8 + $0xd8] sm:$0xff] }
  0xae   :  { %3408 = vmatprep.subr.bf16.mxu0 %v4055_v0  ;;  %v574_v62 = vadd.f32 %v565_v60, %v556_v30  ;;  %v3421_v26 = vpack.c.bf16 %v156_v18, %v155_v17  ;;  %v157_v30 = vld [vmem:[#allocation8 + $0x90] sm:$0xff]  ;;  %v159_v54 = vld [vmem:[#allocation8 + $0xa0] sm:$0xff]  ;;  %vm412_vm10 = vcmp.ge.f32.partialorder %v4219_v28, %v4348_v29  ;;  %v3439_v61 = vpack.c.bf16 %v168_v59, %v167_v58  ;;  %v182_v37 = vld [vmem:[#allocation8 + $0x158] sm:$0xff] }
  0xaf   :  { %v4370_v13 = vadd.f32 %v520_v8, %v510_v4  ;;  %v3424_v34 = vpack.c.bf16 %v158_v31, %v157_v30  ;;  %v3427_v36 = vpack.c.bf16 %v160_v35, %v159_v54  ;;  %v170_v4 = vld [vmem:[#allocation8 + $0xf8] sm:$0xff]  ;;  %v540_v6 = vmul.f32 1.25, %v4352_v57  ;;  %v177_v30 = vld [vmem:[#allocation8 + $0x130] sm:$0xff] }
  0xb0   :  { %v606_v7 = vmul.f32 %v590_v56, %v574_v62  ;;  %v599_v27 = vmul.f32 %v583_v19, %v574_v62  ;;  %v4399_v56 = vsub.f32 %v4219_v28, %v4322_v24  ;;  %v178_v31 = vld [vmem:[#allocation8 + $0x138] sm:$0xff]  ;;  %v347_v35 = vcombine.high %v4342_v50, %v4342_v50  ;;  %v184_v50 = vld [vmem:[#allocation8 + $0x168] sm:$0xff]  ;;  %v185_v58 = vld [vmem:[#allocation8 + $0x170] sm:$0xff] }
  0xb1   :  { %3410 = vmatpush3.bf16.msra.mxu0 %v3409_v40  ;;  %v3855_v14 = vpop.eup %3854  ;;  %v566_v42 = vmul.f32 %v548_v10, %v4370_v13  ;;  %v163_v40 = vld [vmem:[#allocation8 + $0xc0] sm:$0xff]  ;;  %v558_v9 = vmul.f32 %v540_v6, %v4370_v13  ;;  %v173_v13 = vld [vmem:[#allocation8 + $0x110] sm:$0xff]  ;;  %v186_v59 = vld [vmem:[#allocation8 + $0x178] sm:$0xff] }
  0xb2   :  { %3411 = vmatprep.subr.bf16.mxu0 %v4055_v0  ;;  %v4368_v11 = vadd.f32 %v606_v7, %v598_v44  ;;  %v273_v22 = vmul.f32 %v3855_v14, %v4219_v28  ;;  %v332_v44 = vcombine.high %v4337_v45, %v4337_v45  ;;  %v3433_v41 = vpack.c.bf16 %v164_v43, %v163_v40  ;;  %v172_v14 = vld [vmem:[#allocation8 + $0x108] sm:$0xff] }
  0xb3   :  { %v4376_v25 = vadd.f32 %v566_v42, %v557_v15  ;;  %v481_v60 = vmul.f32 2.5, %v4399_v56  ;;  %v584_v15 = vmul.f32 0.8333333, %v4316_v16  ;;  %v175_v16 = vld [vmem:[#allocation8 + $0x120] sm:$0xff]  ;;  %v4439_v46 = vrot.slane %v347_v35, %v4212_v20 }
  0xb4   :  { %v4390_v47 = vrot.slane %v332_v44, %v4208_v12  ;;  %v4443_v40 = vsub.f32 %v4219_v28, %v4348_v29  ;;  %v183_v44 = vld [vmem:[#allocation8 + $0x160] sm:$0xff] }
  0xb5   :  { %3413 = vmatpush3.bf16.msra.mxu0 %v3412_v55  ;;  %v607_v23 = vmul.f32 %v591_v21, %v4376_v25  ;;  %v3436_v55 = vpack.c.bf16 %v166_v49, %v165_v48  ;;  %v511_v62 = vmul.f32 %v4363_v53, %v481_v60  ;;  %v171_v53 = vld [vmem:[#allocation8 + $0x100] sm:$0xff]  ;;  %v600_v42 = vmul.f32 %v584_v15, %v4376_v25  ;;  %v174_v21 = vld [vmem:[#allocation8 + $0x118] sm:$0xff] }
  0xb6   :  { %3414 = vmatprep.subr.bf16.mxu0 %v4055_v0  ;;  %v4395_v52 = vrot.slane %v4390_v47, %v4212_v20  ;;  %v3445_v18 = vpack.c.bf16 %v172_v14, %v171_v53  ;;  %v492_v43 = vsub.f32 %v4439_v46, %v4219_v28  ;;  %vm429_vm14 = vcmp.lt.f32.partialorder %v4219_v28, %v4439_v46  ;;  %v190_v14 = vld [vmem:[#allocation8 + $0x198] sm:$0xff] }
  0xb7   :  { %v4380_v32 = vadd.f32 %v607_v23, %v599_v27  ;;  %v176_v27 = vld [vmem:[#allocation8 + $0x128] sm:$0xff]  ;;  %v3454_v23 = vpack.c.bf16 %v178_v31, %v177_v30  ;;  %v3463_v49 = vpack.c.bf16 %v184_v50, %v183_v44  ;;  %vm414_vm1 = vcmp.ge.f32.partialorder %v4219_v28, %v4439_v46  ;;  %v202_v46 = vld [vmem:[#allocation8 + $0x1f8] sm:$0xff] }
  0xb8   :  { %v491_v45 = vsub.f32 %v4395_v52, %v4219_v28  ;;  %vm428_vm11 = vcmp.lt.f32.partialorder %v4219_v28, %v4395_v52  ;;  %v3451_v25 = vpack.c.bf16 %v176_v27, %v175_v16  ;;  %vm413_vm13 = vcmp.ge.f32.partialorder %v4219_v28, %v4395_v52  ;;  %v197_v27 = vld [vmem:[#allocation8 + $0x1d0] sm:$0xff] }
  0xb9   :  { %3416 = vmatpush3.bf16.msra.mxu0 %v3415_v3  ;;  %vm439_vm12 = vmand %vm412_vm10, %vm428_vm11  ;;  %v169_v3 = vld [vmem:[#allocation8 + $0xf0] sm:$0xff]  ;;  %v502_v48 = vmul.f32 2.5, %v492_v43  ;;  %v473_v31 = vsub.f32 %v4219_v28, %v4395_v52 }
  0xba   :  { %3417 = vmatprep.subr.bf16.mxu0 %v4055_v0  ;;  %v501_v38 = vmul.f32 2.5, %v491_v45  ;;  %v4410_v24 = vsel %vm439_vm12, 1.0, %v4057_v1  ;;  %v549_v7 = vmul.f32 1.25, %v491_v45  ;;  %v3442_v8 = vpack.c.bf16 %v170_v4, %v169_v3  ;;  %vm440_vm15 = vmand %vm413_vm13, %vm429_vm14  ;;  %v188_v4 = vld [vmem:[#allocation8 + $0x188] sm:$0xff] }
  0xbb   :  { %v592_v17 = vmul.f32 0.8333333, %v491_v45  ;;  %v4454_v29 = vsel %vm440_vm15, 1.0, %v4057_v1 }
  0xbc   :  { %v521_v63 = vmul.f32 %v4410_v24, %v501_v38  ;;  %v522_v45 = vmul.f32 %v4454_v29, %v502_v48  ;;  %v541_v38 = vmul.f32 1.25, %v4399_v56 }
  0xbd   :  { %3419 = vmatpush3.bf16.msra.mxu0 %v3418_v2 }
  0xbe   :  { %3420 = vmatprep.subr.bf16.mxu0 %v4055_v0  ;;  %v4415_v5 = vadd.f32 %v521_v63, %v511_v62  ;;  %v3466_v62 = vpack.c.bf16 %v186_v59, %v185_v58  ;;  %v586_v58 = vmul.f32 0.8333333, %v4399_v56 }
  0xc0   :  { %2810 = vmatmul.mubr.f32.vlgmr.msra.gmra.mrb[0].mxu0 %v273_v22  ;;  %v567_v10 = vmul.f32 %v549_v7, %v4415_v5  ;;  %v559_v63 = vmul.f32 %v541_v38, %v4415_v5  ;;  %v585_v7 = vmul.f32 0.8333333, %v4352_v57  ;;  %v189_v5 = vld [vmem:[#allocation8 + $0x190] sm:$0xff]  ;;  %v191_v57 = vld [vmem:[#allocation8 + $0x1a0] sm:$0xff] }
  0xc1   :  { %3422 = vmatpush3.bf16.msra.mxu0 %v3421_v26  ;;  %2844 = vmatprep.mubr.msk.f32.mxu0 %vm4056_vm0, %v4057_v1  ;;  %v3448_v26 = vpack.c.bf16 %v174_v21, %v173_v13  ;;  %v196_v21 = vld [vmem:[#allocation8 + $0x1c8] sm:$0xff] }
  0xc2   :  { %3423 = vmatprep.subr.bf16.mxu0 %v4055_v0  ;;  %v4421_v2 = vadd.f32 %v567_v10, %v558_v9 }
  0xc4   :  { %v608_v19 = vmul.f32 %v592_v17, %v4421_v2  ;;  %v601_v10 = vmul.f32 %v585_v7, %v4421_v2  ;;  %v3472_v17 = vpack.c.bf16 %v190_v14, %v189_v5  ;;  %v209_v14 = vld [vmem:[#allocation8 + $0x230] sm:$0xff] }
  0xc5   :  { %3425 = vmatpush3.bf16.msra.mxu0 %v3424_v34  ;;  %v180_v34 = vld [vmem:[#allocation8 + $0x148] sm:$0xff] }
  0xc6   :  { %3426 = vmatprep.subr.bf16.mxu0 %v4055_v0  ;;  %v4427_v22 = vadd.f32 %v608_v19, %v600_v42  ;;  %v193_v42 = vld [vmem:[#allocation8 + $0x1b0] sm:$0xff]  ;;  %v194_v19 = vld [vmem:[#allocation8 + $0x1b8] sm:$0xff] }
  0xc7   :  { %v3478_v13 = vpack.c.bf16 %v194_v19, %v193_v42  ;;  %v211_v19 = vld [vmem:[#allocation8 + $0x240] sm:$0xff] }
  0xc9   :  { %3428 = vmatpush3.bf16.msra.mxu0 %v3427_v36  ;;  %v181_v36 = vld [vmem:[#allocation8 + $0x150] sm:$0xff] }
  0xca   :  { %3429 = vmatprep.subr.bf16.mxu0 %v4055_v0 }
  0xcd   :  { %3431 = vmatpush3.bf16.msra.mxu0 %v3430_v39  ;;  %v3460_v39 = vpack.c.bf16 %v182_v37, %v181_v36 }
  0xce   :  { %3432 = vmatprep.subr.bf16.mxu0 %v4055_v0 }
  0xd1   :  { %3434 = vmatpush3.bf16.msra.mxu0 %v3433_v41  ;;  %v482_v41 = vmul.f32 2.5, %v4443_v40 }
  0xd2   :  { %3435 = vmatprep.subr.bf16.mxu0 %v4055_v0 }
  0xd5   :  { %3437 = vmatpush3.bf16.msra.mxu0 %v3436_v55  ;;  %v512_v55 = vmul.f32 %v4410_v24, %v482_v41  ;;  %v187_v24 = vld [vmem:[#allocation8 + $0x180] sm:$0xff] }
  0xd6   :  { %3438 = vmatprep.subr.bf16.mxu0 %v4055_v0  ;;  %v3469_v9 = vpack.c.bf16 %v188_v4, %v187_v24  ;;  %v1275_v24 = vld [vmem:[#allocation13 + $0x8] sm:$0xff]  ;;  %v1276_v4 = vld [vmem:[#allocation13 + $0x10] sm:$0xff] }
  0xd7   :  { %v4459_v60 = vadd.f32 %v522_v45, %v512_v55  ;;  %v203_v55 = vld [vmem:[#allocation8 + $0x200] sm:$0xff] }
  0xd9   :  { %3440 = vmatpush3.bf16.msra.mxu0 %v3439_v61  ;;  %v550_v61 = vmul.f32 1.25, %v492_v43 }
  0xda   :  { %3441 = vmatprep.subr.bf16.mxu0 %v4055_v0 }
  0xdb   :  { %v568_v3 = vmul.f32 %v550_v61, %v4459_v60 }
  0xdd   :  { %3443 = vmatpush3.bf16.msra.mxu0 %v3442_v8  ;;  %v4465_v6 = vadd.f32 %v568_v3, %v559_v63  ;;  %v593_v8 = vmul.f32 0.8333333, %v492_v43  ;;  %v201_v43 = vld [vmem:[#allocation8 + $0x1f0] sm:$0xff] }
  0xde   :  { %3444 = vmatprep.subr.bf16.mxu0 %v4055_v0  ;;  %v1274_v3 = vld [vmem:[#allocation13] sm:$0xff] }
  0xdf   :  { %v609_v53 = vmul.f32 %v593_v8, %v4465_v6  ;;  %v602_v38 = vmul.f32 %v586_v58, %v4465_v6  ;;  %v3589_v56 = vpack.c.bf16 %v1275_v24, %v1274_v3  ;;  %v1277_v6 = vld [vmem:[#allocation13 + $0x18] sm:$0xff]  ;;  %v207_v8 = vld [vmem:[#allocation8 + $0x220] sm:$0xff]  ;;  %v237_v24 = vld [vmem:[#allocation8 + $0x310] sm:$0xff] }
  0xe0   :  { %2845 = vmatmul.mubr.f32.vlgmr.msra.gmra.mrb[0].mxu0 %v4327_v33  ;;  %v179_v33 = vld [vmem:[#allocation8 + $0x140] sm:$0xff]  ;;  %v232_v58 = vld [vmem:[#allocation8 + $0x2e8] sm:$0xff] }
  0xe1   :  { %3446 = vmatpush3.bf16.msra.mxu0 %v3445_v18  ;;  %2879 = vmatprep.mubr.msk.f32.mxu0 %vm4056_vm0, %v4057_v1  ;;  %v3457_v54 = vpack.c.bf16 %v180_v34, %v179_v33  ;;  %v4471_v15 = vadd.f32 %v609_v53, %v601_v10  ;;  %v192_v18 = vld [vmem:[#allocation8 + $0x1a8] sm:$0xff]  ;;  %v3592_v10 = vpack.c.bf16 %v1277_v6, %v1276_v4  ;;  %v1278_v53 = vld [vmem:[#allocation13 + $0x20] sm:$0xff]  ;;  %v238_v4 = vld [vmem:[#allocation8 + $0x318] sm:$0xff] }
  0xe2   :  { %3447 = vmatprep.subr.bf16.mxu0 %v4055_v0  ;;  %v3475_v2 = vpack.c.bf16 %v192_v18, %v191_v57  ;;  %v200_v34 = vld [vmem:[#allocation8 + $0x1e8] sm:$0xff]  ;;  %3590 = vmatpush3.bf16.msra.mxu1 %v3589_v56  ;;  %v1280_v18 = vld [vmem:[#allocation13 + $0x30] sm:$0xff] }
  0xe3   :  { %3591 = vmatprep.subr.bf16.mxu1 %v4055_v0  ;;  %v239_v56 = vld [vmem:[#allocation8 + $0x320] sm:$0xff]  ;;  %v240_v6 = vld [vmem:[#allocation8 + $0x328] sm:$0xff] }
  0xe5   :  { %3449 = vmatpush3.bf16.msra.mxu0 %v3448_v26  ;;  %v348_v26 = vcombine.high %v4390_v47, %v4390_v47  ;;  %v199_v47 = vld [vmem:[#allocation8 + $0x1e0] sm:$0xff] }
  0xe6   :  { %3450 = vmatprep.subr.bf16.mxu0 %v4055_v0  ;;  %3593 = vmatpush3.bf16.msra.mxu1 %v3592_v10  ;;  %v242_v10 = vld [vmem:[#allocation8 + $0x338] sm:$0xff] }
  0xe7   :  { %v418_v30 = vrot.slane %v348_v26, %v4212_v20  ;;  %3594 = vmatprep.subr.bf16.mxu1 %v4055_v0  ;;  %v213_v26 = vld [vmem:[#allocation8 + $0x250] sm:$0xff] }
  0xe9   :  { %3452 = vmatpush3.bf16.msra.mxu0 %v3451_v25  ;;  %v198_v25 = vld [vmem:[#allocation8 + $0x1d8] sm:$0xff]  ;;  %vm430_vm2 = vcmp.lt.f32.partialorder %v4219_v28, %v418_v30 }
  0xea   :  { %3453 = vmatprep.subr.bf16.mxu0 %v4055_v0  ;;  %v3484_v33 = vpack.c.bf16 %v198_v25, %v197_v27  ;;  %vm441_vm3 = vmand %vm414_vm1, %vm430_vm2  ;;  %v215_v25 = vld [vmem:[#allocation8 + $0x260] sm:$0xff] }
  0xeb   :  { %v2422_v36 = vsel %vm441_vm3, 1.0, %v4057_v1 }
  0xed   :  { %3455 = vmatpush3.bf16.msra.mxu0 %v3454_v23  ;;  %v493_v23 = vsub.f32 %v418_v30, %v4219_v28  ;;  %v542_v28 = vmul.f32 1.25, %v4443_v40  ;;  %v205_v40 = vld [vmem:[#allocation8 + $0x210] sm:$0xff]  ;;  %v216_v30 = vld [vmem:[#allocation8 + $0x268] sm:$0xff] }
  0xee   :  { %3456 = vmatprep.subr.bf16.mxu0 %v4055_v0 }
  0xef   :  { %v503_v35 = vmul.f32 2.5, %v493_v23  ;;  %v551_v50 = vmul.f32 1.25, %v493_v23  ;;  %v560_v41 = vmul.f32 %v542_v28, %v4459_v60  ;;  %v594_v59 = vmul.f32 0.8333333, %v493_v23  ;;  %v206_v60 = vld [vmem:[#allocation8 + $0x218] sm:$0xff]  ;;  %v217_v23 = vld [vmem:[#allocation8 + $0x270] sm:$0xff] }
  0xf0   :  { %v3496_v7 = vpack.c.bf16 %v206_v60, %v205_v40  ;;  %v226_v28 = vld [vmem:[#allocation8 + $0x2b8] sm:$0xff]  ;;  %v235_v40 = vld [vmem:[#allocation8 + $0x300] sm:$0xff]  ;;  %v236_v60 = vld [vmem:[#allocation8 + $0x308] sm:$0xff] }
  0xf1   :  { %3458 = vmatpush3.bf16.msra.mxu0 %v3457_v54  ;;  %v483_v54 = vmul.f32 2.5, %v473_v31  ;;  %v523_v37 = vmul.f32 %v2422_v36, %v503_v35  ;;  %v3511_v31 = vpack.c.bf16 %v216_v30, %v215_v25  ;;  %v221_v36 = vld [vmem:[#allocation8 + $0x290] sm:$0xff]  ;;  %v3541_v3 = vpack.c.bf16 %v236_v60, %v235_v40  ;;  %v254_v25 = vld [vmem:[#allocation8 + $0x398] sm:$0xff] }
  0xf2   :  { %3459 = vmatprep.subr.bf16.mxu0 %v4055_v0 }
  0xf3   :  { %v513_v52 = vmul.f32 %v4454_v29, %v483_v54  ;;  %v204_v29 = vld [vmem:[#allocation8 + $0x208] sm:$0xff] }
  0xf4   :  { %v220_v54 = vld [vmem:[#allocation8 + $0x288] sm:$0xff] }
  0xf5   :  { %3461 = vmatpush3.bf16.msra.mxu0 %v3460_v39  ;;  %v3487_v39 = vpack.c.bf16 %v200_v34, %v199_v47  ;;  %v533_v44 = vadd.f32 %v523_v37, %v513_v52  ;;  %v219_v34 = vld [vmem:[#allocation8 + $0x280] sm:$0xff]  ;;  %v222_v52 = vld [vmem:[#allocation8 + $0x298] sm:$0xff] }
  0xf6   :  { %3462 = vmatprep.subr.bf16.mxu0 %v4055_v0  ;;  %v3517_v35 = vpack.c.bf16 %v220_v54, %v219_v34  ;;  %v3520_v37 = vpack.c.bf16 %v222_v52, %v221_v36  ;;  %v258_v34 = vld [vmem:[#allocation8 + $0x3b8] sm:$0xff]  ;;  %v261_v52 = vld [vmem:[#allocation8 + $0x3d0] sm:$0xff] }
  0xf7   :  { %v569_v48 = vmul.f32 %v551_v50, %v533_v44  ;;  %v225_v44 = vld [vmem:[#allocation8 + $0x2b0] sm:$0xff] }
  0xf8   :  { %v3526_v50 = vpack.c.bf16 %v226_v28, %v225_v44  ;;  %v265_v28 = vld [vmem:[#allocation8 + $0x3f0] sm:$0xff] }
  0xf9   :  { %3464 = vmatpush3.bf16.msra.mxu0 %v3463_v49  ;;  %v3490_v49 = vpack.c.bf16 %v202_v46, %v201_v43  ;;  %v578_v45 = vadd.f32 %v569_v48, %v560_v41  ;;  %v224_v43 = vld [vmem:[#allocation8 + $0x2a8] sm:$0xff] }
  0xfa   :  { %3465 = vmatprep.subr.bf16.mxu0 %v4055_v0  ;;  %v228_v41 = vld [vmem:[#allocation8 + $0x2c8] sm:$0xff] }
  0xfb   :  { %v610_v61 = vmul.f32 %v594_v59, %v578_v45  ;;  %v231_v45 = vld [vmem:[#allocation8 + $0x2e0] sm:$0xff] }
  0xfc   :  { %v3535_v59 = vpack.c.bf16 %v232_v58, %v231_v45  ;;  %v1286_v58 = vld [vmem:[#allocation13 + $0x60] sm:$0xff] }
  0xfd   :  { %3467 = vmatpush3.bf16.msra.mxu0 %v3466_v62  ;;  %v3493_v62 = vpack.c.bf16 %v204_v29, %v203_v55  ;;  %v4499_v63 = vadd.f32 %v610_v61, %v602_v38  ;;  %v230_v55 = vld [vmem:[#allocation8 + $0x2d8] sm:$0xff]  ;;  %v233_v38 = vld [vmem:[#allocation8 + $0x2f0] sm:$0xff] }
  0xfe   :  { %3468 = vmatprep.subr.bf16.mxu0 %v4055_v0  ;;  %v234_v61 = vld [vmem:[#allocation8 + $0x2f8] sm:$0xff] }
 0x100   :  { %2880 = vmatmul.mubr.f32.vlgmr.msra.gmra.mrb[0].mxu0 %v4344_v51  ;;  %v195_v51 = vld [vmem:[#allocation8 + $0x1c0] sm:$0xff] }
 0x101   :  { %3470 = vmatpush3.bf16.msra.mxu0 %v3469_v9  ;;  %2914 = vmatprep.mubr.msk.f32.mxu0 %vm4056_vm0, %v4057_v1  ;;  %v3481_v16 = vpack.c.bf16 %v196_v21, %v195_v51  ;;  %v208_v9 = vld [vmem:[#allocation8 + $0x228] sm:$0xff] }
 0x102   :  { %3471 = vmatprep.subr.bf16.mxu0 %v4055_v0  ;;  %v3499_v5 = vpack.c.bf16 %v208_v9, %v207_v8  ;;  %v3547_v8 = vpack.c.bf16 %v240_v6, %v239_v56  ;;  %v241_v9 = vld [vmem:[#allocation8 + $0x330] sm:$0xff] }
 0x105   :  { %3473 = vmatpush3.bf16.msra.mxu0 %v3472_v17  ;;  %v210_v17 = vld [vmem:[#allocation8 + $0x238] sm:$0xff] }
 0x106   :  { %3474 = vmatprep.subr.bf16.mxu0 %v4055_v0  ;;  %v3502_v42 = vpack.c.bf16 %v210_v17, %v209_v14  ;;  %v245_v14 = vld [vmem:[#allocation8 + $0x350] sm:$0xff]  ;;  %v246_v17 = vld [vmem:[#allocation8 + $0x358] sm:$0xff] }
 0x109   :  { %3476 = vmatpush3.bf16.msra.mxu0 %v3475_v2  ;;  %v1281_v2 = vld [vmem:[#allocation13 + $0x38] sm:$0xff] }
 0x10a   :  { %3477 = vmatprep.subr.bf16.mxu0 %v4055_v0  ;;  %v3598_v51 = vpack.c.bf16 %v1281_v2, %v1280_v18  ;;  %v247_v18 = vld [vmem:[#allocation8 + $0x360] sm:$0xff]  ;;  %v248_v2 = vld [vmem:[#allocation8 + $0x368] sm:$0xff] }
 0x10d   :  { %3479 = vmatpush3.bf16.msra.mxu0 %v3478_v13  ;;  %v212_v13 = vld [vmem:[#allocation8 + $0x248] sm:$0xff] }
 0x10e   :  { %3480 = vmatprep.subr.bf16.mxu0 %v4055_v0  ;;  %v3505_v21 = vpack.c.bf16 %v212_v13, %v211_v19  ;;  %v249_v19 = vld [vmem:[#allocation8 + $0x370] sm:$0xff]  ;;  %v250_v13 = vld [vmem:[#allocation8 + $0x378] sm:$0xff] }
 0x111   :  { %3482 = vmatpush3.bf16.msra.mxu0 %v3481_v16  ;;  %v214_v16 = vld [vmem:[#allocation8 + $0x258] sm:$0xff] }
 0x112   :  { %3483 = vmatprep.subr.bf16.mxu0 %v4055_v0  ;;  %v3508_v27 = vpack.c.bf16 %v214_v16, %v213_v26  ;;  %v252_v26 = vld [vmem:[#allocation8 + $0x388] sm:$0xff] }
 0x115   :  { %3485 = vmatpush3.bf16.msra.mxu0 %v3484_v33  ;;  %v218_v33 = vld [vmem:[#allocation8 + $0x278] sm:$0xff] }
 0x116   :  { %3486 = vmatprep.subr.bf16.mxu0 %v4055_v0  ;;  %v3514_v47 = vpack.c.bf16 %v218_v33, %v217_v23  ;;  %v256_v23 = vld [vmem:[#allocation8 + $0x3a8] sm:$0xff] }
 0x119   :  { %3488 = vmatpush3.bf16.msra.mxu0 %v3487_v39  ;;  %v223_v39 = vld [vmem:[#allocation8 + $0x2a0] sm:$0xff] }
 0x11a   :  { %3489 = vmatprep.subr.bf16.mxu0 %v4055_v0  ;;  %v3523_v46 = vpack.c.bf16 %v224_v43, %v223_v39  ;;  %v263_v43 = vld [vmem:[#allocation8 + $0x3e0] sm:$0xff] }
 0x11d   :  { %3491 = vmatpush3.bf16.msra.mxu0 %v3490_v49  ;;  %v229_v49 = vld [vmem:[#allocation8 + $0x2d0] sm:$0xff] }
 0x11e   :  { %3492 = vmatprep.subr.bf16.mxu0 %v4055_v0  ;;  %v3532_v29 = vpack.c.bf16 %v230_v55, %v229_v49  ;;  %v1284_v55 = vld [vmem:[#allocation13 + $0x50] sm:$0xff] }
 0x120   :  { %2915 = vmatmul.mubr.f32.vlgmr.msra.gmra.mrb[0].mxu0 %v4368_v11  ;;  %v1279_v11 = vld [vmem:[#allocation13 + $0x28] sm:$0xff] }
 0x121   :  { %3494 = vmatpush3.bf16.msra.mxu0 %v3493_v62  ;;  %2949 = vmatprep.mubr.msk.f32.mxu0 %vm4056_vm0, %v4057_v1  ;;  %v3595_v57 = vpack.c.bf16 %v1279_v11, %v1278_v53  ;;  %v3538_v62 = vpack.c.bf16 %v234_v61, %v233_v38  ;;  %v3550_v53 = vpack.c.bf16 %v242_v10, %v241_v9  ;;  %v244_v11 = vld [vmem:[#allocation8 + $0x348] sm:$0xff]  ;;  %v1288_v61 = vld [vmem:[#allocation13 + $0x70] sm:$0xff] }
 0x122   :  { %3495 = vmatprep.subr.bf16.mxu0 %v4055_v0 }
 0x123   :  { %3596 = vmatpush3.bf16.msra.mxu1 %v3595_v57  ;;  %v3556_v57 = vpack.c.bf16 %v246_v17, %v245_v14 }
 0x124   :  { %3597 = vmatprep.subr.bf16.mxu1 %v4055_v0 }
 0x125   :  { %3497 = vmatpush3.bf16.msra.mxu0 %v3496_v7  ;;  %v3544_v7 = vpack.c.bf16 %v238_v4, %v237_v24 }
 0x126   :  { %3498 = vmatprep.subr.bf16.mxu0 %v4055_v0 }
 0x127   :  { %3599 = vmatpush3.bf16.msra.mxu1 %v3598_v51  ;;  %v3562_v51 = vpack.c.bf16 %v250_v13, %v249_v19  ;;  %v4573_v13 = vld.sshfl [vmem:[#allocation10 + $0x8] sm:$0x33 pattern:$0x75316420] }
 0x128   :  { %3600 = vmatprep.subr.bf16.mxu1 %v4055_v0 }
 0x129   :  { %3500 = vmatpush3.bf16.msra.mxu0 %v3499_v5 }
 0x12a   :  { %3501 = vmatprep.subr.bf16.mxu0 %v4055_v0 }
 0x12d   :  { %3503 = vmatpush3.bf16.msra.mxu0 %v3502_v42  ;;  %v3559_v42 = vpack.c.bf16 %v248_v2, %v247_v18  ;;  %v4563_v18 = vld [vmem:[#allocation11] sm:$0xff]  ;;  %v4565_v2 = vld [vmem:[#allocation11 + $0x8] sm:$0xff] }
 0x12e   :  { %3504 = vmatprep.subr.bf16.mxu0 %v4055_v0 }
 0x131   :  { %3506 = vmatpush3.bf16.msra.mxu0 %v3505_v21  ;;  %v251_v21 = vld [vmem:[#allocation8 + $0x380] sm:$0xff] }
 0x132   :  { %3507 = vmatprep.subr.bf16.mxu0 %v4055_v0  ;;  %v3565_v16 = vpack.c.bf16 %v252_v26, %v251_v21  ;;  %v3613_v21 = vpack.c.bf16 %v4565_v2, %v4563_v18 }
 0x135   :  { %3509 = vmatpush3.bf16.msra.mxu0 %v3508_v27  ;;  %v253_v27 = vld [vmem:[#allocation8 + $0x390] sm:$0xff] }
 0x136   :  { %3510 = vmatprep.subr.bf16.mxu0 %v4055_v0  ;;  %v3568_v30 = vpack.c.bf16 %v254_v25, %v253_v27  ;;  %v4587_v27 = vrot.slane %v4573_v13, %v4208_v12 }
 0x139   :  { %3512 = vmatpush3.bf16.msra.mxu0 %v3511_v31  ;;  %v255_v31 = vld [vmem:[#allocation8 + $0x3a0] sm:$0xff] }
 0x13a   :  { %3513 = vmatprep.subr.bf16.mxu0 %v4055_v0  ;;  %v3571_v33 = vpack.c.bf16 %v256_v23, %v255_v31 }
 0x13d   :  { %3515 = vmatpush3.bf16.msra.mxu0 %v3514_v47  ;;  %v257_v47 = vld [vmem:[#allocation8 + $0x3b0] sm:$0xff] }
 0x13e   :  { %3516 = vmatprep.subr.bf16.mxu0 %v4055_v0  ;;  %v3574_v54 = vpack.c.bf16 %v258_v34, %v257_v47 }
 0x140   :  { %2950 = vmatmul.mubr.f32.vlgmr.msra.gmra.mrb[0].mxu0 %v4380_v32  ;;  %v227_v32 = vld [vmem:[#allocation8 + $0x2c0] sm:$0xff] }
 0x141   :  { %3518 = vmatpush3.bf16.msra.mxu0 %v3517_v35  ;;  %2984 = vmatprep.mubr.msk.f32.mxu0 %vm4056_vm0, %v4057_v1  ;;  %v3529_v48 = vpack.c.bf16 %v228_v41, %v227_v32  ;;  %v260_v35 = vld [vmem:[#allocation8 + $0x3c8] sm:$0xff]  ;;  %v1282_v41 = vld [vmem:[#allocation13 + $0x40] sm:$0xff] }
 0x142   :  { %3519 = vmatprep.subr.bf16.mxu0 %v4055_v0 }
 0x145   :  { %3521 = vmatpush3.bf16.msra.mxu0 %v3520_v37  ;;  %v262_v37 = vld [vmem:[#allocation8 + $0x3d8] sm:$0xff] }
 0x146   :  { %3522 = vmatprep.subr.bf16.mxu0 %v4055_v0  ;;  %v3580_v39 = vpack.c.bf16 %v262_v37, %v261_v52 }
 0x149   :  { %3524 = vmatpush3.bf16.msra.mxu0 %v3523_v46  ;;  %v264_v46 = vld [vmem:[#allocation8 + $0x3e8] sm:$0xff] }
 0x14a   :  { %3525 = vmatprep.subr.bf16.mxu0 %v4055_v0  ;;  %v3583_v44 = vpack.c.bf16 %v264_v46, %v263_v43 }
 0x14d   :  { %3527 = vmatpush3.bf16.msra.mxu0 %v3526_v50  ;;  %v266_v50 = vld [vmem:[#allocation8 + $0x3f8] sm:$0xff] }
 0x14e   :  { %3528 = vmatprep.subr.bf16.mxu0 %v4055_v0  ;;  %v3586_v32 = vpack.c.bf16 %v266_v50, %v265_v28 }
 0x151   :  { %3530 = vmatpush3.bf16.msra.mxu0 %v3529_v48  ;;  %v1283_v48 = vld [vmem:[#allocation13 + $0x48] sm:$0xff] }
 0x152   :  { %3531 = vmatprep.subr.bf16.mxu0 %v4055_v0  ;;  %v3601_v49 = vpack.c.bf16 %v1283_v48, %v1282_v41 }
 0x154   :  { %3602 = vmatpush3.bf16.msra.mxu1 %v3601_v49 }
 0x155   :  { %3533 = vmatpush3.bf16.msra.mxu0 %v3532_v29  ;;  %v1285_v29 = vld [vmem:[#allocation13 + $0x58] sm:$0xff]  ;;  %3603 = vmatprep.subr.bf16.mxu1 %v4055_v0 }
 0x156   :  { %3534 = vmatprep.subr.bf16.mxu0 %v4055_v0  ;;  %v3604_v45 = vpack.c.bf16 %v1285_v29, %v1284_v55 }
 0x158   :  { %3605 = vmatpush3.bf16.msra.mxu1 %v3604_v45 }
 0x159   :  { %3536 = vmatpush3.bf16.msra.mxu0 %v3535_v59  ;;  %v1287_v59 = vld [vmem:[#allocation13 + $0x68] sm:$0xff]  ;;  %3606 = vmatprep.subr.bf16.mxu1 %v4055_v0 }
 0x15a   :  { %3537 = vmatprep.subr.bf16.mxu0 %v4055_v0  ;;  %v3607_v38 = vpack.c.bf16 %v1287_v59, %v1286_v58  ;;  %v4625_v59 = vrot.slane %v4587_v27, %v4212_v20 }
 0x15c   :  { %3608 = vmatpush3.bf16.msra.mxu1 %v3607_v38  ;;  %v1467_v38 = vcombine.high %v4573_v13, %v4573_v13 }
 0x15d   :  { %3539 = vmatpush3.bf16.msra.mxu0 %v3538_v62  ;;  %v1289_v62 = vld [vmem:[#allocation13 + $0x78] sm:$0xff]  ;;  %3609 = vmatprep.subr.bf16.mxu1 %v4055_v0 }
 0x15e   :  { %3540 = vmatprep.subr.bf16.mxu0 %v4055_v0  ;;  %v3610_v40 = vpack.c.bf16 %v1289_v62, %v1288_v61 }
 0x160   :  { %2985 = vmatmul.mubr.f32.vlgmr.msra.gmra.mrb[0].mxu0 %v4427_v22  ;;  %v243_v22 = vld [vmem:[#allocation8 + $0x340] sm:$0xff]  ;;  %3611 = vmatpush3.bf16.msra.mxu1 %v3610_v40 }
 0x161   :  { %3542 = vmatpush3.bf16.msra.mxu0 %v3541_v3  ;;  %3019 = vmatprep.mubr.msk.f32.mxu0 %vm4056_vm0, %v4057_v1  ;;  %v3553_v5 = vpack.c.bf16 %v244_v11, %v243_v22 }
 0x162   :  { %3543 = vmatprep.subr.bf16.mxu0 %v4055_v0  ;;  %3612 = vmatprep.subr.bf16.mxu1 %v4055_v0 }
 0x165   :  { %3545 = vmatpush3.bf16.msra.mxu0 %v3544_v7 }
 0x166   :  { %3546 = vmatprep.subr.bf16.mxu0 %v4055_v0 }
 0x169   :  { %3548 = vmatpush3.bf16.msra.mxu0 %v3547_v8 }
 0x16a   :  { %3549 = vmatprep.subr.bf16.mxu0 %v4055_v0 }
 0x16d   :  { %3551 = vmatpush3.bf16.msra.mxu0 %v3550_v53 }
 0x16e   :  { %3552 = vmatprep.subr.bf16.mxu0 %v4055_v0 }
 0x171   :  { %3554 = vmatpush3.bf16.msra.mxu0 %v3553_v5 }
 0x172   :  { %3555 = vmatprep.subr.bf16.mxu0 %v4055_v0 }
 0x175   :  { %3557 = vmatpush3.bf16.msra.mxu0 %v3556_v57 }
 0x176   :  { %3558 = vmatprep.subr.bf16.mxu0 %v4055_v0 }
 0x179   :  { %3560 = vmatpush3.bf16.msra.mxu0 %v3559_v42 }
 0x17a   :  { %3561 = vmatprep.subr.bf16.mxu0 %v4055_v0 }
 0x17d   :  { %3563 = vmatpush3.bf16.msra.mxu0 %v3562_v51 }
 0x17e   :  { %3564 = vmatprep.subr.bf16.mxu0 %v4055_v0 }
 0x180   :  { %3020 = vmatmul.mubr.f32.vlgmr.msra.gmra.mrb[0].mxu0 %v4471_v15  ;;  %v259_v15 = vld [vmem:[#allocation8 + $0x3c0] sm:$0xff] }
 0x181   :  { %3566 = vmatpush3.bf16.msra.mxu0 %v3565_v16  ;;  %3054 = vmatprep.mubr.msk.f32.mxu0 %vm4056_vm0, %v4057_v1  ;;  %v3577_v36 = vpack.c.bf16 %v260_v35, %v259_v15 }
 0x182   :  { %3567 = vmatprep.subr.bf16.mxu0 %v4055_v0 }
 0x185   :  { %3569 = vmatpush3.bf16.msra.mxu0 %v3568_v30 }
 0x186   :  { %3570 = vmatprep.subr.bf16.mxu0 %v4055_v0 }
 0x189   :  { %3572 = vmatpush3.bf16.msra.mxu0 %v3571_v33 }
 0x18a   :  { %3573 = vmatprep.subr.bf16.mxu0 %v4055_v0 }
 0x18d   :  { %3575 = vmatpush3.bf16.msra.mxu0 %v3574_v54 }
 0x18e   :  { %3576 = vmatprep.subr.bf16.mxu0 %v4055_v0 }
 0x191   :  { %3578 = vmatpush3.bf16.msra.mxu0 %v3577_v36 }
 0x192   :  { %3579 = vmatprep.subr.bf16.mxu0 %v4055_v0 }
 0x195   :  { %3581 = vmatpush3.bf16.msra.mxu0 %v3580_v39 }
 0x196   :  { %3582 = vmatprep.subr.bf16.mxu0 %v4055_v0 }
 0x199   :  { %3584 = vmatpush3.bf16.msra.mxu0 %v3583_v44 }
 0x19a   :  { %3585 = vmatprep.subr.bf16.mxu0 %v4055_v0 }
 0x19d   :  { %3587 = vmatpush3.bf16.msra.mxu0 %v3586_v32 }
 0x1a0   :  { %3055 = vmatmul.mubr.f32.vlgmr.msra.gmra.mrb[0].mxu0 %v4499_v63  ;;  %v1256_v63 = vld [vmem:[#allocation10] sm:$0xff] }
 0x1a1   :  { %v1411_v60 = vcombine.high %v1256_v63, %v1256_v63  ;;  %v1418_v3 = vrot.slane %v1256_v63, %v4208_v12 }
 0x1a3   :  { %v1425_v24 = vrot.slane %v1411_v60, %v4208_v12  ;;  %v1426_v4 = vcombine.high %v1418_v3, %v1418_v3  ;;  %v1434_v56 = vrot.slane %v1418_v3, %v4208_v12 }
 0x1a5   :  { %v1427_v7 = vcombine.high %v1425_v24, %v1425_v24  ;;  %v1448_v6 = vrot.slane %v1426_v4, %v4208_v12  ;;  %v1441_v8 = vrot.slane %v1425_v24, %v4208_v12  ;;  %v1456_v10 = vcombine.high %v1434_v56, %v1434_v56 }
 0x1a6   :  { %v1487_v5 = vrot.slane %v1434_v56, %v4212_v20 }
 0x1a7   :  { %v1455_v9 = vrot.slane %v1427_v7, %v4208_v12  ;;  %v1458_v53 = vcombine.high %v1448_v6, %v1448_v6  ;;  %v1457_v22 = vcombine.high %v1441_v8, %v1441_v8  ;;  %v1491_v14 = vrot.slane %v1448_v6, %v4212_v20 }
 0x1a8   :  { %v1495_v17 = vrot.slane %v1456_v10, %v4212_v20  ;;  %v4568_v42 = vrot.slane %v1441_v8, %v4212_v20  ;;  %v4635_v10 = vld [vmem:[#allocation11 + $0x18] sm:$0xff] }
 0x1a9   :  { %v1459_v11 = vcombine.high %v1455_v9, %v1455_v9  ;;  %v1499_v57 = vrot.slane %v1458_v53, %v4212_v20  ;;  %v4571_v19 = vrot.slane %v1455_v9, %v4212_v20  ;;  %v4580_v26 = vrot.slane %v1457_v22, %v4212_v20  ;;  %v4633_v9 = vld [vmem:[#allocation11 + $0x10] sm:$0xff] }
 0x1ab   :  { %v4583_v16 = vrot.slane %v1459_v11, %v4212_v20 }
 0x273   :  { %v4575_v51 = vpop.f32.mrb[0].mxu0 }
 0x274   :  { %v3056_v25 = vpop.f32.mrb[1].mxu0  ;;  %vm1539_vm4 = vcmp.ge.f32.partialorder %v4575_v51, %v1487_v5  ;;  %vm1540_vm5 = vcmp.ge.f32.partialorder %v4575_v51, %v1491_v14  ;;  %vm1541_vm6 = vcmp.ge.f32.partialorder %v4575_v51, %v1495_v17  ;;  %vm1542_vm7 = vcmp.ge.f32.partialorder %v4575_v51, %v1499_v57 }
 0x275   :  { %vm1555_vm8 = vcmp.lt.f32.partialorder %v4575_v51, %v1491_v14  ;;  %vm1556_vm9 = vcmp.lt.f32.partialorder %v4575_v51, %v1495_v17  ;;  %vm1557_vm10 = vcmp.lt.f32.partialorder %v4575_v51, %v1499_v57  ;;  %vm1558_vm11 = vcmp.lt.f32.partialorder %v4575_v51, %v4568_v42 }
 0x276   :  { %vm1566_vm12 = vmand %vm1539_vm4, %vm1555_vm8  ;;  %v1599_v30 = vsub.f32 %v4575_v51, %v1487_v5  ;;  %v1600_v31 = vsub.f32 %v4575_v51, %v1491_v14  ;;  %v4601_v23 = vsub.f32 %v4575_v51, %v1495_v17  ;;  %v4604_v33 = vsub.f32 %v4575_v51, %v1499_v57 }
 0x277   :  { %vm1567_vm13 = vmand %vm1540_vm5, %vm1556_vm9  ;;  %v2425_v47 = vsel %vm1566_vm12, 1.0, %v4057_v1  ;;  %v1619_v34 = vsub.f32 %v1495_v17, %v4575_v51  ;;  %v1620_v54 = vsub.f32 %v1499_v57, %v4575_v51  ;;  %v1621_v15 = vsub.f32 %v4568_v42, %v4575_v51 }
 0x278   :  { %vm1568_vm14 = vmand %vm1541_vm6, %vm1557_vm10  ;;  %v2426_v35 = vsel %vm1567_vm13, 1.0, %v4057_v1  ;;  %v1609_v36 = vmul.f32 2.5, %v1599_v30  ;;  %v1610_v52 = vmul.f32 2.5, %v1600_v31  ;;  %v1611_v37 = vmul.f32 2.5, %v4601_v23 }
 0x279   :  { %vm1569_vm15 = vmand %vm1542_vm7, %vm1558_vm11  ;;  %v2427_v39 = vsel %vm1568_vm14, 1.0, %v4057_v1  ;;  %v1612_v43 = vmul.f32 2.5, %v4604_v33  ;;  %v1629_v46 = vmul.f32 2.5, %v1619_v34  ;;  %v1630_v44 = vmul.f32 2.5, %v1620_v54 }
 0x27a   :  { %v2428_v28 = vsel %vm1569_vm15, 1.0, %v4057_v1  ;;  %v1631_v50 = vmul.f32 2.5, %v1621_v15  ;;  %v1639_v32 = vmul.f32 %v2425_v47, %v1609_v36  ;;  %v1640_v41 = vmul.f32 %v2426_v35, %v1610_v52 }
 0x27b   :  { %v1641_v48 = vmul.f32 %v2427_v39, %v1611_v37  ;;  %v1642_v49 = vmul.f32 %v2428_v28, %v1612_v43  ;;  %v1649_v55 = vmul.f32 %v2426_v35, %v1629_v46  ;;  %v1650_v29 = vmul.f32 %v2427_v39, %v1630_v44  ;;  %v4654_v35 = vld [vmem:[#allocation11 + $0x28] sm:$0xff] }
 0x27c   :  { %v1651_v45 = vmul.f32 %v2428_v28, %v1631_v50  ;;  %v1669_v58 = vmul.f32 1.25, %v1599_v30  ;;  %v1670_v40 = vmul.f32 1.25, %v1600_v31  ;;  %v1678_v63 = vmul.f32 1.25, %v1620_v54 }
 0x27d   :  { %v1659_v61 = vadd.f32 %v1649_v55, %v1639_v32  ;;  %v1660_v62 = vadd.f32 %v1650_v29, %v1640_v41  ;;  %v1679_v3 = vmul.f32 1.25, %v1621_v15  ;;  %v1714_v24 = vmul.f32 0.8333333, %v1599_v30  ;;  %v4668_v55 = vld [vmem:[#allocation11 + $0x30] sm:$0xff]  ;;  %v4670_v29 = vld [vmem:[#allocation11 + $0x38] sm:$0xff] }
 0x27e   :  { %v1661_v60 = vadd.f32 %v1651_v45, %v1641_v48  ;;  %vm1543_vm1 = vcmp.ge.f32.partialorder %v4575_v51, %v4568_v42  ;;  %vm1559_vm2 = vcmp.lt.f32.partialorder %v4575_v51, %v4571_v19  ;;  %v1722_v8 = vmul.f32 0.8333333, %v1621_v15  ;;  %v4652_v15 = vld [vmem:[#allocation11 + $0x20] sm:$0xff] }
 0x27f   :  { %v1687_v4 = vmul.f32 %v1669_v58, %v1659_v61  ;;  %v1688_v7 = vmul.f32 %v1670_v40, %v1660_v62  ;;  %v1696_v56 = vmul.f32 %v1678_v63, %v1660_v62  ;;  %vm1570_vm3 = vmand %vm1543_vm1, %vm1559_vm2  ;;  %v1622_v53 = vsub.f32 %v4571_v19, %v4575_v51 }
 0x280   :  { %v1697_v6 = vmul.f32 %v1679_v3, %v1661_v60  ;;  %v1671_v22 = vmul.f32 1.25, %v4601_v23  ;;  %v2423_v5 = vmul.f32 -1.442695, %v4575_v51  ;;  %v2429_v14 = vsel %vm1570_vm3, 1.0, %v4057_v1  ;;  %v4699_v3 = vld [vmem:[#allocation11 + $0x48] sm:$0xff] }
 0x281   :  { %v1705_v11 = vadd.f32 %v1696_v56, %v1687_v4  ;;  %vm1544_vm4 = vcmp.ge.f32.partialorder %v4575_v51, %v4571_v19  ;;  %v1632_v57 = vmul.f32 2.5, %v1622_v53  ;;  %v1715_v25 = vmul.f32 0.8333333, %v1600_v31 }
 0x282   :  { %v1706_v17 = vadd.f32 %v1697_v6, %v1688_v7  ;;  %v1689_v13 = vmul.f32 %v1671_v22, %v1661_v60  ;;  %v3616_v47 = vpack.c.bf16 %v4635_v10, %v4633_v9  ;;  %vm1560_vm5 = vcmp.lt.f32.partialorder %v4575_v51, %v4580_v26  ;;  %v4697_v60 = vld [vmem:[#allocation11 + $0x40] sm:$0xff] }
 0x283   :  { %v1730_v30 = vmul.f32 %v1714_v24, %v1705_v11  ;;  %v4650_v34 = vsub.f32 %v4575_v51, %v4568_v42  ;;  %v1652_v36 = vmul.f32 %v2429_v14, %v1632_v57  ;;  %vm1571_vm6 = vmand %vm1544_vm4, %vm1560_vm5  ;;  %v1623_v31 = vsub.f32 %v4580_v26, %v4575_v51 }
 0x284   :  { %v1738_v54 = vmul.f32 %v1722_v8, %v1706_v17  ;;  %v1731_v52 = vmul.f32 %v1715_v25, %v1706_v17  ;;  %3856 = vpow2.f32 %v2423_v5  ;;  %v1680_v37 = vmul.f32 1.25, %v1622_v53 }
 0x285   :  { %v2430_v39 = vsel %vm1571_vm6, 1.0, %v4057_v1  ;;  %v1613_v43 = vmul.f32 2.5, %v4650_v34  ;;  %v1662_v42 = vadd.f32 %v1652_v36, %v1642_v49  ;;  %v1633_v44 = vmul.f32 2.5, %v1623_v31 }
 0x286   :  { %v1746_v46 = vadd.f32 %v1738_v54, %v1730_v30  ;;  %v1672_v28 = vmul.f32 1.25, %v4604_v33  ;;  %v3619_v50 = vpack.c.bf16 %v4654_v35, %v4652_v15  ;;  %v4664_v41 = vrot.slane %v1467_v38, %v4208_v12 }
 0x287   :  { %v1643_v32 = vmul.f32 %v2429_v14, %v1613_v43  ;;  %v1482_v48 = vcombine.high %v4587_v27, %v4587_v27  ;;  %v1698_v45 = vmul.f32 %v1680_v37, %v1662_v42  ;;  %v1723_v49 = vmul.f32 0.8333333, %v1622_v53 }
 0x288   :  { %3090 = vmatmul.mubr.f32.vlgmr.msra.gmra.mrb[0].mxu1 %v1746_v46  ;;  %v1653_v58 = vmul.f32 %v2430_v39, %v1633_v44  ;;  %v1690_v61 = vmul.f32 %v1672_v28, %v1662_v42  ;;  %v1681_v12 = vmul.f32 1.25, %v1623_v31  ;;  %v1716_v38 = vmul.f32 0.8333333, %v4601_v23 }
 0x289   :  { %3614 = vmatpush3.bf16.msra.mxu1 %v3613_v21  ;;  %3124 = vmatprep.mubr.msk.f32.mxu1 %vm4056_vm0, %v4057_v1  ;;  %vm1545_vm7 = vcmp.ge.f32.partialorder %v4575_v51, %v4580_v26  ;;  %vm1561_vm8 = vcmp.lt.f32.partialorder %v4575_v51, %v4583_v16  ;;  %v1707_v27 = vadd.f32 %v1698_v45, %v1689_v13  ;;  %v1673_v40 = vmul.f32 1.25, %v4650_v34 }
 0x28a   :  { %3615 = vmatprep.subr.bf16.mxu1 %v4055_v0  ;;  %v1663_v62 = vadd.f32 %v1653_v58, %v1643_v32  ;;  %vm1572_vm9 = vmand %vm1545_vm7, %vm1561_vm8  ;;  %v4685_v18 = vsub.f32 %v4575_v51, %v4571_v19  ;;  %v1624_v2 = vsub.f32 %v4583_v16, %v4575_v51  ;;  %v3622_v21 = vpack.c.bf16 %v4670_v29, %v4668_v55 }
 0x28b   :  { %v2431_v23 = vsel %vm1572_vm9, 1.0, %v4057_v1  ;;  %v4695_v63 = vrot.slane %v4664_v41, %v4212_v20  ;;  %v1739_v19 = vmul.f32 %v1723_v49, %v1707_v27  ;;  %v1732_v4 = vmul.f32 %v1716_v38, %v1707_v27 }
 0x28c   :  { %v1699_v24 = vmul.f32 %v1681_v12, %v1663_v62  ;;  %v1614_v7 = vmul.f32 2.5, %v4685_v18  ;;  %v1724_v56 = vmul.f32 0.8333333, %v1623_v31  ;;  %v1634_v6 = vmul.f32 2.5, %v1624_v2  ;;  %v1269_v31 = vld [vmem:[#allocation11 + $0x58] sm:$0xff] }
 0x28d   :  { %3617 = vmatpush3.bf16.msra.mxu1 %v3616_v47  ;;  %v1691_v8 = vmul.f32 %v1673_v40, %v1663_v62  ;;  %v4703_v9 = vrot.slane %v1482_v48, %v4212_v20  ;;  %v4706_v10 = vadd.f32 %v1739_v19, %v1731_v52  ;;  %v1717_v11 = vmul.f32 0.8333333, %v4604_v33 }
 0x28e   :  { %3618 = vmatprep.subr.bf16.mxu1 %v4055_v0  ;;  %v1708_v53 = vadd.f32 %v1699_v24, %v1690_v61  ;;  %v1644_v22 = vmul.f32 %v2430_v39, %v1614_v7  ;;  %v3857_v5 = vpop.eup %3856  ;;  %v3625_v14 = vpack.c.bf16 %v4699_v3, %v4697_v60  ;;  %v1654_v17 = vmul.f32 %v2431_v23, %v1634_v6 }
 0x28f   :  { %vm1546_vm10 = vcmp.ge.f32.partialorder %v4575_v51, %v4583_v16  ;;  %v1483_v57 = vcombine.high %v4664_v41, %v4664_v41  ;;  %vm1562_vm11 = vcmp.lt.f32.partialorder %v4575_v51, %v4625_v59  ;;  %v4719_v30 = vsub.f32 %v4575_v51, %v4580_v26  ;;  %v1268_v26 = vld [vmem:[#allocation11 + $0x50] sm:$0xff] }
 0x290   :  { %v1740_v13 = vmul.f32 %v1724_v56, %v1708_v53  ;;  %v1733_v25 = vmul.f32 %v1717_v11, %v1708_v53  ;;  %v1664_v33 = vadd.f32 %v1654_v17, %v1644_v22  ;;  %v1682_v47 = vmul.f32 1.25, %v1624_v2  ;;  %vm1573_vm12 = vmand %vm1546_vm10, %vm1562_vm11 }
 0x291   :  { %3620 = vmatpush3.bf16.msra.mxu1 %v3619_v50  ;;  %v1625_v54 = vsub.f32 %v4625_v59, %v4575_v51  ;;  %v1674_v15 = vmul.f32 1.25, %v4685_v18  ;;  %v2432_v36 = vsel %vm1573_vm12, 1.0, %v4057_v1  ;;  %v1615_v52 = vmul.f32 2.5, %v4719_v30 }
 0x292   :  { %3621 = vmatprep.subr.bf16.mxu1 %v4055_v0  ;;  %v4725_v35 = vadd.f32 %v1740_v13, %v1732_v4  ;;  %vm1547_vm13 = vcmp.ge.f32.partialorder %v4575_v51, %v4625_v59  ;;  %v1405_v37 = vadd.f32 1.0, %v3857_v5  ;;  %v1700_v39 = vmul.f32 %v1682_v47, %v1664_v33 }
 0x293   :  { %v1725_v43 = vmul.f32 0.8333333, %v1624_v2  ;;  %v1635_v46 = vmul.f32 2.5, %v1625_v54  ;;  %v1645_v42 = vmul.f32 %v2431_v23, %v1615_v52  ;;  %v1692_v44 = vmul.f32 %v1674_v15, %v1664_v33  ;;  %v1271_v23 = vld [vmem:[#allocation11 + $0x68] sm:$0xff] }
 0x294   :  { %v1718_v28 = vmul.f32 0.8333333, %v4650_v34  ;;  %vm1563_vm14 = vcmp.lt.f32.partialorder %v4575_v51, %v4695_v63  ;;  %v1709_v50 = vadd.f32 %v1700_v39, %v1691_v8  ;;  %v4736_v41 = vsub.f32 %v4575_v51, %v4583_v16 }
 0x295   :  { %3623 = vmatpush3.bf16.msra.mxu1 %v3622_v21  ;;  %v1655_v32 = vmul.f32 %v2432_v36, %v1635_v46  ;;  %vm1574_vm15 = vmand %vm1547_vm13, %vm1563_vm14  ;;  %v1626_v48 = vsub.f32 %v4695_v63, %v4575_v51  ;;  %v3628_v55 = vpack.c.bf16 %v1269_v31, %v1268_v26  ;;  %v1683_v29 = vmul.f32 1.25, %v1625_v54  ;;  %v1290_v31 = vld [vmem:[#allocation13 + $0x80] sm:$0xff] }
 0x296   :  { %3624 = vmatprep.subr.bf16.mxu1 %v4055_v0  ;;  %v2433_v34 = vsel %vm1574_vm15, 1.0, %v4057_v1  ;;  %v1553_v45 = vrot.slane %v1483_v57, %v4212_v20  ;;  %v1741_v49 = vmul.f32 %v1725_v43, %v1709_v50  ;;  %v1734_v61 = vmul.f32 %v1718_v28, %v1709_v50  ;;  %v1270_v20 = vld [vmem:[#allocation11 + $0x60] sm:$0xff] }
 0x297   :  { %v1665_v58 = vadd.f32 %v1655_v32, %v1645_v42  ;;  %v1675_v12 = vmul.f32 1.25, %v4719_v30  ;;  %3858 = vrcp.f32 %v1405_v37  ;;  %v1616_v16 = vmul.f32 2.5, %v4736_v41  ;;  %v1291_v37 = vld [vmem:[#allocation13 + $0x88] sm:$0xff] }
 0x298   :  { %v1636_v38 = vmul.f32 2.5, %v1626_v48  ;;  %vm1548_vm1 = vcmp.ge.f32.partialorder %v4575_v51, %v4695_v63  ;;  %v4747_v27 = vadd.f32 %v1741_v49, %v1733_v25  ;;  %v1726_v2 = vmul.f32 0.8333333, %v1625_v54 }
 0x299   :  { %3626 = vmatpush3.bf16.msra.mxu1 %v3625_v14  ;;  %v1701_v62 = vmul.f32 %v1683_v29, %v1665_v58  ;;  %v1693_v21 = vmul.f32 %v1675_v12, %v1665_v58  ;;  %v1646_v40 = vmul.f32 %v2432_v36, %v1616_v16  ;;  %vm1564_vm2 = vcmp.lt.f32.partialorder %v4575_v51, %v4703_v9  ;;  %v1273_v14 = vld [vmem:[#allocation11 + $0x78] sm:$0xff]  ;;  %v1292_v12 = vld [vmem:[#allocation13 + $0x90] sm:$0xff] }
 0x29a   :  { %3627 = vmatprep.subr.bf16.mxu1 %v4055_v0  ;;  %v1656_v60 = vmul.f32 %v2433_v34, %v1636_v38  ;;  %v1607_v3 = vsub.f32 %v4575_v51, %v4625_v59  ;;  %v1684_v24 = vmul.f32 1.25, %v1626_v48  ;;  %v1719_v4 = vmul.f32 0.8333333, %v4685_v18  ;;  %vm1575_vm3 = vmand %vm1548_vm1, %vm1564_vm2  ;;  %v1272_v18 = vld [vmem:[#allocation11 + $0x70] sm:$0xff]  ;;  %v1293_v16 = vld [vmem:[#allocation13 + $0x98] sm:$0xff] }
 0x29b   :  { %v1710_v19 = vadd.f32 %v1701_v62, %v1692_v44  ;;  %v1627_v7 = vsub.f32 %v4703_v9, %v4575_v51  ;;  %v2434_v6 = vsel %vm1575_vm3, 1.0, %v4057_v1  ;;  %v1676_v53 = vmul.f32 1.25, %v4736_v41 }
 0x29c   :  { %v1666_v56 = vadd.f32 %v1656_v60, %v1646_v40  ;;  %v1617_v8 = vmul.f32 2.5, %v1607_v3  ;;  %v3631_v22 = vpack.c.bf16 %v1271_v23, %v1270_v20  ;;  %v1727_v57 = vmul.f32 0.8333333, %v1626_v48 }
 0x29d   :  { %3629 = vmatpush3.bf16.msra.mxu1 %v3628_v55  ;;  %v1742_v59 = vmul.f32 %v1726_v2, %v1710_v19  ;;  %v1735_v11 = vmul.f32 %v1719_v4, %v1710_v19  ;;  %v1637_v5 = vmul.f32 2.5, %v1627_v7  ;;  %v1720_v54 = vmul.f32 0.8333333, %v4719_v30  ;;  %v1296_v4 = vld [vmem:[#allocation13 + $0xb0] sm:$0xff] }
 0x29e   :  { %3630 = vmatprep.subr.bf16.mxu1 %v4055_v0  ;;  %v1702_v17 = vmul.f32 %v1684_v24, %v1666_v56  ;;  %v1647_v13 = vmul.f32 %v2433_v34, %v1617_v8  ;;  %v1694_v25 = vmul.f32 %v1676_v53, %v1666_v56  ;;  %vm1549_vm4 = vcmp.ge.f32.partialorder %v4575_v51, %v4703_v9  ;;  %v1298_v8 = vld [vmem:[#allocation13 + $0xc0] sm:$0xff]  ;;  %v1299_v53 = vld [vmem:[#allocation13 + $0xc8] sm:$0xff] }
 0x29f   :  { %v4763_v33 = vadd.f32 %v1742_v59, %v1734_v61  ;;  %v1657_v47 = vmul.f32 %v2434_v6, %v1637_v5  ;;  %vm1565_vm5 = vcmp.lt.f32.partialorder %v4575_v51, %v1553_v45  ;;  %v1608_v36 = vsub.f32 %v4575_v51, %v4695_v63  ;;  %v1300_v59 = vld [vmem:[#allocation13 + $0xd0] sm:$0xff] }
 0x2a0   :  { %v1711_v15 = vadd.f32 %v1702_v17, %v1693_v21  ;;  %v1628_v52 = vsub.f32 %v1553_v45, %v4575_v51  ;;  %v3634_v26 = vpack.c.bf16 %v1273_v14, %v1272_v18  ;;  %v1685_v43 = vmul.f32 1.25, %v1627_v7  ;;  %vm1576_vm6 = vmand %vm1549_vm4, %vm1565_vm5  ;;  %v1302_v18 = vld [vmem:[#allocation13 + $0xe0] sm:$0xff]  ;;  %v1303_v14 = vld [vmem:[#allocation13 + $0xe8] sm:$0xff] }
 0x2a1   :  { %3632 = vmatpush3.bf16.msra.mxu1 %v3631_v22  ;;  %v1667_v39 = vadd.f32 %v1657_v47, %v1647_v13  ;;  %v1677_v46 = vmul.f32 1.25, %v1607_v3  ;;  %v3859_v30 = vpop.eup %3858  ;;  %v2435_v44 = vsel %vm1576_vm6, 1.0, %v4057_v1  ;;  %v1618_v28 = vmul.f32 2.5, %v1608_v36  ;;  %v1305_v13 = vld [vmem:[#allocation13 + $0xf8] sm:$0xff]  ;;  %v1306_v47 = vld [vmem:[#allocation13 + $0x100] sm:$0xff]  ;;  %v1308_v36 = vld [vmem:[#allocation13 + $0x110] sm:$0xff] }
 0x2a2   :  { %3633 = vmatprep.subr.bf16.mxu1 %v4055_v0  ;;  %v1743_v9 = vmul.f32 %v1727_v57, %v1711_v15  ;;  %v1736_v42 = vmul.f32 %v1720_v54, %v1711_v15  ;;  %v1638_v63 = vmul.f32 2.5, %v1628_v52  ;;  %v3637_v32 = vpack.c.bf16 %v1291_v37, %v1290_v31  ;;  %v1304_v57 = vld [vmem:[#allocation13 + $0xf0] sm:$0xff]  ;;  %v1307_v54 = vld [vmem:[#allocation13 + $0x108] sm:$0xff]  ;;  %v1310_v31 = vld [vmem:[#allocation13 + $0x120] sm:$0xff] }
 0x2a3   :  { %v1703_v50 = vmul.f32 %v1685_v43, %v1667_v39  ;;  %v1648_v55 = vmul.f32 %v2434_v6, %v1618_v28  ;;  %v1695_v29 = vmul.f32 %v1677_v46, %v1667_v39  ;;  %v1728_v45 = vmul.f32 0.8333333, %v1627_v7  ;;  %v1297_v7 = vld [vmem:[#allocation13 + $0xb8] sm:$0xff]  ;;  %v1311_v37 = vld [vmem:[#allocation13 + $0x128] sm:$0xff]  ;;  %v1312_v43 = vld [vmem:[#allocation13 + $0x130] sm:$0xff] }
 0x2a4   :  { %v4774_v48 = vadd.f32 %v1743_v9, %v1735_v11  ;;  %v1658_v49 = vmul.f32 %v2435_v44, %v1638_v63  ;;  %v1721_v58 = vmul.f32 0.8333333, %v4736_v41  ;;  %v1408_v61 = vmul.f32 %v3859_v30, %v4575_v51  ;;  %v1294_v51 = vld [vmem:[#allocation13 + $0xa0] sm:$0xff]  ;;  %v1295_v41 = vld [vmem:[#allocation13 + $0xa8] sm:$0xff]  ;;  %v1301_v11 = vld [vmem:[#allocation13 + $0xd8] sm:$0xff] }
 0x2a5   :  { %3635 = vmatpush3.bf16.msra.mxu1 %v3634_v26  ;;  %v1712_v34 = vadd.f32 %v1703_v50, %v1694_v25  ;;  %v1686_v2 = vmul.f32 1.25, %v1628_v52  ;;  %v3640_v20 = vpack.c.bf16 %v1293_v16, %v1292_v12  ;;  %v1729_v3 = vmul.f32 0.8333333, %v1628_v52  ;;  %v1309_v52 = vld [vmem:[#allocation13 + $0x118] sm:$0xff]  ;;  %v1315_v9 = vld [vmem:[#allocation13 + $0x148] sm:$0xff]  ;;  %v1316_v44 = vld [vmem:[#allocation13 + $0x150] sm:$0xff] }
 0x2a6   :  { %3636 = vmatprep.subr.bf16.mxu1 %v4055_v0  ;;  %v1668_v62 = vadd.f32 %v1658_v49, %v1648_v55  ;;  %v3643_v19 = vpack.c.bf16 %v1295_v41, %v1294_v51  ;;  %v3646_v6 = vpack.c.bf16 %v1297_v7, %v1296_v4  ;;  %v3649_v22 = vpack.c.bf16 %v1299_v53, %v1298_v8  ;;  %v1313_v46 = vld [vmem:[#allocation13 + $0x138] sm:$0xff]  ;;  %v1318_v63 = vld [vmem:[#allocation13 + $0x160] sm:$0xff]  ;;  %v1324_v12 = vld [vmem:[#allocation13 + $0x190] sm:$0xff] }
 0x2a7   :  { %v1744_v38 = vmul.f32 %v1728_v45, %v1712_v34  ;;  %v1737_v21 = vmul.f32 %v1721_v58, %v1712_v34  ;;  %v3652_v5 = vpack.c.bf16 %v1301_v11, %v1300_v59  ;;  %v3655_v17 = vpack.c.bf16 %v1303_v14, %v1302_v18  ;;  %v1317_v28 = vld [vmem:[#allocation13 + $0x158] sm:$0xff]  ;;  %v1322_v49 = vld [vmem:[#allocation13 + $0x180] sm:$0xff]  ;;  %v1323_v58 = vld [vmem:[#allocation13 + $0x188] sm:$0xff] }
 0x2a8   :  { %3125 = vmatmul.mubr.f32.vlgmr.msra.gmra.mrb[0].mxu1 %v1408_v61  ;;  %v1704_v40 = vmul.f32 %v1686_v2, %v1668_v62  ;;  %v3658_v25 = vpack.c.bf16 %v1305_v13, %v1304_v57  ;;  %v3661_v15 = vpack.c.bf16 %v1307_v54, %v1306_v47  ;;  %v3664_v26 = vpack.c.bf16 %v1309_v52, %v1308_v36  ;;  %v1321_v34 = vld [vmem:[#allocation13 + $0x178] sm:$0xff]  ;;  %v1326_v62 = vld [vmem:[#allocation13 + $0x1a0] sm:$0xff]  ;;  %v1327_v2 = vld [vmem:[#allocation13 + $0x1a8] sm:$0xff] }
 0x2a9   :  { %3638 = vmatpush3.bf16.msra.mxu1 %v3637_v32  ;;  %3159 = vmatprep.mubr.msk.f32.mxu1 %vm4056_vm0, %v4057_v1  ;;  %v4781_v23 = vadd.f32 %v1744_v38, %v1736_v42  ;;  %v3667_v39 = vpack.c.bf16 %v1311_v37, %v1310_v31  ;;  %v3670_v30 = vpack.c.bf16 %v1313_v46, %v1312_v43  ;;  %v1319_v32 = vld [vmem:[#allocation13 + $0x168] sm:$0xff]  ;;  %v1325_v16 = vld [vmem:[#allocation13 + $0x198] sm:$0xff]  ;;  %v1334_v4 = vld [vmem:[#allocation13 + $0x1e0] sm:$0xff] }
 0x2aa   :  { %3639 = vmatprep.subr.bf16.mxu1 %v4055_v0  ;;  %v1713_v60 = vadd.f32 %v1704_v40, %v1695_v29  ;;  %v3676_v50 = vpack.c.bf16 %v1317_v28, %v1316_v44  ;;  %v3679_v55 = vpack.c.bf16 %v1319_v32, %v1318_v63  ;;  %v1320_v29 = vld [vmem:[#allocation13 + $0x170] sm:$0xff]  ;;  %v3685_v61 = vpack.c.bf16 %v1323_v58, %v1322_v49  ;;  %v1329_v40 = vld [vmem:[#allocation13 + $0x1b8] sm:$0xff]  ;;  %v1331_v41 = vld [vmem:[#allocation13 + $0x1c8] sm:$0xff] }
 0x2ab   :  { %v3682_v45 = vpack.c.bf16 %v1321_v34, %v1320_v29  ;;  %v3688_v38 = vpack.c.bf16 %v1325_v16, %v1324_v12  ;;  %v1335_v7 = vld [vmem:[#allocation13 + $0x1e8] sm:$0xff]  ;;  %v1336_v8 = vld [vmem:[#allocation13 + $0x1f0] sm:$0xff]  ;;  %v1337_v53 = vld [vmem:[#allocation13 + $0x1f8] sm:$0xff] }
 0x2ac   :  { %v1745_v24 = vmul.f32 %v1729_v3, %v1713_v60  ;;  %v1332_v3 = vld [vmem:[#allocation13 + $0x1d0] sm:$0xff]  ;;  %v1338_v59 = vld [vmem:[#allocation13 + $0x200] sm:$0xff]  ;;  %v1339_v11 = vld [vmem:[#allocation13 + $0x208] sm:$0xff] }
 0x2ad   :  { %3641 = vmatpush3.bf16.msra.mxu1 %v3640_v20  ;;  %v1328_v20 = vld [vmem:[#allocation13 + $0x1b0] sm:$0xff]  ;;  %v1341_v14 = vld [vmem:[#allocation13 + $0x218] sm:$0xff]  ;;  %v1342_v57 = vld [vmem:[#allocation13 + $0x220] sm:$0xff] }
 0x2ae   :  { %3642 = vmatprep.subr.bf16.mxu1 %v4055_v0  ;;  %v4785_v56 = vadd.f32 %v1745_v24, %v1737_v21  ;;  %v3691_v21 = vpack.c.bf16 %v1327_v2, %v1326_v62  ;;  %v3694_v51 = vpack.c.bf16 %v1329_v40, %v1328_v20  ;;  %v1340_v18 = vld [vmem:[#allocation13 + $0x210] sm:$0xff]  ;;  %v1343_v13 = vld [vmem:[#allocation13 + $0x228] sm:$0xff]  ;;  %v1345_v54 = vld [vmem:[#allocation13 + $0x238] sm:$0xff] }
 0x2af   :  { %v1344_v47 = vld [vmem:[#allocation13 + $0x230] sm:$0xff]  ;;  %v1347_v36 = vld [vmem:[#allocation13 + $0x248] sm:$0xff]  ;;  %v1349_v31 = vld [vmem:[#allocation13 + $0x258] sm:$0xff] }
 0x2b0   :  { %v1351_v43 = vld [vmem:[#allocation13 + $0x268] sm:$0xff]  ;;  %v1357_v63 = vld [vmem:[#allocation13 + $0x298] sm:$0xff]  ;;  %v1364_v16 = vld [vmem:[#allocation13 + $0x2d0] sm:$0xff] }
 0x2b1   :  { %3644 = vmatpush3.bf16.msra.mxu1 %v3643_v19  ;;  %v1333_v19 = vld [vmem:[#allocation13 + $0x1d8] sm:$0xff]  ;;  %v1355_v44 = vld [vmem:[#allocation13 + $0x288] sm:$0xff]  ;;  %v1366_v2 = vld [vmem:[#allocation13 + $0x2e0] sm:$0xff] }
 0x2b2   :  { %3645 = vmatprep.subr.bf16.mxu1 %v4055_v0  ;;  %v3700_v24 = vpack.c.bf16 %v1333_v19, %v1332_v3  ;;  %v1359_v29 = vld [vmem:[#allocation13 + $0x2a8] sm:$0xff]  ;;  %v1361_v49 = vld [vmem:[#allocation13 + $0x2b8] sm:$0xff]  ;;  %v1368_v40 = vld [vmem:[#allocation13 + $0x2f0] sm:$0xff] }
 0x2b3   :  { %v1372_v19 = vld [vmem:[#allocation13 + $0x310] sm:$0xff] }
 0x2b5   :  { %3647 = vmatpush3.bf16.msra.mxu1 %v3646_v6  ;;  %v3703_v6 = vpack.c.bf16 %v1335_v7, %v1334_v4  ;;  %v1374_v7 = vld [vmem:[#allocation13 + $0x320] sm:$0xff] }
 0x2b6   :  { %3648 = vmatprep.subr.bf16.mxu1 %v4055_v0 }
 0x2b9   :  { %3650 = vmatpush3.bf16.msra.mxu1 %v3649_v22  ;;  %v3706_v22 = vpack.c.bf16 %v1337_v53, %v1336_v8  ;;  %v1376_v53 = vld [vmem:[#allocation13 + $0x330] sm:$0xff] }
 0x2ba   :  { %3651 = vmatprep.subr.bf16.mxu1 %v4055_v0 }
 0x2bd   :  { %3653 = vmatpush3.bf16.msra.mxu1 %v3652_v5  ;;  %v3709_v5 = vpack.c.bf16 %v1339_v11, %v1338_v59  ;;  %v1379_v11 = vld [vmem:[#allocation13 + $0x348] sm:$0xff] }
 0x2be   :  { %3654 = vmatprep.subr.bf16.mxu1 %v4055_v0 }
 0x2c1   :  { %3656 = vmatpush3.bf16.msra.mxu1 %v3655_v17  ;;  %v3712_v17 = vpack.c.bf16 %v1341_v14, %v1340_v18  ;;  %v1380_v18 = vld [vmem:[#allocation13 + $0x350] sm:$0xff]  ;;  %v1381_v14 = vld [vmem:[#allocation13 + $0x358] sm:$0xff] }
 0x2c2   :  { %3657 = vmatprep.subr.bf16.mxu1 %v4055_v0 }
 0x2c5   :  { %3659 = vmatpush3.bf16.msra.mxu1 %v3658_v25  ;;  %v3715_v25 = vpack.c.bf16 %v1343_v13, %v1342_v57  ;;  %v1382_v57 = vld [vmem:[#allocation13 + $0x360] sm:$0xff]  ;;  %v1383_v13 = vld [vmem:[#allocation13 + $0x368] sm:$0xff] }
 0x2c6   :  { %3660 = vmatprep.subr.bf16.mxu1 %v4055_v0 }
 0x2c8   :  { %3160 = vmatmul.mubr.f32.vlgmr.msra.gmra.mrb[0].mxu1 %v4706_v10  ;;  %v1314_v10 = vld [vmem:[#allocation13 + $0x140] sm:$0xff] }
 0x2c9   :  { %3662 = vmatpush3.bf16.msra.mxu1 %v3661_v15  ;;  %3194 = vmatprep.mubr.msk.f32.mxu1 %vm4056_vm0, %v4057_v1  ;;  %v3673_v42 = vpack.c.bf16 %v1315_v9, %v1314_v10  ;;  %v3718_v15 = vpack.c.bf16 %v1345_v54, %v1344_v47  ;;  %v1353_v10 = vld [vmem:[#allocation13 + $0x278] sm:$0xff]  ;;  %v1384_v47 = vld [vmem:[#allocation13 + $0x370] sm:$0xff] }
 0x2ca   :  { %3663 = vmatprep.subr.bf16.mxu1 %v4055_v0  ;;  %v1385_v54 = vld [vmem:[#allocation13 + $0x378] sm:$0xff] }
 0x2cd   :  { %3665 = vmatpush3.bf16.msra.mxu1 %v3664_v26  ;;  %v1348_v26 = vld [vmem:[#allocation13 + $0x250] sm:$0xff] }
 0x2ce   :  { %3666 = vmatprep.subr.bf16.mxu1 %v4055_v0  ;;  %v3724_v37 = vpack.c.bf16 %v1349_v31, %v1348_v26  ;;  %v1388_v26 = vld [vmem:[#allocation13 + $0x390] sm:$0xff]  ;;  %v1389_v31 = vld [vmem:[#allocation13 + $0x398] sm:$0xff] }
 0x2d1   :  { %3668 = vmatpush3.bf16.msra.mxu1 %v3667_v39  ;;  %v1350_v39 = vld [vmem:[#allocation13 + $0x260] sm:$0xff] }
 0x2d2   :  { %3669 = vmatprep.subr.bf16.mxu1 %v4055_v0  ;;  %v3727_v46 = vpack.c.bf16 %v1351_v43, %v1350_v39  ;;  %v1390_v39 = vld [vmem:[#allocation13 + $0x3a0] sm:$0xff]  ;;  %v1391_v43 = vld [vmem:[#allocation13 + $0x3a8] sm:$0xff] }
 0x2d5   :  { %3671 = vmatpush3.bf16.msra.mxu1 %v3670_v30  ;;  %v1352_v30 = vld [vmem:[#allocation13 + $0x270] sm:$0xff] }
 0x2d6   :  { %3672 = vmatprep.subr.bf16.mxu1 %v4055_v0  ;;  %v3730_v9 = vpack.c.bf16 %v1353_v10, %v1352_v30  ;;  %v1392_v30 = vld [vmem:[#allocation13 + $0x3b0] sm:$0xff]  ;;  %v1393_v10 = vld [vmem:[#allocation13 + $0x3b8] sm:$0xff] }
 0x2d9   :  { %3674 = vmatpush3.bf16.msra.mxu1 %v3673_v42  ;;  %v1354_v42 = vld [vmem:[#allocation13 + $0x280] sm:$0xff] }
 0x2da   :  { %3675 = vmatprep.subr.bf16.mxu1 %v4055_v0  ;;  %v3733_v28 = vpack.c.bf16 %v1355_v44, %v1354_v42  ;;  %v1395_v42 = vld [vmem:[#allocation13 + $0x3c8] sm:$0xff] }
 0x2dd   :  { %3677 = vmatpush3.bf16.msra.mxu1 %v3676_v50  ;;  %v1356_v50 = vld [vmem:[#allocation13 + $0x290] sm:$0xff] }
 0x2de   :  { %3678 = vmatprep.subr.bf16.mxu1 %v4055_v0  ;;  %v3736_v32 = vpack.c.bf16 %v1357_v63, %v1356_v50  ;;  %v1398_v63 = vld [vmem:[#allocation13 + $0x3e0] sm:$0xff] }
 0x2e1   :  { %3680 = vmatpush3.bf16.msra.mxu1 %v3679_v55  ;;  %v1358_v55 = vld [vmem:[#allocation13 + $0x2a0] sm:$0xff] }
 0x2e2   :  { %3681 = vmatprep.subr.bf16.mxu1 %v4055_v0  ;;  %v3739_v34 = vpack.c.bf16 %v1359_v29, %v1358_v55  ;;  %v1400_v29 = vld [vmem:[#allocation13 + $0x3f0] sm:$0xff] }
 0x2e5   :  { %3683 = vmatpush3.bf16.msra.mxu1 %v3682_v45  ;;  %v1360_v45 = vld [vmem:[#allocation13 + $0x2b0] sm:$0xff] }
 0x2e6   :  { %3684 = vmatprep.subr.bf16.mxu1 %v4055_v0  ;;  %v3742_v58 = vpack.c.bf16 %v1361_v49, %v1360_v45 }
 0x2e8   :  { %3195 = vmatmul.mubr.f32.vlgmr.msra.gmra.mrb[0].mxu1 %v4725_v35  ;;  %v1330_v35 = vld [vmem:[#allocation13 + $0x1c0] sm:$0xff] }
 0x2e9   :  { %3686 = vmatpush3.bf16.msra.mxu1 %v3685_v61  ;;  %3229 = vmatprep.mubr.msk.f32.mxu1 %vm4056_vm0, %v4057_v1  ;;  %v3697_v60 = vpack.c.bf16 %v1331_v41, %v1330_v35  ;;  %v1363_v61 = vld [vmem:[#allocation13 + $0x2c8] sm:$0xff]  ;;  %v1370_v41 = vld [vmem:[#allocation13 + $0x300] sm:$0xff] }
 0x2ea   :  { %3687 = vmatprep.subr.bf16.mxu1 %v4055_v0 }
 0x2ed   :  { %3689 = vmatpush3.bf16.msra.mxu1 %v3688_v38  ;;  %v1365_v38 = vld [vmem:[#allocation13 + $0x2d8] sm:$0xff] }
 0x2ee   :  { %3690 = vmatprep.subr.bf16.mxu1 %v4055_v0  ;;  %v3748_v62 = vpack.c.bf16 %v1365_v38, %v1364_v16 }
 0x2f1   :  { %3692 = vmatpush3.bf16.msra.mxu1 %v3691_v21  ;;  %v1367_v21 = vld [vmem:[#allocation13 + $0x2e8] sm:$0xff] }
 0x2f2   :  { %3693 = vmatprep.subr.bf16.mxu1 %v4055_v0  ;;  %v3751_v20 = vpack.c.bf16 %v1367_v21, %v1366_v2 }
 0x2f5   :  { %3695 = vmatpush3.bf16.msra.mxu1 %v3694_v51  ;;  %v1369_v51 = vld [vmem:[#allocation13 + $0x2f8] sm:$0xff] }
 0x2f6   :  { %3696 = vmatprep.subr.bf16.mxu1 %v4055_v0  ;;  %v3754_v35 = vpack.c.bf16 %v1369_v51, %v1368_v40 }
 0x2f9   :  { %3698 = vmatpush3.bf16.msra.mxu1 %v3697_v60  ;;  %v1371_v60 = vld [vmem:[#allocation13 + $0x308] sm:$0xff] }
 0x2fa   :  { %3699 = vmatprep.subr.bf16.mxu1 %v4055_v0  ;;  %v3757_v3 = vpack.c.bf16 %v1371_v60, %v1370_v41 }
 0x2fd   :  { %3701 = vmatpush3.bf16.msra.mxu1 %v3700_v24  ;;  %v1373_v24 = vld [vmem:[#allocation13 + $0x318] sm:$0xff] }
 0x2fe   :  { %3702 = vmatprep.subr.bf16.mxu1 %v4055_v0  ;;  %v3760_v4 = vpack.c.bf16 %v1373_v24, %v1372_v19 }
 0x301   :  { %3704 = vmatpush3.bf16.msra.mxu1 %v3703_v6  ;;  %v1375_v6 = vld [vmem:[#allocation13 + $0x328] sm:$0xff] }
 0x302   :  { %3705 = vmatprep.subr.bf16.mxu1 %v4055_v0  ;;  %v3763_v8 = vpack.c.bf16 %v1375_v6, %v1374_v7 }
 0x305   :  { %3707 = vmatpush3.bf16.msra.mxu1 %v3706_v22  ;;  %v1377_v22 = vld [vmem:[#allocation13 + $0x338] sm:$0xff] }
 0x306   :  { %3708 = vmatprep.subr.bf16.mxu1 %v4055_v0  ;;  %v3766_v59 = vpack.c.bf16 %v1377_v22, %v1376_v53 }
 0x308   :  { %3230 = vmatmul.mubr.f32.vlgmr.msra.gmra.mrb[0].mxu1 %v4747_v27  ;;  %v1346_v27 = vld [vmem:[#allocation13 + $0x240] sm:$0xff] }
 0x309   :  { %3710 = vmatpush3.bf16.msra.mxu1 %v3709_v5  ;;  %3264 = vmatprep.mubr.msk.f32.mxu1 %vm4056_vm0, %v4057_v1  ;;  %v3721_v52 = vpack.c.bf16 %v1347_v36, %v1346_v27  ;;  %v1386_v27 = vld [vmem:[#allocation13 + $0x380] sm:$0xff]  ;;  %v1387_v36 = vld [vmem:[#allocation13 + $0x388] sm:$0xff] }
 0x30a   :  { %3711 = vmatprep.subr.bf16.mxu1 %v4055_v0 }
 0x30d   :  { %3713 = vmatpush3.bf16.msra.mxu1 %v3712_v17  ;;  %v3772_v17 = vpack.c.bf16 %v1381_v14, %v1380_v18 }
 0x30e   :  { %3714 = vmatprep.subr.bf16.mxu1 %v4055_v0 }
 0x311   :  { %3716 = vmatpush3.bf16.msra.mxu1 %v3715_v25  ;;  %v3775_v25 = vpack.c.bf16 %v1383_v13, %v1382_v57 }
 0x312   :  { %3717 = vmatprep.subr.bf16.mxu1 %v4055_v0 }
 0x315   :  { %3719 = vmatpush3.bf16.msra.mxu1 %v3718_v15  ;;  %v3778_v15 = vpack.c.bf16 %v1385_v54, %v1384_v47 }
 0x316   :  { %3720 = vmatprep.subr.bf16.mxu1 %v4055_v0 }
 0x319   :  { %3722 = vmatpush3.bf16.msra.mxu1 %v3721_v52  ;;  %v3781_v52 = vpack.c.bf16 %v1387_v36, %v1386_v27 }
 0x31a   :  { %3723 = vmatprep.subr.bf16.mxu1 %v4055_v0 }
 0x31d   :  { %3725 = vmatpush3.bf16.msra.mxu1 %v3724_v37  ;;  %v3784_v37 = vpack.c.bf16 %v1389_v31, %v1388_v26 }
 0x31e   :  { %3726 = vmatprep.subr.bf16.mxu1 %v4055_v0 }
 0x321   :  { %3728 = vmatpush3.bf16.msra.mxu1 %v3727_v46  ;;  %v3787_v46 = vpack.c.bf16 %v1391_v43, %v1390_v39 }
 0x322   :  { %3729 = vmatprep.subr.bf16.mxu1 %v4055_v0 }
 0x325   :  { %3731 = vmatpush3.bf16.msra.mxu1 %v3730_v9  ;;  %v3790_v9 = vpack.c.bf16 %v1393_v10, %v1392_v30 }
 0x326   :  { %3732 = vmatprep.subr.bf16.mxu1 %v4055_v0 }
 0x328   :  { %3265 = vmatmul.mubr.f32.vlgmr.msra.gmra.mrb[0].mxu1 %v4763_v33  ;;  %v1362_v33 = vld [vmem:[#allocation13 + $0x2c0] sm:$0xff] }
 0x329   :  { %3734 = vmatpush3.bf16.msra.mxu1 %v3733_v28  ;;  %3299 = vmatprep.mubr.msk.f32.mxu1 %vm4056_vm0, %v4057_v1  ;;  %v3745_v12 = vpack.c.bf16 %v1363_v61, %v1362_v33  ;;  %v1397_v28 = vld [vmem:[#allocation13 + $0x3d8] sm:$0xff] }
 0x32a   :  { %3735 = vmatprep.subr.bf16.mxu1 %v4055_v0 }
 0x32d   :  { %3737 = vmatpush3.bf16.msra.mxu1 %v3736_v32  ;;  %v1399_v32 = vld [vmem:[#allocation13 + $0x3e8] sm:$0xff] }
 0x32e   :  { %3738 = vmatprep.subr.bf16.mxu1 %v4055_v0  ;;  %v3799_v55 = vpack.c.bf16 %v1399_v32, %v1398_v63 }
 0x331   :  { %3740 = vmatpush3.bf16.msra.mxu1 %v3739_v34  ;;  %v1401_v34 = vld [vmem:[#allocation13 + $0x3f8] sm:$0xff] }
 0x332   :  { %3741 = vmatprep.subr.bf16.mxu1 %v4055_v0  ;;  %v3802_v45 = vpack.c.bf16 %v1401_v34, %v1400_v29 }
 0x335   :  { %3743 = vmatpush3.bf16.msra.mxu1 %v3742_v58 }
 0x336   :  { %3744 = vmatprep.subr.bf16.mxu1 %v4055_v0 }
 0x339   :  { %3746 = vmatpush3.bf16.msra.mxu1 %v3745_v12 }
 0x33a   :  { %3747 = vmatprep.subr.bf16.mxu1 %v4055_v0 }
 0x33d   :  { %3749 = vmatpush3.bf16.msra.mxu1 %v3748_v62 }
 0x33e   :  { %3750 = vmatprep.subr.bf16.mxu1 %v4055_v0 }
 0x341   :  { %3752 = vmatpush3.bf16.msra.mxu1 %v3751_v20 }
 0x342   :  { %3753 = vmatprep.subr.bf16.mxu1 %v4055_v0 }
 0x345   :  { %3755 = vmatpush3.bf16.msra.mxu1 %v3754_v35 }
 0x346   :  { %3756 = vmatprep.subr.bf16.mxu1 %v4055_v0 }
 0x348   :  { %3300 = vmatmul.mubr.f32.vlgmr.msra.gmra.mrb[0].mxu1 %v4774_v48  ;;  %v1378_v48 = vld [vmem:[#allocation13 + $0x340] sm:$0xff] }
 0x349   :  { %3758 = vmatpush3.bf16.msra.mxu1 %v3757_v3  ;;  %3334 = vmatprep.mubr.msk.f32.mxu1 %vm4056_vm0, %v4057_v1  ;;  %v3769_v5 = vpack.c.bf16 %v1379_v11, %v1378_v48 }
 0x34a   :  { %3759 = vmatprep.subr.bf16.mxu1 %v4055_v0 }
 0x34d   :  { %3761 = vmatpush3.bf16.msra.mxu1 %v3760_v4 }
 0x34e   :  { %3762 = vmatprep.subr.bf16.mxu1 %v4055_v0 }
 0x351   :  { %3764 = vmatpush3.bf16.msra.mxu1 %v3763_v8 }
 0x352   :  { %3765 = vmatprep.subr.bf16.mxu1 %v4055_v0 }
 0x355   :  { %3767 = vmatpush3.bf16.msra.mxu1 %v3766_v59 }
 0x356   :  { %3768 = vmatprep.subr.bf16.mxu1 %v4055_v0 }
 0x359   :  { %3770 = vmatpush3.bf16.msra.mxu1 %v3769_v5 }
 0x35a   :  { %3771 = vmatprep.subr.bf16.mxu1 %v4055_v0 }
 0x35d   :  { %3773 = vmatpush3.bf16.msra.mxu1 %v3772_v17 }
 0x35e   :  { %3774 = vmatprep.subr.bf16.mxu1 %v4055_v0 }
 0x361   :  { %3776 = vmatpush3.bf16.msra.mxu1 %v3775_v25 }
 0x362   :  { %3777 = vmatprep.subr.bf16.mxu1 %v4055_v0 }
 0x365   :  { %3779 = vmatpush3.bf16.msra.mxu1 %v3778_v15 }
 0x366   :  { %3780 = vmatprep.subr.bf16.mxu1 %v4055_v0 }
 0x368   :  { %3335 = vmatmul.mubr.f32.vlgmr.msra.gmra.mrb[0].mxu1 %v4781_v23  ;;  %v1394_v23 = vld [vmem:[#allocation13 + $0x3c0] sm:$0xff] }
 0x369   :  { %3782 = vmatpush3.bf16.msra.mxu1 %v3781_v52  ;;  %3369 = vmatprep.mubr.msk.f32.mxu1 %vm4056_vm0, %v4057_v1  ;;  %v3793_v44 = vpack.c.bf16 %v1395_v42, %v1394_v23  ;;  %v1396_v1 = vld [vmem:[#allocation13 + $0x3d0] sm:$0xff] }
 0x36a   :  { %3783 = vmatprep.subr.bf16.mxu1 %v4055_v0  ;;  %v3796_v50 = vpack.c.bf16 %v1397_v28, %v1396_v1 }
 0x36d   :  { %3785 = vmatpush3.bf16.msra.mxu1 %v3784_v37 }
 0x36e   :  { %3786 = vmatprep.subr.bf16.mxu1 %v4055_v0 }
 0x371   :  { %3788 = vmatpush3.bf16.msra.mxu1 %v3787_v46 }
 0x372   :  { %3789 = vmatprep.subr.bf16.mxu1 %v4055_v0 }
 0x375   :  { %3791 = vmatpush3.bf16.msra.mxu1 %v3790_v9 }
 0x376   :  { %3792 = vmatprep.subr.bf16.mxu1 %v4055_v0 }
 0x379   :  { %3794 = vmatpush3.bf16.msra.mxu1 %v3793_v44 }
 0x37a   :  { %3795 = vmatprep.subr.bf16.mxu1 %v4055_v0 }
 0x37d   :  { %3797 = vmatpush3.bf16.msra.mxu1 %v3796_v50 }
 0x37e   :  { %3798 = vmatprep.subr.bf16.mxu1 %v4055_v0 }
 0x381   :  { %3800 = vmatpush3.bf16.msra.mxu1 %v3799_v55 }
 0x382   :  { %3801 = vmatprep.subr.bf16.mxu1 %v4055_v0 }
 0x385   :  { %3803 = vmatpush3.bf16.msra.mxu1 %v3802_v45 }
 0x388   :  { %3370 = vmatmul.mubr.f32.vlgmr.msra.gmra.mrb[0].mxu1 %v4785_v56 }
 0x45b   :  { %v2386_v49 = vpop.f32.mrb[0].mxu1 }
 0x45c   :  { %2391 = vst [vmem:[#allocation14] sm:$0xff] %v2386_v49  ;;  %v3371_v58 = vpop.f32.mrb[1].mxu1 }
 0x45d   :  { %4025 = shalt.err (!%p4022_p4)
}
 0x45e   :  { %s4026_s3 = scalar_lea.hbm %s4878_s7, 128 }
 0x45f   :  { %p4027_p5 = scmp.ne.s32.totalorder %s4878_s7, %s4026_s3  ;;  %p4030_p6 = scmp.lt.u32.totalorder %s4026_s3, %s4878_s7 }
 0x461   :  { %p4032_p7 = pnand %p4030_p6, %p4027_p5 }
 0x463   :  { %4035 = shalt.err (!%p4032_p7)
}
 0x464   :  { %2401 = dma.vmem_to_hbm [thread:$0]  %s2399_s11, 128, %s4878_s7, [#allocation4]  }
 0x465   :  { %4044 = dma.done.wait [#allocation4], 128  }
 0x466   :  { %4045 = vsyncadd [#allocation4], 4294967168 }
 0x467   :  { %2405 = vsyncpa [#allocation3], 1 }
 0x468   :  { %2406 = vsyncpa [#allocation6], 1 }
 0x469   :  { %2407 = vsyncpa [#allocation9], 1 }
 0x46a   :  { %2408 = vsyncpa [#allocation12], 1 }
 0x46b   :  { %2409 = vsyncpa [#allocation4], 1 }

// kernel: tpu_custom_call.1
= control target key start
LH: loop header
LB: loop body
LE: loop exit
PB: predicated region body
PF: predicated region fallthrough
CT: control target
= control target key end

     0   :  { %12 = vsyncpa [#allocation3], 0  ;;  %s4871_s0 = inlined_call_operand.hbm [shape: f32[8,128], index: 0, kind: input, shape index: {}]   ;;  %s4872_s1 = inlined_call_operand.hbm [shape: f32[12,128], index: 1, kind: input, shape index: {}]   ;;  %s4873_s2 = inlined_call_operand.hbm [shape: f32[128,128], index: 2, kind: input, shape index: {}]   ;;  %s4874_s3 = inlined_call_operand.hbm [shape: f32[8,128,128], index: 3, kind: input, shape index: {}]   ;;  %s4875_s4 = inlined_call_operand.hbm [shape: f32[12,128], index: 4, kind: input, shape index: {}]   ;;  %s4876_s5 = inlined_call_operand.hbm [shape: f32[128,128], index: 5, kind: input, shape index: {}]   ;;  %s4877_s6 = inlined_call_operand.hbm [shape: f32[8,128,128], index: 6, kind: input, shape index: {}]   ;;  %s4878_s7 = inlined_call_operand.hbm [shape: f32[8,128], index: 7, kind: output, shape index: {}]  }
   0x1   :  { %13 = vsyncpa [#allocation6], 0 }
   0x2   :  { %14 = vsyncpa [#allocation9], 0 }
   0x3   :  { %15 = vsyncpa [#allocation12], 0 }
   0x4   :  { %16 = vsyncpa [#allocation4], 0  ;;  %s4046_s24 = smov [#allocation5]   ;;  %s3860_s28 = scalar_lea.hbm %s4872_s1, 256 }
   0x5   :  { %s32_s25 = sshll.u32 %s4046_s24, 4  ;;  %p3861_p0 = scmp.ne.s32.totalorder %s4872_s1, %s3860_s28  ;;  %s33_s25 = int_to_ptr.vmem [resolvable:$true] %s32_s25 }
   0x6   :  { %p3864_p1 = scmp.lt.u32.totalorder %s3860_s28, %s4872_s1 }
   0x8   :  { %p3866_p2 = pnand %p3864_p1, %p3861_p0 }
   0xa   :  { %3869 = shalt.err (!%p3866_p2)
}
   0xb   :  { %s3870_s10 = scalar_lea.vmem %s33_s25, 256  ;;  %p3875_p4 = scmp.lt.s32.totalorder %s33_s25, %s33_s25 }
   0xc   :  { %p3871_p3 = scmp.ne.s32.totalorder %s33_s25, %s3870_s10  ;;  %p3876_p5 = scmp.lt.s32.totalorder %s3870_s10, %s3870_s10 }
   0xe   :  { %p3877_p6 = por %p3876_p5, %p3875_p4 }
  0x10   :  { %p3878_p7 = pnand %p3877_p6, %p3871_p3 }
  0x12   :  { %3881 = shalt.err (!%p3878_p7)
}
  0x13   :  { %s4047_s11 = smov 128   ;;  %s4048_s12 = smov 8  }
  0x14   :  { %38 = dma.hbm_to_vmem [thread:$0]  %s4872_s1, 256, %s33_s25, [#allocation6], %s4047_s11, %s4047_s11, %s4048_s12  }
  0x15   :  { %s4049_s15 = smov [#allocation8]   ;;  %s4050_s17 = smov [#allocation11]  }
  0x16   :  { %s56_s16 = sshll.u32 %s4049_s15, 4  ;;  %s80_s18 = sshll.u32 %s4050_s17, 4  ;;  %s57_s16 = int_to_ptr.vmem [resolvable:$true] %s56_s16  ;;  %s81_s18 = int_to_ptr.vmem [resolvable:$true] %s80_s18 }
  0x17   :  { %s3882_s21 = scalar_lea.hbm %s4874_s3, 16384 }
  0x18   :  { %p3883_p8 = scmp.ne.s32.totalorder %s4874_s3, %s3882_s21  ;;  %p3886_p9 = scmp.lt.u32.totalorder %s3882_s21, %s4874_s3 }
  0x1a   :  { %p3888_p10 = pnand %p3886_p9, %p3883_p8 }
  0x1c   :  { %3891 = shalt.err (!%p3888_p10)
}
  0x1d   :  { %s3892_s1 = scalar_lea.vmem %s57_s16, 16384  ;;  %p3897_p12 = scmp.lt.s32.totalorder %s57_s16, %s57_s16 }
  0x1e   :  { %p3893_p11 = scmp.ne.s32.totalorder %s57_s16, %s3892_s1  ;;  %p3898_p13 = scmp.lt.s32.totalorder %s3892_s1, %s3892_s1 }
  0x20   :  { %p3899_p0 = por %p3898_p13, %p3897_p12 }
  0x22   :  { %p3900_p1 = pnand %p3899_p0, %p3893_p11 }
  0x24   :  { %3903 = shalt.err (!%p3900_p1)
}
  0x25   :  { %62 = dma.hbm_to_vmem [thread:$0]  %s4874_s3, 16384, %s57_s16, [#allocation9], %s4047_s11, %s4047_s11, %s4048_s12  }
  0x26   :  { %s3904_s30 = scalar_lea.hbm %s4876_s5, 2048 }
  0x27   :  { %p3905_p2 = scmp.ne.s32.totalorder %s4876_s5, %s3904_s30  ;;  %p3908_p3 = scmp.lt.u32.totalorder %s3904_s30, %s4876_s5 }
  0x29   :  { %p3910_p4 = pnand %p3908_p3, %p3905_p2 }
  0x2b   :  { %3913 = shalt.err (!%p3910_p4)
}
  0x2c   :  { %s3914_s14 = scalar_lea.vmem %s81_s18, 2048  ;;  %p3919_p6 = scmp.lt.s32.totalorder %s81_s18, %s81_s18 }
  0x2d   :  { %p3915_p5 = scmp.ne.s32.totalorder %s81_s18, %s3914_s14  ;;  %p3920_p7 = scmp.lt.s32.totalorder %s3914_s14, %s3914_s14 }
  0x2f   :  { %p3921_p8 = por %p3920_p7, %p3919_p6 }
  0x31   :  { %p3922_p9 = pnand %p3921_p8, %p3915_p5 }
  0x33   :  { %3925 = shalt.err (!%p3922_p9)
}
  0x34   :  { %86 = dma.hbm_to_vmem [thread:$0]  %s4876_s5, 2048, %s81_s18, [#allocation12], %s4047_s11, %s4047_s11, %s4048_s12  }
  0x35   :  { %s4051_s16 = smov [#allocation2]   ;;  %s4052_s19 = smov [#allocation7]  }
  0x36   :  { %s23_s17 = sshll.u32 %s4051_s16, 4  ;;  %s44_s20 = sshll.u32 %s4052_s19, 4  ;;  %s24_s17 = int_to_ptr.vmem [resolvable:$true] %s23_s17  ;;  %s45_s20 = int_to_ptr.vmem [resolvable:$true] %s44_s20 }
  0x37   :  { %s3926_s23 = scalar_lea.hbm %s4871_s0, 128 }
  0x38   :  { %p3927_p10 = scmp.ne.s32.totalorder %s4871_s0, %s3926_s23  ;;  %p3930_p11 = scmp.lt.u32.totalorder %s3926_s23, %s4871_s0 }
  0x3a   :  { %p3932_p12 = pnand %p3930_p11, %p3927_p10 }
  0x3c   :  { %3935 = shalt.err (!%p3932_p12)
}
  0x3d   :  { %s3936_s5 = scalar_lea.vmem %s24_s17, 128  ;;  %p3941_p0 = scmp.lt.s32.totalorder %s24_s17, %s24_s17 }
  0x3e   :  { %p3937_p13 = scmp.ne.s32.totalorder %s24_s17, %s3936_s5  ;;  %p3942_p1 = scmp.lt.s32.totalorder %s3936_s5, %s3936_s5 }
  0x40   :  { %p3943_p2 = por %p3942_p1, %p3941_p0 }
  0x42   :  { %p3944_p3 = pnand %p3943_p2, %p3937_p13 }
  0x44   :  { %3947 = shalt.err (!%p3944_p3)
}
  0x45   :  { %26 = dma.hbm_to_vmem [thread:$0]  %s4871_s0, 128, %s24_s17, [#allocation3]  }
  0x46   :  { %s3948_s30 = scalar_lea.hbm %s4873_s2, 2048 }
  0x47   :  { %p3949_p4 = scmp.ne.s32.totalorder %s4873_s2, %s3948_s30  ;;  %p3952_p5 = scmp.lt.u32.totalorder %s3948_s30, %s4873_s2 }
  0x49   :  { %p3954_p6 = pnand %p3952_p5, %p3949_p4 }
  0x4b   :  { %3957 = shalt.err (!%p3954_p6)
}
  0x4c   :  { %s3958_s14 = scalar_lea.vmem %s45_s20, 2048  ;;  %p3963_p8 = scmp.lt.s32.totalorder %s45_s20, %s45_s20 }
  0x4d   :  { %p3959_p7 = scmp.ne.s32.totalorder %s45_s20, %s3958_s14  ;;  %p3964_p9 = scmp.lt.s32.totalorder %s3958_s14, %s3958_s14 }
  0x4f   :  { %p3965_p10 = por %p3964_p9, %p3963_p8 }
  0x51   :  { %p3966_p11 = pnand %p3965_p10, %p3959_p7 }
  0x53   :  { %3969 = shalt.err (!%p3966_p11)
}
  0x54   :  { %50 = dma.hbm_to_vmem [thread:$0]  %s4873_s2, 2048, %s45_s20, [#allocation6], %s4047_s11, %s4047_s11, %s4048_s12  }
  0x55   :  { %s4053_s15 = smov [#allocation10]   ;;  %s4054_s17 = smov [#allocation13]  }
  0x56   :  { %s68_s16 = sshll.u32 %s4053_s15, 4  ;;  %s92_s19 = sshll.u32 %s4054_s17, 4  ;;  %s69_s16 = int_to_ptr.vmem [resolvable:$true] %s68_s16  ;;  %s93_s19 = int_to_ptr.vmem [resolvable:$true] %s92_s19 }
  0x57   :  { %s3970_s23 = scalar_lea.hbm %s4875_s4, 256 }
  0x58   :  { %p3971_p12 = scmp.ne.s32.totalorder %s4875_s4, %s3970_s23  ;;  %p3974_p13 = scmp.lt.u32.totalorder %s3970_s23, %s4875_s4 }
  0x5a   :  { %p3976_p0 = pnand %p3974_p13, %p3971_p12 }
  0x5c   :  { %3979 = shalt.err (!%p3976_p0)
}
  0x5d   :  { %s3980_s2 = scalar_lea.vmem %s69_s16, 256  ;;  %p3985_p2 = scmp.lt.s32.totalorder %s69_s16, %s69_s16 }
  0x5e   :  { %p3981_p1 = scmp.ne.s32.totalorder %s69_s16, %s3980_s2  ;;  %p3986_p3 = scmp.lt.s32.totalorder %s3980_s2, %s3980_s2 }
  0x60   :  { %p3987_p4 = por %p3986_p3, %p3985_p2 }
  0x62   :  { %p3988_p5 = pnand %p3987_p4, %p3981_p1 }
  0x64   :  { %3991 = shalt.err (!%p3988_p5)
}
  0x65   :  { %74 = dma.hbm_to_vmem [thread:$0]  %s4875_s4, 256, %s69_s16, [#allocation9], %s4047_s11, %s4047_s11, %s4048_s12  }
  0x66   :  { %s3992_s28 = scalar_lea.hbm %s4877_s6, 16384 }
  0x67   :  { %p3993_p6 = scmp.ne.s32.totalorder %s4877_s6, %s3992_s28  ;;  %p3996_p7 = scmp.lt.u32.totalorder %s3992_s28, %s4877_s6 }
  0x69   :  { %p3998_p8 = pnand %p3996_p7, %p3993_p6 }
  0x6b   :  { %4001 = shalt.err (!%p3998_p8)
}
  0x6c   :  { %s4002_s10 = scalar_lea.vmem %s93_s19, 16384  ;;  %p4007_p10 = scmp.lt.s32.totalorder %s93_s19, %s93_s19 }
  0x6d   :  { %p4003_p9 = scmp.ne.s32.totalorder %s93_s19, %s4002_s10  ;;  %p4008_p11 = scmp.lt.s32.totalorder %s4002_s10, %s4002_s10 }
  0x6f   :  { %p4009_p12 = por %p4008_p11, %p4007_p10 }
  0x71   :  { %p4010_p13 = pnand %p4009_p12, %p4003_p9 }
  0x73   :  { %4013 = shalt.err (!%p4010_p13)
}
  0x74   :  { %98 = dma.hbm_to_vmem [thread:$0]  %s4877_s6, 16384, %s93_s19, [#allocation12], %s4047_s11, %s4047_s11, %s4048_s12  }
  0x75   :  { %4036 = dma.done.wait [#allocation3], 128  }
  0x76   :  { %4037 = vsyncadd [#allocation3], 4294967168 }
  0x77   :  { %4038 = dma.done.wait [#allocation6], 2304  }
  0x78   :  { %4039 = vsyncadd [#allocation6], 4294964992 }
  0x79   :  { %4040 = dma.done.wait [#allocation9], 16640  }
  0x7a   :  { %4041 = vsyncadd [#allocation9], 4294950656 }
  0x7b   :  { %4042 = dma.done.wait [#allocation12], 18432  }
  0x7c   :  { %4043 = vsyncadd [#allocation12], 4294948864  ;;  %v4055_v0 = vmov 0.0|0.0   ;;  %vm4056_vm0 = vmmov 0   ;;  %v4057_v1 = vmov 0.0   ;;  %v280_v2 = vlaneseq  ;;  %v139_v7 = vld [vmem:[#allocation8] sm:$0xff] }
  0x7d   :  { %3372 = vmatprep.subr.bf16.mxu0 %v4055_v0  ;;  %2774 = vmatprep.mubr.msk.f32.mxu0 %vm4056_vm0, %v4057_v1  ;;  %v4058_v3 = vmov 1966171168   ;;  %v140_v8 = vld [vmem:[#allocation8 + $0x8] sm:$0xff]  ;;  %v141_v9 = vld [vmem:[#allocation8 + $0x10] sm:$0xff]  ;;  %v142_v11 = vld [vmem:[#allocation8 + $0x18] sm:$0xff]  ;;  %s4059_s6 = smov [#allocation14]  }
  0x7e   :  { %v278_v4 = vunpack.c.l.s4 %v4058_v3  ;;  %3588 = vmatprep.subr.bf16.mxu1 %v4055_v0  ;;  %3089 = vmatprep.mubr.msk.f32.mxu1 %vm4056_vm0, %v4057_v1  ;;  %v281_v6 = vshrl.u32 %v280_v2, 7  ;;  %v3373_v10 = vpack.c.bf16 %v140_v8, %v139_v7  ;;  %v3376_v13 = vpack.c.bf16 %v142_v11, %v141_v9  ;;  %v143_v14 = vld [vmem:[#allocation8 + $0x20] sm:$0xff]  ;;  %v144_v15 = vld [vmem:[#allocation8 + $0x28] sm:$0xff]  ;;  %v121_v16 = vld [vmem:[#allocation5] sm:$0xff]  ;;  %s2398_s11 = sshll.u32 %s4059_s6, 4  ;;  %s2399_s11 = int_to_ptr.vmem [resolvable:$true] %s2398_s11 }
  0x7f   :  { %v276_v17 = vcombine.high %v121_v16, %v121_v16  ;;  %v3379_v19 = vpack.c.bf16 %v144_v15, %v143_v14  ;;  %v145_v21 = vld [vmem:[#allocation8 + $0x30] sm:$0xff]  ;;  %v146_v22 = vld [vmem:[#allocation8 + $0x38] sm:$0xff]  ;;  %v147_v26 = vld [vmem:[#allocation8 + $0x40] sm:$0xff]  ;;  %s4014_s12 = scalar_lea.vmem %s2399_s11, 128  ;;  %p4019_p1 = scmp.lt.s32.totalorder %s2399_s11, %s2399_s11 }
  0x80   :  { %v279_v5 = vunpack.c.0.s8 %v278_v4  ;;  %3374 = vmatpush3.bf16.msra.mxu0 %v3373_v10  ;;  %v4212_v20 = vsub.s32 0, %v281_v6  ;;  %v148_v27 = vld [vmem:[#allocation8 + $0x48] sm:$0xff]  ;;  %v3382_v32 = vpack.c.bf16 %v146_v22, %v145_v21  ;;  %v149_v43 = vld [vmem:[#allocation8 + $0x50] sm:$0xff]  ;;  %v150_v44 = vld [vmem:[#allocation8 + $0x58] sm:$0xff]  ;;  %p4015_p0 = scmp.ne.s32.totalorder %s2399_s11, %s4014_s12  ;;  %p4020_p2 = scmp.lt.s32.totalorder %s4014_s12, %s4014_s12 }
  0x81   :  { %3375 = vmatprep.subr.bf16.mxu0 %v4055_v0  ;;  %v4219_v28 = vld [vmem:[#allocation2] sm:$0xff]  ;;  %v3385_v37 = vpack.c.bf16 %v148_v27, %v147_v26  ;;  %v3388_v55 = vpack.c.bf16 %v150_v44, %v149_v43  ;;  %v151_v59 = vld [vmem:[#allocation8 + $0x60] sm:$0xff]  ;;  %v153_v15 = vld [vmem:[#allocation8 + $0x70] sm:$0xff] }
  0x82   :  { %v4208_v12 = vsub.s32 %v279_v5, %v281_v6  ;;  %v152_v60 = vld [vmem:[#allocation8 + $0x68] sm:$0xff]  ;;  %p4021_p3 = por %p4020_p2, %p4019_p1 }
  0x83   :  { %v3391_v10 = vpack.c.bf16 %v152_v60, %v151_v59 }
  0x84   :  { %v283_v18 = vrot.slane %v121_v16, %v4208_v12  ;;  %3377 = vmatpush3.bf16.msra.mxu0 %v3376_v13  ;;  %v4216_v23 = vrot.slane %v276_v17, %v4208_v12  ;;  %v154_v16 = vld [vmem:[#allocation8 + $0x78] sm:$0xff]  ;;  %p4022_p4 = pnand %p4021_p3, %p4015_p0 }
  0x85   :  { %3378 = vmatprep.subr.bf16.mxu0 %v4055_v0  ;;  %v3394_v26 = vpack.c.bf16 %v154_v16, %v153_v15 }
  0x86   :  { %v291_v24 = vcombine.high %v283_v18, %v283_v18  ;;  %v299_v25 = vrot.slane %v283_v18, %v4208_v12  ;;  %v4223_v29 = vrot.slane %v4216_v23, %v4208_v12  ;;  %v292_v11 = vcombine.high %v4216_v23, %v4216_v23 }
  0x88   :  { %v313_v30 = vrot.slane %v291_v24, %v4208_v12  ;;  %v321_v31 = vcombine.high %v299_v25, %v299_v25  ;;  %3380 = vmatpush3.bf16.msra.mxu0 %v3379_v19  ;;  %v352_v33 = vrot.slane %v299_v25, %v4212_v20  ;;  %v4232_v38 = vrot.slane %v4223_v29, %v4212_v20 }
  0x89   :  { %3381 = vmatprep.subr.bf16.mxu0 %v4055_v0 }
  0x8a   :  { %v323_v34 = vcombine.high %v313_v30, %v313_v30  ;;  %v356_v35 = vrot.slane %v313_v30, %v4212_v20  ;;  %v360_v36 = vrot.slane %v321_v31, %v4212_v20  ;;  %vm404_vm1 = vcmp.ge.f32.partialorder %v4219_v28, %v352_v33 }
  0x8b   :  { %v464_v39 = vsub.f32 %v4219_v28, %v352_v33  ;;  %vm423_vm6 = vcmp.lt.f32.partialorder %v4219_v28, %v4232_v38  ;;  %v486_v57 = vsub.f32 %v4232_v38, %v4219_v28  ;;  %v4275_v31 = vrot.slane %v292_v11, %v4208_v12 }
  0x8c   :  { %v364_v40 = vrot.slane %v323_v34, %v4212_v20  ;;  %vm405_vm2 = vcmp.ge.f32.partialorder %v4219_v28, %v356_v35  ;;  %vm406_vm3 = vcmp.ge.f32.partialorder %v4219_v28, %v360_v36  ;;  %vm420_vm4 = vcmp.lt.f32.partialorder %v4219_v28, %v356_v35  ;;  %3383 = vmatpush3.bf16.msra.mxu0 %v3382_v32 }
  0x8d   :  { %vm421_vm5 = vcmp.lt.f32.partialorder %v4219_v28, %v360_v36  ;;  %vm431_vm7 = vmand %vm404_vm1, %vm420_vm4  ;;  %v465_v41 = vsub.f32 %v4219_v28, %v356_v35  ;;  %v4245_v42 = vsub.f32 %v4219_v28, %v360_v36  ;;  %3384 = vmatprep.subr.bf16.mxu0 %v4055_v0  ;;  %v474_v48 = vmul.f32 2.5, %v464_v39  ;;  %v123_v35 = vld [vmem:[#allocation7] sm:$0xff] }
  0x8e   :  { %vm407_vm8 = vcmp.ge.f32.partialorder %v4219_v28, %v364_v40  ;;  %vm422_vm9 = vcmp.lt.f32.partialorder %v4219_v28, %v364_v40  ;;  %vm432_vm10 = vmand %vm405_vm2, %vm421_vm5  ;;  %v2412_v45 = vsel %vm431_vm7, 1.0, %v4057_v1  ;;  %v4252_v46 = vsub.f32 %v4219_v28, %v364_v40 }
  0x8f   :  { %vm433_vm11 = vmand %vm406_vm3, %vm422_vm9  ;;  %v2413_v47 = vsel %vm432_vm10, 1.0, %v4057_v1  ;;  %v475_v49 = vmul.f32 2.5, %v465_v41  ;;  %v476_v50 = vmul.f32 2.5, %v4245_v42  ;;  %v484_v53 = vsub.f32 %v360_v36, %v4219_v28  ;;  %v124_v36 = vld [vmem:[#allocation7 + $0x8] sm:$0xff] }
  0x90   :  { %vm434_vm12 = vmand %vm407_vm8, %vm423_vm6  ;;  %v2414_v51 = vsel %vm433_vm11, 1.0, %v4057_v1  ;;  %v477_v52 = vmul.f32 2.5, %v4252_v46  ;;  %v485_v54 = vsub.f32 %v364_v40, %v4219_v28  ;;  %3386 = vmatpush3.bf16.msra.mxu0 %v3385_v37  ;;  %v504_v58 = vmul.f32 %v2412_v45, %v474_v48 }
  0x91   :  { %v2415_v56 = vsel %vm434_vm12, 1.0, %v4057_v1  ;;  %3387 = vmatprep.subr.bf16.mxu0 %v4055_v0  ;;  %v494_v61 = vmul.f32 2.5, %v484_v53  ;;  %v505_v63 = vmul.f32 %v2413_v47, %v475_v49  ;;  %v496_v3 = vmul.f32 2.5, %v486_v57 }
  0x92   :  { %v495_v62 = vmul.f32 2.5, %v485_v54  ;;  %v4269_v2 = vmul.f32 %v2415_v56, %v477_v52  ;;  %v506_v4 = vmul.f32 %v2414_v51, %v476_v50  ;;  %v534_v5 = vmul.f32 1.25, %v464_v39  ;;  %v125_v50 = vld [vmem:[#allocation7 + $0x10] sm:$0xff] }
  0x93   :  { %v514_v6 = vmul.f32 %v2413_v47, %v494_v61  ;;  %v535_v8 = vmul.f32 1.25, %v465_v41  ;;  %v543_v9 = vmul.f32 1.25, %v485_v54  ;;  %v516_v13 = vmul.f32 %v2415_v56, %v496_v3  ;;  %v128_v61 = vld [vmem:[#allocation7 + $0x28] sm:$0xff] }
  0x94   :  { %v515_v7 = vmul.f32 %v2414_v51, %v495_v62  ;;  %3389 = vmatpush3.bf16.msra.mxu0 %v3388_v55  ;;  %v544_v14 = vmul.f32 1.25, %v486_v57  ;;  %v579_v25 = vmul.f32 0.8333333, %v464_v39  ;;  %v587_v30 = vmul.f32 0.8333333, %v486_v57  ;;  %v126_v51 = vld [vmem:[#allocation7 + $0x18] sm:$0xff] }
  0x95   :  { %3390 = vmatprep.subr.bf16.mxu0 %v4055_v0  ;;  %v524_v17 = vadd.f32 %v514_v6, %v504_v58  ;;  %v526_v19 = vadd.f32 %v516_v13, %v506_v4  ;;  %v536_v32 = vmul.f32 1.25, %v4245_v42  ;;  %v580_v33 = vmul.f32 0.8333333, %v465_v41  ;;  %v130_v6 = vld [vmem:[#allocation7 + $0x38] sm:$0xff] }
  0x96   :  { %v525_v18 = vadd.f32 %v515_v7, %v505_v63  ;;  %v2410_v37 = vmul.f32 -1.442695, %v4219_v28  ;;  %v372_v39 = vrot.slane %v4275_v31, %v4212_v20  ;;  %vm408_vm13 = vcmp.ge.f32.partialorder %v4219_v28, %v4232_v38 }
  0x97   :  { %v552_v21 = vmul.f32 %v534_v5, %v524_v17  ;;  %v562_v27 = vmul.f32 %v544_v14, %v526_v19  ;;  %v322_v40 = vcombine.high %v4223_v29, %v4223_v29  ;;  %v554_v44 = vmul.f32 %v536_v32, %v526_v19  ;;  %v129_v5 = vld [vmem:[#allocation7 + $0x30] sm:$0xff]  ;;  %v132_v32 = vld [vmem:[#allocation7 + $0x48] sm:$0xff] }
  0x98   :  { %v553_v22 = vmul.f32 %v535_v8, %v525_v18  ;;  %v561_v24 = vmul.f32 %v543_v9, %v525_v18  ;;  %3392 = vmatpush3.bf16.msra.mxu0 %v3391_v10  ;;  %vm424_vm14 = vcmp.lt.f32.partialorder %v4219_v28, %v372_v39  ;;  %v487_v41 = vsub.f32 %v372_v39, %v4219_v28 }
  0x99   :  { %3393 = vmatprep.subr.bf16.mxu0 %v4055_v0  ;;  %v3397_v48 = vpack.c.bf16 %v124_v36, %v123_v35  ;;  %vm435_vm15 = vmand %vm408_vm13, %vm424_vm14  ;;  %3852 = vpow2.f32 %v2410_v37  ;;  %v4291_v53 = vrot.slane %v322_v40, %v4212_v20  ;;  %vm409_vm1 = vcmp.ge.f32.partialorder %v4219_v28, %v372_v39 }
  0x9a   :  { %v570_v23 = vadd.f32 %v561_v24, %v552_v21  ;;  %v571_v34 = vadd.f32 %v562_v27, %v553_v22  ;;  %v2416_v52 = vsel %vm435_vm15, 1.0, %v4057_v1  ;;  %v497_v29 = vmul.f32 2.5, %v487_v41 }
  0x9b   :  { %v4296_v54 = vsub.f32 %v4219_v28, %v4232_v38  ;;  %v545_v56 = vmul.f32 1.25, %v487_v41  ;;  %v537_v57 = vmul.f32 1.25, %v4252_v46  ;;  %v3400_v58 = vpack.c.bf16 %v126_v51, %v125_v50  ;;  %v127_v38 = vld [vmem:[#allocation7 + $0x20] sm:$0xff] }
  0x9c   :  { %v595_v43 = vmul.f32 %v579_v25, %v570_v23  ;;  %3395 = vmatpush3.bf16.msra.mxu0 %v3394_v26  ;;  %v603_v45 = vmul.f32 %v587_v30, %v571_v34  ;;  %v596_v47 = vmul.f32 %v580_v33, %v571_v34  ;;  %v517_v55 = vmul.f32 %v2416_v52, %v497_v29  ;;  %v131_v23 = vld [vmem:[#allocation7 + $0x40] sm:$0xff] }
  0x9d   :  { %3396 = vmatprep.subr.bf16.mxu0 %v4055_v0  ;;  %vm425_vm2 = vcmp.lt.f32.partialorder %v4219_v28, %v4291_v53  ;;  %v478_v59 = vmul.f32 2.5, %v4296_v54  ;;  %v488_v60 = vsub.f32 %v4291_v53, %v4219_v28  ;;  %v588_v8 = vmul.f32 0.8333333, %v487_v41  ;;  %v133_v41 = vld [vmem:[#allocation7 + $0x50] sm:$0xff] }
  0x9e   :  { %v611_v49 = vadd.f32 %v603_v45, %v595_v43  ;;  %v527_v62 = vadd.f32 %v517_v55, %v4269_v2  ;;  %vm436_vm3 = vmand %vm409_vm1, %vm425_vm2  ;;  %v581_v10 = vmul.f32 0.8333333, %v4245_v42  ;;  %v3403_v11 = vpack.c.bf16 %v128_v61, %v127_v38  ;;  %v4337_v45 = vld.sshfl [vmem:[#allocation5 + $0x8] sm:$0x33 pattern:$0x75316420] }
  0x9f   :  { %v2417_v63 = vsel %vm436_vm3, 1.0, %v4057_v1  ;;  %v498_v3 = vmul.f32 2.5, %v488_v60  ;;  %v508_v4 = vmul.f32 %v2416_v52, %v478_v59  ;;  %v546_v14 = vmul.f32 1.25, %v488_v60  ;;  %v136_v59 = vld [vmem:[#allocation7 + $0x68] sm:$0xff] }
  0xa0   :  { %2775 = vmatmul.mubr.f32.vlgmr.msra.gmra.mrb[0].mxu0 %v611_v49  ;;  %v563_v7 = vmul.f32 %v545_v56, %v527_v62  ;;  %v555_v9 = vmul.f32 %v537_v57, %v527_v62  ;;  %v324_v15 = vcombine.high %v4275_v31, %v4275_v31  ;;  %v4316_v16 = vsub.f32 %v4219_v28, %v372_v39 }
  0xa1   :  { %3398 = vmatpush3.bf16.msra.mxu0 %v3397_v48  ;;  %2809 = vmatprep.mubr.msk.f32.mxu0 %vm4056_vm0, %v4057_v1  ;;  %v518_v13 = vmul.f32 %v2417_v63, %v498_v3  ;;  %v3406_v17 = vpack.c.bf16 %v130_v6, %v129_v5  ;;  %vm410_vm4 = vcmp.ge.f32.partialorder %v4219_v28, %v4291_v53  ;;  %v538_v42 = vmul.f32 1.25, %v4296_v54  ;;  %v137_v5 = vld [vmem:[#allocation7 + $0x70] sm:$0xff]  ;;  %v138_v6 = vld [vmem:[#allocation7 + $0x78] sm:$0xff] }
  0xa2   :  { %3399 = vmatprep.subr.bf16.mxu0 %v4055_v0  ;;  %v572_v2 = vadd.f32 %v563_v7, %v554_v44  ;;  %v4322_v24 = vrot.slane %v324_v15, %v4212_v20  ;;  %v479_v25 = vmul.f32 2.5, %v4316_v16  ;;  %v589_v27 = vmul.f32 0.8333333, %v488_v60 }
  0xa3   :  { %v528_v18 = vadd.f32 %v518_v13, %v508_v4  ;;  %v3853_v19 = vpop.eup %3852  ;;  %v582_v31 = vmul.f32 0.8333333, %v4252_v46  ;;  %v3409_v40 = vpack.c.bf16 %v132_v32, %v131_v23  ;;  %v4342_v50 = vrot.slane %v4337_v45, %v4208_v12 }
  0xa4   :  { %v604_v21 = vmul.f32 %v588_v8, %v572_v2  ;;  %v597_v22 = vmul.f32 %v581_v10, %v572_v2  ;;  %vm426_vm5 = vcmp.lt.f32.partialorder %v4219_v28, %v4322_v24  ;;  %v489_v34 = vsub.f32 %v4322_v24, %v4219_v28 }
  0xa5   :  { %3401 = vmatpush3.bf16.msra.mxu0 %v3400_v58  ;;  %v564_v26 = vmul.f32 %v546_v14, %v528_v18  ;;  %v556_v30 = vmul.f32 %v538_v42, %v528_v18  ;;  %v509_v35 = vmul.f32 %v2417_v63, %v479_v25  ;;  %v270_v36 = vadd.f32 1.0, %v3853_v19  ;;  %vm437_vm6 = vmand %vm410_vm4, %vm426_vm5  ;;  %v135_v58 = vld [vmem:[#allocation7 + $0x60] sm:$0xff]  ;;  %v156_v18 = vld [vmem:[#allocation8 + $0x88] sm:$0xff] }
  0xa6   :  { %3402 = vmatprep.subr.bf16.mxu0 %v4055_v0  ;;  %v4327_v33 = vadd.f32 %v604_v21, %v596_v47  ;;  %v2418_v46 = vsel %vm437_vm6, 1.0, %v4057_v1  ;;  %v499_v39 = vmul.f32 2.5, %v489_v34  ;;  %v134_v47 = vld [vmem:[#allocation7 + $0x58] sm:$0xff]  ;;  %v547_v49 = vmul.f32 1.25, %v489_v34 }
  0xa7   :  { %v573_v37 = vadd.f32 %v564_v26, %v555_v9  ;;  %3854 = vrcp.f32 %v270_v36  ;;  %v4348_v29 = vrot.slane %v4342_v50, %v4212_v20  ;;  %v3412_v55 = vpack.c.bf16 %v134_v47, %v133_v41 }
  0xa8   :  { %v519_v48 = vmul.f32 %v2418_v46, %v499_v39  ;;  %v590_v56 = vmul.f32 0.8333333, %v489_v34  ;;  %v4352_v57 = vsub.f32 %v4219_v28, %v4291_v53  ;;  %vm411_vm7 = vcmp.ge.f32.partialorder %v4219_v28, %v4322_v24 }
  0xa9   :  { %3404 = vmatpush3.bf16.msra.mxu0 %v3403_v11  ;;  %v605_v43 = vmul.f32 %v589_v27, %v573_v37  ;;  %v598_v44 = vmul.f32 %v582_v31, %v573_v37  ;;  %vm427_vm8 = vcmp.lt.f32.partialorder %v4219_v28, %v4348_v29  ;;  %v490_v38 = vsub.f32 %v4348_v29, %v4219_v28  ;;  %v158_v31 = vld [vmem:[#allocation8 + $0x98] sm:$0xff]  ;;  %v161_v37 = vld [vmem:[#allocation8 + $0xb0] sm:$0xff] }
  0xaa   :  { %3405 = vmatprep.subr.bf16.mxu0 %v4055_v0  ;;  %v529_v52 = vadd.f32 %v519_v48, %v509_v35  ;;  %vm438_vm9 = vmand %vm411_vm7, %vm427_vm8  ;;  %v480_v61 = vmul.f32 2.5, %v4352_v57  ;;  %v3415_v3 = vpack.c.bf16 %v136_v59, %v135_v58  ;;  %v539_v9 = vmul.f32 1.25, %v4316_v16  ;;  %v160_v35 = vld [vmem:[#allocation8 + $0xa8] sm:$0xff]  ;;  %v165_v48 = vld [vmem:[#allocation8 + $0xd0] sm:$0xff] }
  0xab   :  { %v4344_v51 = vadd.f32 %v605_v43, %v597_v22  ;;  %v4363_v53 = vsel %vm438_vm9, 1.0, %v4057_v1  ;;  %v500_v63 = vmul.f32 2.5, %v490_v38  ;;  %v548_v10 = vmul.f32 1.25, %v490_v38  ;;  %v164_v43 = vld [vmem:[#allocation8 + $0xc8] sm:$0xff]  ;;  %v167_v58 = vld [vmem:[#allocation8 + $0xe0] sm:$0xff] }
  0xac   :  { %v565_v60 = vmul.f32 %v547_v49, %v529_v52  ;;  %v510_v4 = vmul.f32 %v2418_v46, %v480_v61  ;;  %v3418_v2 = vpack.c.bf16 %v138_v6, %v137_v5  ;;  %v557_v15 = vmul.f32 %v539_v9, %v529_v52  ;;  %v162_v46 = vld [vmem:[#allocation8 + $0xb8] sm:$0xff]  ;;  %v168_v59 = vld [vmem:[#allocation8 + $0xe8] sm:$0xff] }
  0xad   :  { %3407 = vmatpush3.bf16.msra.mxu0 %v3406_v17  ;;  %v520_v8 = vmul.f32 %v4363_v53, %v500_v63  ;;  %v155_v17 = vld [vmem:[#allocation8 + $0x80] sm:$0xff]  ;;  %v583_v19 = vmul.f32 0.8333333, %v4296_v54  ;;  %v591_v21 = vmul.f32 0.8333333, %v490_v38  ;;  %v3430_v39 = vpack.c.bf16 %v162_v46, %v161_v37  ;;  %v166_v49 = vld [vmem:[#allocation8 + $0xd8] sm:$0xff] }
  0xae   :  { %3408 = vmatprep.subr.bf16.mxu0 %v4055_v0  ;;  %v574_v62 = vadd.f32 %v565_v60, %v556_v30  ;;  %v3421_v26 = vpack.c.bf16 %v156_v18, %v155_v17  ;;  %v157_v30 = vld [vmem:[#allocation8 + $0x90] sm:$0xff]  ;;  %v159_v54 = vld [vmem:[#allocation8 + $0xa0] sm:$0xff]  ;;  %vm412_vm10 = vcmp.ge.f32.partialorder %v4219_v28, %v4348_v29  ;;  %v3439_v61 = vpack.c.bf16 %v168_v59, %v167_v58  ;;  %v182_v37 = vld [vmem:[#allocation8 + $0x158] sm:$0xff] }
  0xaf   :  { %v4370_v13 = vadd.f32 %v520_v8, %v510_v4  ;;  %v3424_v34 = vpack.c.bf16 %v158_v31, %v157_v30  ;;  %v3427_v36 = vpack.c.bf16 %v160_v35, %v159_v54  ;;  %v170_v4 = vld [vmem:[#allocation8 + $0xf8] sm:$0xff]  ;;  %v540_v6 = vmul.f32 1.25, %v4352_v57  ;;  %v177_v30 = vld [vmem:[#allocation8 + $0x130] sm:$0xff] }
  0xb0   :  { %v606_v7 = vmul.f32 %v590_v56, %v574_v62  ;;  %v599_v27 = vmul.f32 %v583_v19, %v574_v62  ;;  %v4399_v56 = vsub.f32 %v4219_v28, %v4322_v24  ;;  %v178_v31 = vld [vmem:[#allocation8 + $0x138] sm:$0xff]  ;;  %v347_v35 = vcombine.high %v4342_v50, %v4342_v50  ;;  %v184_v50 = vld [vmem:[#allocation8 + $0x168] sm:$0xff]  ;;  %v185_v58 = vld [vmem:[#allocation8 + $0x170] sm:$0xff] }
  0xb1   :  { %3410 = vmatpush3.bf16.msra.mxu0 %v3409_v40  ;;  %v3855_v14 = vpop.eup %3854  ;;  %v566_v42 = vmul.f32 %v548_v10, %v4370_v13  ;;  %v163_v40 = vld [vmem:[#allocation8 + $0xc0] sm:$0xff]  ;;  %v558_v9 = vmul.f32 %v540_v6, %v4370_v13  ;;  %v173_v13 = vld [vmem:[#allocation8 + $0x110] sm:$0xff]  ;;  %v186_v59 = vld [vmem:[#allocation8 + $0x178] sm:$0xff] }
  0xb2   :  { %3411 = vmatprep.subr.bf16.mxu0 %v4055_v0  ;;  %v4368_v11 = vadd.f32 %v606_v7, %v598_v44  ;;  %v273_v22 = vmul.f32 %v3855_v14, %v4219_v28  ;;  %v332_v44 = vcombine.high %v4337_v45, %v4337_v45  ;;  %v3433_v41 = vpack.c.bf16 %v164_v43, %v163_v40  ;;  %v172_v14 = vld [vmem:[#allocation8 + $0x108] sm:$0xff] }
  0xb3   :  { %v4376_v25 = vadd.f32 %v566_v42, %v557_v15  ;;  %v481_v60 = vmul.f32 2.5, %v4399_v56  ;;  %v584_v15 = vmul.f32 0.8333333, %v4316_v16  ;;  %v175_v16 = vld [vmem:[#allocation8 + $0x120] sm:$0xff]  ;;  %v4439_v46 = vrot.slane %v347_v35, %v4212_v20 }
  0xb4   :  { %v4390_v47 = vrot.slane %v332_v44, %v4208_v12  ;;  %v4443_v40 = vsub.f32 %v4219_v28, %v4348_v29  ;;  %v183_v44 = vld [vmem:[#allocation8 + $0x160] sm:$0xff] }
  0xb5   :  { %3413 = vmatpush3.bf16.msra.mxu0 %v3412_v55  ;;  %v607_v23 = vmul.f32 %v591_v21, %v4376_v25  ;;  %v3436_v55 = vpack.c.bf16 %v166_v49, %v165_v48  ;;  %v511_v62 = vmul.f32 %v4363_v53, %v481_v60  ;;  %v171_v53 = vld [vmem:[#allocation8 + $0x100] sm:$0xff]  ;;  %v600_v42 = vmul.f32 %v584_v15, %v4376_v25  ;;  %v174_v21 = vld [vmem:[#allocation8 + $0x118] sm:$0xff] }
  0xb6   :  { %3414 = vmatprep.subr.bf16.mxu0 %v4055_v0  ;;  %v4395_v52 = vrot.slane %v4390_v47, %v4212_v20  ;;  %v3445_v18 = vpack.c.bf16 %v172_v14, %v171_v53  ;;  %v492_v43 = vsub.f32 %v4439_v46, %v4219_v28  ;;  %vm429_vm14 = vcmp.lt.f32.partialorder %v4219_v28, %v4439_v46  ;;  %v190_v14 = vld [vmem:[#allocation8 + $0x198] sm:$0xff] }
  0xb7   :  { %v4380_v32 = vadd.f32 %v607_v23, %v599_v27  ;;  %v176_v27 = vld [vmem:[#allocation8 + $0x128] sm:$0xff]  ;;  %v3454_v23 = vpack.c.bf16 %v178_v31, %v177_v30  ;;  %v3463_v49 = vpack.c.bf16 %v184_v50, %v183_v44  ;;  %vm414_vm1 = vcmp.ge.f32.partialorder %v4219_v28, %v4439_v46  ;;  %v202_v46 = vld [vmem:[#allocation8 + $0x1f8] sm:$0xff] }
  0xb8   :  { %v491_v45 = vsub.f32 %v4395_v52, %v4219_v28  ;;  %vm428_vm11 = vcmp.lt.f32.partialorder %v4219_v28, %v4395_v52  ;;  %v3451_v25 = vpack.c.bf16 %v176_v27, %v175_v16  ;;  %vm413_vm13 = vcmp.ge.f32.partialorder %v4219_v28, %v4395_v52  ;;  %v197_v27 = vld [vmem:[#allocation8 + $0x1d0] sm:$0xff] }
  0xb9   :  { %3416 = vmatpush3.bf16.msra.mxu0 %v3415_v3  ;;  %vm439_vm12 = vmand %vm412_vm10, %vm428_vm11  ;;  %v169_v3 = vld [vmem:[#allocation8 + $0xf0] sm:$0xff]  ;;  %v502_v48 = vmul.f32 2.5, %v492_v43  ;;  %v473_v31 = vsub.f32 %v4219_v28, %v4395_v52 }
  0xba   :  { %3417 = vmatprep.subr.bf16.mxu0 %v4055_v0  ;;  %v501_v38 = vmul.f32 2.5, %v491_v45  ;;  %v4410_v24 = vsel %vm439_vm12, 1.0, %v4057_v1  ;;  %v549_v7 = vmul.f32 1.25, %v491_v45  ;;  %v3442_v8 = vpack.c.bf16 %v170_v4, %v169_v3  ;;  %vm440_vm15 = vmand %vm413_vm13, %vm429_vm14  ;;  %v188_v4 = vld [vmem:[#allocation8 + $0x188] sm:$0xff] }
  0xbb   :  { %v592_v17 = vmul.f32 0.8333333, %v491_v45  ;;  %v4454_v29 = vsel %vm440_vm15, 1.0, %v4057_v1 }
  0xbc   :  { %v521_v63 = vmul.f32 %v4410_v24, %v501_v38  ;;  %v522_v45 = vmul.f32 %v4454_v29, %v502_v48  ;;  %v541_v38 = vmul.f32 1.25, %v4399_v56 }
  0xbd   :  { %3419 = vmatpush3.bf16.msra.mxu0 %v3418_v2 }
  0xbe   :  { %3420 = vmatprep.subr.bf16.mxu0 %v4055_v0  ;;  %v4415_v5 = vadd.f32 %v521_v63, %v511_v62  ;;  %v3466_v62 = vpack.c.bf16 %v186_v59, %v185_v58  ;;  %v586_v58 = vmul.f32 0.8333333, %v4399_v56 }
  0xc0   :  { %2810 = vmatmul.mubr.f32.vlgmr.msra.gmra.mrb[0].mxu0 %v273_v22  ;;  %v567_v10 = vmul.f32 %v549_v7, %v4415_v5  ;;  %v559_v63 = vmul.f32 %v541_v38, %v4415_v5  ;;  %v585_v7 = vmul.f32 0.8333333, %v4352_v57  ;;  %v189_v5 = vld [vmem:[#allocation8 + $0x190] sm:$0xff]  ;;  %v191_v57 = vld [vmem:[#allocation8 + $0x1a0] sm:$0xff] }
  0xc1   :  { %3422 = vmatpush3.bf16.msra.mxu0 %v3421_v26  ;;  %2844 = vmatprep.mubr.msk.f32.mxu0 %vm4056_vm0, %v4057_v1  ;;  %v3448_v26 = vpack.c.bf16 %v174_v21, %v173_v13  ;;  %v196_v21 = vld [vmem:[#allocation8 + $0x1c8] sm:$0xff] }
  0xc2   :  { %3423 = vmatprep.subr.bf16.mxu0 %v4055_v0  ;;  %v4421_v2 = vadd.f32 %v567_v10, %v558_v9 }
  0xc4   :  { %v608_v19 = vmul.f32 %v592_v17, %v4421_v2  ;;  %v601_v10 = vmul.f32 %v585_v7, %v4421_v2  ;;  %v3472_v17 = vpack.c.bf16 %v190_v14, %v189_v5  ;;  %v209_v14 = vld [vmem:[#allocation8 + $0x230] sm:$0xff] }
  0xc5   :  { %3425 = vmatpush3.bf16.msra.mxu0 %v3424_v34  ;;  %v180_v34 = vld [vmem:[#allocation8 + $0x148] sm:$0xff] }
  0xc6   :  { %3426 = vmatprep.subr.bf16.mxu0 %v4055_v0  ;;  %v4427_v22 = vadd.f32 %v608_v19, %v600_v42  ;;  %v193_v42 = vld [vmem:[#allocation8 + $0x1b0] sm:$0xff]  ;;  %v194_v19 = vld [vmem:[#allocation8 + $0x1b8] sm:$0xff] }
  0xc7   :  { %v3478_v13 = vpack.c.bf16 %v194_v19, %v193_v42  ;;  %v211_v19 = vld [vmem:[#allocation8 + $0x240] sm:$0xff] }
  0xc9   :  { %3428 = vmatpush3.bf16.msra.mxu0 %v3427_v36  ;;  %v181_v36 = vld [vmem:[#allocation8 + $0x150] sm:$0xff] }
  0xca   :  { %3429 = vmatprep.subr.bf16.mxu0 %v4055_v0 }
  0xcd   :  { %3431 = vmatpush3.bf16.msra.mxu0 %v3430_v39  ;;  %v3460_v39 = vpack.c.bf16 %v182_v37, %v181_v36 }
  0xce   :  { %3432 = vmatprep.subr.bf16.mxu0 %v4055_v0 }
  0xd1   :  { %3434 = vmatpush3.bf16.msra.mxu0 %v3433_v41  ;;  %v482_v41 = vmul.f32 2.5, %v4443_v40 }
  0xd2   :  { %3435 = vmatprep.subr.bf16.mxu0 %v4055_v0 }
  0xd5   :  { %3437 = vmatpush3.bf16.msra.mxu0 %v3436_v55  ;;  %v512_v55 = vmul.f32 %v4410_v24, %v482_v41  ;;  %v187_v24 = vld [vmem:[#allocation8 + $0x180] sm:$0xff] }
  0xd6   :  { %3438 = vmatprep.subr.bf16.mxu0 %v4055_v0  ;;  %v3469_v9 = vpack.c.bf16 %v188_v4, %v187_v24  ;;  %v1275_v24 = vld [vmem:[#allocation13 + $0x8] sm:$0xff]  ;;  %v1276_v4 = vld [vmem:[#allocation13 + $0x10] sm:$0xff] }
  0xd7   :  { %v4459_v60 = vadd.f32 %v522_v45, %v512_v55  ;;  %v203_v55 = vld [vmem:[#allocation8 + $0x200] sm:$0xff] }
  0xd9   :  { %3440 = vmatpush3.bf16.msra.mxu0 %v3439_v61  ;;  %v550_v61 = vmul.f32 1.25, %v492_v43 }
  0xda   :  { %3441 = vmatprep.subr.bf16.mxu0 %v4055_v0 }
  0xdb   :  { %v568_v3 = vmul.f32 %v550_v61, %v4459_v60 }
  0xdd   :  { %3443 = vmatpush3.bf16.msra.mxu0 %v3442_v8  ;;  %v4465_v6 = vadd.f32 %v568_v3, %v559_v63  ;;  %v593_v8 = vmul.f32 0.8333333, %v492_v43  ;;  %v201_v43 = vld [vmem:[#allocation8 + $0x1f0] sm:$0xff] }
  0xde   :  { %3444 = vmatprep.subr.bf16.mxu0 %v4055_v0  ;;  %v1274_v3 = vld [vmem:[#allocation13] sm:$0xff] }
  0xdf   :  { %v609_v53 = vmul.f32 %v593_v8, %v4465_v6  ;;  %v602_v38 = vmul.f32 %v586_v58, %v4465_v6  ;;  %v3589_v56 = vpack.c.bf16 %v1275_v24, %v1274_v3  ;;  %v1277_v6 = vld [vmem:[#allocation13 + $0x18] sm:$0xff]  ;;  %v207_v8 = vld [vmem:[#allocation8 + $0x220] sm:$0xff]  ;;  %v237_v24 = vld [vmem:[#allocation8 + $0x310] sm:$0xff] }
  0xe0   :  { %2845 = vmatmul.mubr.f32.vlgmr.msra.gmra.mrb[0].mxu0 %v4327_v33  ;;  %v179_v33 = vld [vmem:[#allocation8 + $0x140] sm:$0xff]  ;;  %v232_v58 = vld [vmem:[#allocation8 + $0x2e8] sm:$0xff] }
  0xe1   :  { %3446 = vmatpush3.bf16.msra.mxu0 %v3445_v18  ;;  %2879 = vmatprep.mubr.msk.f32.mxu0 %vm4056_vm0, %v4057_v1  ;;  %v3457_v54 = vpack.c.bf16 %v180_v34, %v179_v33  ;;  %v4471_v15 = vadd.f32 %v609_v53, %v601_v10  ;;  %v192_v18 = vld [vmem:[#allocation8 + $0x1a8] sm:$0xff]  ;;  %v3592_v10 = vpack.c.bf16 %v1277_v6, %v1276_v4  ;;  %v1278_v53 = vld [vmem:[#allocation13 + $0x20] sm:$0xff]  ;;  %v238_v4 = vld [vmem:[#allocation8 + $0x318] sm:$0xff] }
  0xe2   :  { %3447 = vmatprep.subr.bf16.mxu0 %v4055_v0  ;;  %v3475_v2 = vpack.c.bf16 %v192_v18, %v191_v57  ;;  %v200_v34 = vld [vmem:[#allocation8 + $0x1e8] sm:$0xff]  ;;  %3590 = vmatpush3.bf16.msra.mxu1 %v3589_v56  ;;  %v1280_v18 = vld [vmem:[#allocation13 + $0x30] sm:$0xff] }
  0xe3   :  { %3591 = vmatprep.subr.bf16.mxu1 %v4055_v0  ;;  %v239_v56 = vld [vmem:[#allocation8 + $0x320] sm:$0xff]  ;;  %v240_v6 = vld [vmem:[#allocation8 + $0x328] sm:$0xff] }
  0xe5   :  { %3449 = vmatpush3.bf16.msra.mxu0 %v3448_v26  ;;  %v348_v26 = vcombine.high %v4390_v47, %v4390_v47  ;;  %v199_v47 = vld [vmem:[#allocation8 + $0x1e0] sm:$0xff] }
  0xe6   :  { %3450 = vmatprep.subr.bf16.mxu0 %v4055_v0  ;;  %3593 = vmatpush3.bf16.msra.mxu1 %v3592_v10  ;;  %v242_v10 = vld [vmem:[#allocation8 + $0x338] sm:$0xff] }
  0xe7   :  { %v418_v30 = vrot.slane %v348_v26, %v4212_v20  ;;  %3594 = vmatprep.subr.bf16.mxu1 %v4055_v0  ;;  %v213_v26 = vld [vmem:[#allocation8 + $0x250] sm:$0xff] }
  0xe9   :  { %3452 = vmatpush3.bf16.msra.mxu0 %v3451_v25  ;;  %v198_v25 = vld [vmem:[#allocation8 + $0x1d8] sm:$0xff]  ;;  %vm430_vm2 = vcmp.lt.f32.partialorder %v4219_v28, %v418_v30 }
  0xea   :  { %3453 = vmatprep.subr.bf16.mxu0 %v4055_v0  ;;  %v3484_v33 = vpack.c.bf16 %v198_v25, %v197_v27  ;;  %vm441_vm3 = vmand %vm414_vm1, %vm430_vm2  ;;  %v215_v25 = vld [vmem:[#allocation8 + $0x260] sm:$0xff] }
  0xeb   :  { %v2422_v36 = vsel %vm441_vm3, 1.0, %v4057_v1 }
  0xed   :  { %3455 = vmatpush3.bf16.msra.mxu0 %v3454_v23  ;;  %v493_v23 = vsub.f32 %v418_v30, %v4219_v28  ;;  %v542_v28 = vmul.f32 1.25, %v4443_v40  ;;  %v205_v40 = vld [vmem:[#allocation8 + $0x210] sm:$0xff]  ;;  %v216_v30 = vld [vmem:[#allocation8 + $0x268] sm:$0xff] }
  0xee   :  { %3456 = vmatprep.subr.bf16.mxu0 %v4055_v0 }
  0xef   :  { %v503_v35 = vmul.f32 2.5, %v493_v23  ;;  %v551_v50 = vmul.f32 1.25, %v493_v23  ;;  %v560_v41 = vmul.f32 %v542_v28, %v4459_v60  ;;  %v594_v59 = vmul.f32 0.8333333, %v493_v23  ;;  %v206_v60 = vld [vmem:[#allocation8 + $0x218] sm:$0xff]  ;;  %v217_v23 = vld [vmem:[#allocation8 + $0x270] sm:$0xff] }
  0xf0   :  { %v3496_v7 = vpack.c.bf16 %v206_v60, %v205_v40  ;;  %v226_v28 = vld [vmem:[#allocation8 + $0x2b8] sm:$0xff]  ;;  %v235_v40 = vld [vmem:[#allocation8 + $0x300] sm:$0xff]  ;;  %v236_v60 = vld [vmem:[#allocation8 + $0x308] sm:$0xff] }
  0xf1   :  { %3458 = vmatpush3.bf16.msra.mxu0 %v3457_v54  ;;  %v483_v54 = vmul.f32 2.5, %v473_v31  ;;  %v523_v37 = vmul.f32 %v2422_v36, %v503_v35  ;;  %v3511_v31 = vpack.c.bf16 %v216_v30, %v215_v25  ;;  %v221_v36 = vld [vmem:[#allocation8 + $0x290] sm:$0xff]  ;;  %v3541_v3 = vpack.c.bf16 %v236_v60, %v235_v40  ;;  %v254_v25 = vld [vmem:[#allocation8 + $0x398] sm:$0xff] }
  0xf2   :  { %3459 = vmatprep.subr.bf16.mxu0 %v4055_v0 }
  0xf3   :  { %v513_v52 = vmul.f32 %v4454_v29, %v483_v54  ;;  %v204_v29 = vld [vmem:[#allocation8 + $0x208] sm:$0xff] }
  0xf4   :  { %v220_v54 = vld [vmem:[#allocation8 + $0x288] sm:$0xff] }
  0xf5   :  { %3461 = vmatpush3.bf16.msra.mxu0 %v3460_v39  ;;  %v3487_v39 = vpack.c.bf16 %v200_v34, %v199_v47  ;;  %v533_v44 = vadd.f32 %v523_v37, %v513_v52  ;;  %v219_v34 = vld [vmem:[#allocation8 + $0x280] sm:$0xff]  ;;  %v222_v52 = vld [vmem:[#allocation8 + $0x298] sm:$0xff] }
  0xf6   :  { %3462 = vmatprep.subr.bf16.mxu0 %v4055_v0  ;;  %v3517_v35 = vpack.c.bf16 %v220_v54, %v219_v34  ;;  %v3520_v37 = vpack.c.bf16 %v222_v52, %v221_v36  ;;  %v258_v34 = vld [vmem:[#allocation8 + $0x3b8] sm:$0xff]  ;;  %v261_v52 = vld [vmem:[#allocation8 + $0x3d0] sm:$0xff] }
  0xf7   :  { %v569_v48 = vmul.f32 %v551_v50, %v533_v44  ;;  %v225_v44 = vld [vmem:[#allocation8 + $0x2b0] sm:$0xff] }
  0xf8   :  { %v3526_v50 = vpack.c.bf16 %v226_v28, %v225_v44  ;;  %v265_v28 = vld [vmem:[#allocation8 + $0x3f0] sm:$0xff] }
  0xf9   :  { %3464 = vmatpush3.bf16.msra.mxu0 %v3463_v49  ;;  %v3490_v49 = vpack.c.bf16 %v202_v46, %v201_v43  ;;  %v578_v45 = vadd.f32 %v569_v48, %v560_v41  ;;  %v224_v43 = vld [vmem:[#allocation8 + $0x2a8] sm:$0xff] }
  0xfa   :  { %3465 = vmatprep.subr.bf16.mxu0 %v4055_v0  ;;  %v228_v41 = vld [vmem:[#allocation8 + $0x2c8] sm:$0xff] }
  0xfb   :  { %v610_v61 = vmul.f32 %v594_v59, %v578_v45  ;;  %v231_v45 = vld [vmem:[#allocation8 + $0x2e0] sm:$0xff] }
  0xfc   :  { %v3535_v59 = vpack.c.bf16 %v232_v58, %v231_v45  ;;  %v1286_v58 = vld [vmem:[#allocation13 + $0x60] sm:$0xff] }
  0xfd   :  { %3467 = vmatpush3.bf16.msra.mxu0 %v3466_v62  ;;  %v3493_v62 = vpack.c.bf16 %v204_v29, %v203_v55  ;;  %v4499_v63 = vadd.f32 %v610_v61, %v602_v38  ;;  %v230_v55 = vld [vmem:[#allocation8 + $0x2d8] sm:$0xff]  ;;  %v233_v38 = vld [vmem:[#allocation8 + $0x2f0] sm:$0xff] }
  0xfe   :  { %3468 = vmatprep.subr.bf16.mxu0 %v4055_v0  ;;  %v234_v61 = vld [vmem:[#allocation8 + $0x2f8] sm:$0xff] }
 0x100   :  { %2880 = vmatmul.mubr.f32.vlgmr.msra.gmra.mrb[0].mxu0 %v4344_v51  ;;  %v195_v51 = vld [vmem:[#allocation8 + $0x1c0] sm:$0xff] }
 0x101   :  { %3470 = vmatpush3.bf16.msra.mxu0 %v3469_v9  ;;  %2914 = vmatprep.mubr.msk.f32.mxu0 %vm4056_vm0, %v4057_v1  ;;  %v3481_v16 = vpack.c.bf16 %v196_v21, %v195_v51  ;;  %v208_v9 = vld [vmem:[#allocation8 + $0x228] sm:$0xff] }
 0x102   :  { %3471 = vmatprep.subr.bf16.mxu0 %v4055_v0  ;;  %v3499_v5 = vpack.c.bf16 %v208_v9, %v207_v8  ;;  %v3547_v8 = vpack.c.bf16 %v240_v6, %v239_v56  ;;  %v241_v9 = vld [vmem:[#allocation8 + $0x330] sm:$0xff] }
 0x105   :  { %3473 = vmatpush3.bf16.msra.mxu0 %v3472_v17  ;;  %v210_v17 = vld [vmem:[#allocation8 + $0x238] sm:$0xff] }
 0x106   :  { %3474 = vmatprep.subr.bf16.mxu0 %v4055_v0  ;;  %v3502_v42 = vpack.c.bf16 %v210_v17, %v209_v14  ;;  %v245_v14 = vld [vmem:[#allocation8 + $0x350] sm:$0xff]  ;;  %v246_v17 = vld [vmem:[#allocation8 + $0x358] sm:$0xff] }
 0x109   :  { %3476 = vmatpush3.bf16.msra.mxu0 %v3475_v2  ;;  %v1281_v2 = vld [vmem:[#allocation13 + $0x38] sm:$0xff] }
 0x10a   :  { %3477 = vmatprep.subr.bf16.mxu0 %v4055_v0  ;;  %v3598_v51 = vpack.c.bf16 %v1281_v2, %v1280_v18  ;;  %v247_v18 = vld [vmem:[#allocation8 + $0x360] sm:$0xff]  ;;  %v248_v2 = vld [vmem:[#allocation8 + $0x368] sm:$0xff] }
 0x10d   :  { %3479 = vmatpush3.bf16.msra.mxu0 %v3478_v13  ;;  %v212_v13 = vld [vmem:[#allocation8 + $0x248] sm:$0xff] }
 0x10e   :  { %3480 = vmatprep.subr.bf16.mxu0 %v4055_v0  ;;  %v3505_v21 = vpack.c.bf16 %v212_v13, %v211_v19  ;;  %v249_v19 = vld [vmem:[#allocation8 + $0x370] sm:$0xff]  ;;  %v250_v13 = vld [vmem:[#allocation8 + $0x378] sm:$0xff] }
 0x111   :  { %3482 = vmatpush3.bf16.msra.mxu0 %v3481_v16  ;;  %v214_v16 = vld [vmem:[#allocation8 + $0x258] sm:$0xff] }
 0x112   :  { %3483 = vmatprep.subr.bf16.mxu0 %v4055_v0  ;;  %v3508_v27 = vpack.c.bf16 %v214_v16, %v213_v26  ;;  %v252_v26 = vld [vmem:[#allocation8 + $0x388] sm:$0xff] }
 0x115   :  { %3485 = vmatpush3.bf16.msra.mxu0 %v3484_v33  ;;  %v218_v33 = vld [vmem:[#allocation8 + $0x278] sm:$0xff] }
 0x116   :  { %3486 = vmatprep.subr.bf16.mxu0 %v4055_v0  ;;  %v3514_v47 = vpack.c.bf16 %v218_v33, %v217_v23  ;;  %v256_v23 = vld [vmem:[#allocation8 + $0x3a8] sm:$0xff] }
 0x119   :  { %3488 = vmatpush3.bf16.msra.mxu0 %v3487_v39  ;;  %v223_v39 = vld [vmem:[#allocation8 + $0x2a0] sm:$0xff] }
 0x11a   :  { %3489 = vmatprep.subr.bf16.mxu0 %v4055_v0  ;;  %v3523_v46 = vpack.c.bf16 %v224_v43, %v223_v39  ;;  %v263_v43 = vld [vmem:[#allocation8 + $0x3e0] sm:$0xff] }
 0x11d   :  { %3491 = vmatpush3.bf16.msra.mxu0 %v3490_v49  ;;  %v229_v49 = vld [vmem:[#allocation8 + $0x2d0] sm:$0xff] }
 0x11e   :  { %3492 = vmatprep.subr.bf16.mxu0 %v4055_v0  ;;  %v3532_v29 = vpack.c.bf16 %v230_v55, %v229_v49  ;;  %v1284_v55 = vld [vmem:[#allocation13 + $0x50] sm:$0xff] }
 0x120   :  { %2915 = vmatmul.mubr.f32.vlgmr.msra.gmra.mrb[0].mxu0 %v4368_v11  ;;  %v1279_v11 = vld [vmem:[#allocation13 + $0x28] sm:$0xff] }
 0x121   :  { %3494 = vmatpush3.bf16.msra.mxu0 %v3493_v62  ;;  %2949 = vmatprep.mubr.msk.f32.mxu0 %vm4056_vm0, %v4057_v1  ;;  %v3595_v57 = vpack.c.bf16 %v1279_v11, %v1278_v53  ;;  %v3538_v62 = vpack.c.bf16 %v234_v61, %v233_v38  ;;  %v3550_v53 = vpack.c.bf16 %v242_v10, %v241_v9  ;;  %v244_v11 = vld [vmem:[#allocation8 + $0x348] sm:$0xff]  ;;  %v1288_v61 = vld [vmem:[#allocation13 + $0x70] sm:$0xff] }
 0x122   :  { %3495 = vmatprep.subr.bf16.mxu0 %v4055_v0 }
 0x123   :  { %3596 = vmatpush3.bf16.msra.mxu1 %v3595_v57  ;;  %v3556_v57 = vpack.c.bf16 %v246_v17, %v245_v14 }
 0x124   :  { %3597 = vmatprep.subr.bf16.mxu1 %v4055_v0 }
 0x125   :  { %3497 = vmatpush3.bf16.msra.mxu0 %v3496_v7  ;;  %v3544_v7 = vpack.c.bf16 %v238_v4, %v237_v24 }
 0x126   :  { %3498 = vmatprep.subr.bf16.mxu0 %v4055_v0 }
 0x127   :  { %3599 = vmatpush3.bf16.msra.mxu1 %v3598_v51  ;;  %v3562_v51 = vpack.c.bf16 %v250_v13, %v249_v19  ;;  %v4573_v13 = vld.sshfl [vmem:[#allocation10 + $0x8] sm:$0x33 pattern:$0x75316420] }
 0x128   :  { %3600 = vmatprep.subr.bf16.mxu1 %v4055_v0 }
 0x129   :  { %3500 = vmatpush3.bf16.msra.mxu0 %v3499_v5 }
 0x12a   :  { %3501 = vmatprep.subr.bf16.mxu0 %v4055_v0 }
 0x12d   :  { %3503 = vmatpush3.bf16.msra.mxu0 %v3502_v42  ;;  %v3559_v42 = vpack.c.bf16 %v248_v2, %v247_v18  ;;  %v4563_v18 = vld [vmem:[#allocation11] sm:$0xff]  ;;  %v4565_v2 = vld [vmem:[#allocation11 + $0x8] sm:$0xff] }
 0x12e   :  { %3504 = vmatprep.subr.bf16.mxu0 %v4055_v0 }
 0x131   :  { %3506 = vmatpush3.bf16.msra.mxu0 %v3505_v21  ;;  %v251_v21 = vld [vmem:[#allocation8 + $0x380] sm:$0xff] }
 0x132   :  { %3507 = vmatprep.subr.bf16.mxu0 %v4055_v0  ;;  %v3565_v16 = vpack.c.bf16 %v252_v26, %v251_v21  ;;  %v3613_v21 = vpack.c.bf16 %v4565_v2, %v4563_v18 }
 0x135   :  { %3509 = vmatpush3.bf16.msra.mxu0 %v3508_v27  ;;  %v253_v27 = vld [vmem:[#allocation8 + $0x390] sm:$0xff] }
 0x136   :  { %3510 = vmatprep.subr.bf16.mxu0 %v4055_v0  ;;  %v3568_v30 = vpack.c.bf16 %v254_v25, %v253_v27  ;;  %v4587_v27 = vrot.slane %v4573_v13, %v4208_v12 }
 0x139   :  { %3512 = vmatpush3.bf16.msra.mxu0 %v3511_v31  ;;  %v255_v31 = vld [vmem:[#allocation8 + $0x3a0] sm:$0xff] }
 0x13a   :  { %3513 = vmatprep.subr.bf16.mxu0 %v4055_v0  ;;  %v3571_v33 = vpack.c.bf16 %v256_v23, %v255_v31 }
 0x13d   :  { %3515 = vmatpush3.bf16.msra.mxu0 %v3514_v47  ;;  %v257_v47 = vld [vmem:[#allocation8 + $0x3b0] sm:$0xff] }
 0x13e   :  { %3516 = vmatprep.subr.bf16.mxu0 %v4055_v0  ;;  %v3574_v54 = vpack.c.bf16 %v258_v34, %v257_v47 }
 0x140   :  { %2950 = vmatmul.mubr.f32.vlgmr.msra.gmra.mrb[0].mxu0 %v4380_v32  ;;  %v227_v32 = vld [vmem:[#allocation8 + $0x2c0] sm:$0xff] }
 0x141   :  { %3518 = vmatpush3.bf16.msra.mxu0 %v3517_v35  ;;  %2984 = vmatprep.mubr.msk.f32.mxu0 %vm4056_vm0, %v4057_v1  ;;  %v3529_v48 = vpack.c.bf16 %v228_v41, %v227_v32  ;;  %v260_v35 = vld [vmem:[#allocation8 + $0x3c8] sm:$0xff]  ;;  %v1282_v41 = vld [vmem:[#allocation13 + $0x40] sm:$0xff] }
 0x142   :  { %3519 = vmatprep.subr.bf16.mxu0 %v4055_v0 }
 0x145   :  { %3521 = vmatpush3.bf16.msra.mxu0 %v3520_v37  ;;  %v262_v37 = vld [vmem:[#allocation8 + $0x3d8] sm:$0xff] }
 0x146   :  { %3522 = vmatprep.subr.bf16.mxu0 %v4055_v0  ;;  %v3580_v39 = vpack.c.bf16 %v262_v37, %v261_v52 }
 0x149   :  { %3524 = vmatpush3.bf16.msra.mxu0 %v3523_v46  ;;  %v264_v46 = vld [vmem:[#allocation8 + $0x3e8] sm:$0xff] }
 0x14a   :  { %3525 = vmatprep.subr.bf16.mxu0 %v4055_v0  ;;  %v3583_v44 = vpack.c.bf16 %v264_v46, %v263_v43 }
 0x14d   :  { %3527 = vmatpush3.bf16.msra.mxu0 %v3526_v50  ;;  %v266_v50 = vld [vmem:[#allocation8 + $0x3f8] sm:$0xff] }
 0x14e   :  { %3528 = vmatprep.subr.bf16.mxu0 %v4055_v0  ;;  %v3586_v32 = vpack.c.bf16 %v266_v50, %v265_v28 }
 0x151   :  { %3530 = vmatpush3.bf16.msra.mxu0 %v3529_v48  ;;  %v1283_v48 = vld [vmem:[#allocation13 + $0x48] sm:$0xff] }
 0x152   :  { %3531 = vmatprep.subr.bf16.mxu0 %v4055_v0  ;;  %v3601_v49 = vpack.c.bf16 %v1283_v48, %v1282_v41 }
 0x154   :  { %3602 = vmatpush3.bf16.msra.mxu1 %v3601_v49 }
 0x155   :  { %3533 = vmatpush3.bf16.msra.mxu0 %v3532_v29  ;;  %v1285_v29 = vld [vmem:[#allocation13 + $0x58] sm:$0xff]  ;;  %3603 = vmatprep.subr.bf16.mxu1 %v4055_v0 }
 0x156   :  { %3534 = vmatprep.subr.bf16.mxu0 %v4055_v0  ;;  %v3604_v45 = vpack.c.bf16 %v1285_v29, %v1284_v55 }
 0x158   :  { %3605 = vmatpush3.bf16.msra.mxu1 %v3604_v45 }
 0x159   :  { %3536 = vmatpush3.bf16.msra.mxu0 %v3535_v59  ;;  %v1287_v59 = vld [vmem:[#allocation13 + $0x68] sm:$0xff]  ;;  %3606 = vmatprep.subr.bf16.mxu1 %v4055_v0 }
 0x15a   :  { %3537 = vmatprep.subr.bf16.mxu0 %v4055_v0  ;;  %v3607_v38 = vpack.c.bf16 %v1287_v59, %v1286_v58  ;;  %v4625_v59 = vrot.slane %v4587_v27, %v4212_v20 }
 0x15c   :  { %3608 = vmatpush3.bf16.msra.mxu1 %v3607_v38  ;;  %v1467_v38 = vcombine.high %v4573_v13, %v4573_v13 }
 0x15d   :  { %3539 = vmatpush3.bf16.msra.mxu0 %v3538_v62  ;;  %v1289_v62 = vld [vmem:[#allocation13 + $0x78] sm:$0xff]  ;;  %3609 = vmatprep.subr.bf16.mxu1 %v4055_v0 }
 0x15e   :  { %3540 = vmatprep.subr.bf16.mxu0 %v4055_v0  ;;  %v3610_v40 = vpack.c.bf16 %v1289_v62, %v1288_v61 }
 0x160   :  { %2985 = vmatmul.mubr.f32.vlgmr.msra.gmra.mrb[0].mxu0 %v4427_v22  ;;  %v243_v22 = vld [vmem:[#allocation8 + $0x340] sm:$0xff]  ;;  %3611 = vmatpush3.bf16.msra.mxu1 %v3610_v40 }
 0x161   :  { %3542 = vmatpush3.bf16.msra.mxu0 %v3541_v3  ;;  %3019 = vmatprep.mubr.msk.f32.mxu0 %vm4056_vm0, %v4057_v1  ;;  %v3553_v5 = vpack.c.bf16 %v244_v11, %v243_v22 }
 0x162   :  { %3543 = vmatprep.subr.bf16.mxu0 %v4055_v0  ;;  %3612 = vmatprep.subr.bf16.mxu1 %v4055_v0 }
 0x165   :  { %3545 = vmatpush3.bf16.msra.mxu0 %v3544_v7 }
 0x166   :  { %3546 = vmatprep.subr.bf16.mxu0 %v4055_v0 }
 0x169   :  { %3548 = vmatpush3.bf16.msra.mxu0 %v3547_v8 }
 0x16a   :  { %3549 = vmatprep.subr.bf16.mxu0 %v4055_v0 }
 0x16d   :  { %3551 = vmatpush3.bf16.msra.mxu0 %v3550_v53 }
 0x16e   :  { %3552 = vmatprep.subr.bf16.mxu0 %v4055_v0 }
 0x171   :  { %3554 = vmatpush3.bf16.msra.mxu0 %v3553_v5 }
 0x172   :  { %3555 = vmatprep.subr.bf16.mxu0 %v4055_v0 }
 0x175   :  { %3557 = vmatpush3.bf16.msra.mxu0 %v3556_v57 }
 0x176   :  { %3558 = vmatprep.subr.bf16.mxu0 %v4055_v0 }
 0x179   :  { %3560 = vmatpush3.bf16.msra.mxu0 %v3559_v42 }
 0x17a   :  { %3561 = vmatprep.subr.bf16.mxu0 %v4055_v0 }
 0x17d   :  { %3563 = vmatpush3.bf16.msra.mxu0 %v3562_v51 }
 0x17e   :  { %3564 = vmatprep.subr.bf16.mxu0 %v4055_v0 }
 0x180   :  { %3020 = vmatmul.mubr.f32.vlgmr.msra.gmra.mrb[0].mxu0 %v4471_v15  ;;  %v259_v15 = vld [vmem:[#allocation8 + $0x3c0] sm:$0xff] }
 0x181   :  { %3566 = vmatpush3.bf16.msra.mxu0 %v3565_v16  ;;  %3054 = vmatprep.mubr.msk.f32.mxu0 %vm4056_vm0, %v4057_v1  ;;  %v3577_v36 = vpack.c.bf16 %v260_v35, %v259_v15 }
 0x182   :  { %3567 = vmatprep.subr.bf16.mxu0 %v4055_v0 }
 0x185   :  { %3569 = vmatpush3.bf16.msra.mxu0 %v3568_v30 }
 0x186   :  { %3570 = vmatprep.subr.bf16.mxu0 %v4055_v0 }
 0x189   :  { %3572 = vmatpush3.bf16.msra.mxu0 %v3571_v33 }
 0x18a   :  { %3573 = vmatprep.subr.bf16.mxu0 %v4055_v0 }
 0x18d   :  { %3575 = vmatpush3.bf16.msra.mxu0 %v3574_v54 }
 0x18e   :  { %3576 = vmatprep.subr.bf16.mxu0 %v4055_v0 }
 0x191   :  { %3578 = vmatpush3.bf16.msra.mxu0 %v3577_v36 }
 0x192   :  { %3579 = vmatprep.subr.bf16.mxu0 %v4055_v0 }
 0x195   :  { %3581 = vmatpush3.bf16.msra.mxu0 %v3580_v39 }
 0x196   :  { %3582 = vmatprep.subr.bf16.mxu0 %v4055_v0 }
 0x199   :  { %3584 = vmatpush3.bf16.msra.mxu0 %v3583_v44 }
 0x19a   :  { %3585 = vmatprep.subr.bf16.mxu0 %v4055_v0 }
 0x19d   :  { %3587 = vmatpush3.bf16.msra.mxu0 %v3586_v32 }
 0x1a0   :  { %3055 = vmatmul.mubr.f32.vlgmr.msra.gmra.mrb[0].mxu0 %v4499_v63  ;;  %v1256_v63 = vld [vmem:[#allocation10] sm:$0xff] }
 0x1a1   :  { %v1411_v60 = vcombine.high %v1256_v63, %v1256_v63  ;;  %v1418_v3 = vrot.slane %v1256_v63, %v4208_v12 }
 0x1a3   :  { %v1425_v24 = vrot.slane %v1411_v60, %v4208_v12  ;;  %v1426_v4 = vcombine.high %v1418_v3, %v1418_v3  ;;  %v1434_v56 = vrot.slane %v1418_v3, %v4208_v12 }
 0x1a5   :  { %v1427_v7 = vcombine.high %v1425_v24, %v1425_v24  ;;  %v1448_v6 = vrot.slane %v1426_v4, %v4208_v12  ;;  %v1441_v8 = vrot.slane %v1425_v24, %v4208_v12  ;;  %v1456_v10 = vcombine.high %v1434_v56, %v1434_v56 }
 0x1a6   :  { %v1487_v5 = vrot.slane %v1434_v56, %v4212_v20 }
 0x1a7   :  { %v1455_v9 = vrot.slane %v1427_v7, %v4208_v12  ;;  %v1458_v53 = vcombine.high %v1448_v6, %v1448_v6  ;;  %v1457_v22 = vcombine.high %v1441_v8, %v1441_v8  ;;  %v1491_v14 = vrot.slane %v1448_v6, %v4212_v20 }
 0x1a8   :  { %v1495_v17 = vrot.slane %v1456_v10, %v4212_v20  ;;  %v4568_v42 = vrot.slane %v1441_v8, %v4212_v20  ;;  %v4635_v10 = vld [vmem:[#allocation11 + $0x18] sm:$0xff] }
 0x1a9   :  { %v1459_v11 = vcombine.high %v1455_v9, %v1455_v9  ;;  %v1499_v57 = vrot.slane %v1458_v53, %v4212_v20  ;;  %v4571_v19 = vrot.slane %v1455_v9, %v4212_v20  ;;  %v4580_v26 = vrot.slane %v1457_v22, %v4212_v20  ;;  %v4633_v9 = vld [vmem:[#allocation11 + $0x10] sm:$0xff] }
 0x1ab   :  { %v4583_v16 = vrot.slane %v1459_v11, %v4212_v20 }
 0x273   :  { %v4575_v51 = vpop.f32.mrb[0].mxu0 }
 0x274   :  { %v3056_v25 = vpop.f32.mrb[1].mxu0  ;;  %vm1539_vm4 = vcmp.ge.f32.partialorder %v4575_v51, %v1487_v5  ;;  %vm1540_vm5 = vcmp.ge.f32.partialorder %v4575_v51, %v1491_v14  ;;  %vm1541_vm6 = vcmp.ge.f32.partialorder %v4575_v51, %v1495_v17  ;;  %vm1542_vm7 = vcmp.ge.f32.partialorder %v4575_v51, %v1499_v57 }
 0x275   :  { %vm1555_vm8 = vcmp.lt.f32.partialorder %v4575_v51, %v1491_v14  ;;  %vm1556_vm9 = vcmp.lt.f32.partialorder %v4575_v51, %v1495_v17  ;;  %vm1557_vm10 = vcmp.lt.f32.partialorder %v4575_v51, %v1499_v57  ;;  %vm1558_vm11 = vcmp.lt.f32.partialorder %v4575_v51, %v4568_v42 }
 0x276   :  { %vm1566_vm12 = vmand %vm1539_vm4, %vm1555_vm8  ;;  %v1599_v30 = vsub.f32 %v4575_v51, %v1487_v5  ;;  %v1600_v31 = vsub.f32 %v4575_v51, %v1491_v14  ;;  %v4601_v23 = vsub.f32 %v4575_v51, %v1495_v17  ;;  %v4604_v33 = vsub.f32 %v4575_v51, %v1499_v57 }
 0x277   :  { %vm1567_vm13 = vmand %vm1540_vm5, %vm1556_vm9  ;;  %v2425_v47 = vsel %vm1566_vm12, 1.0, %v4057_v1  ;;  %v1619_v34 = vsub.f32 %v1495_v17, %v4575_v51  ;;  %v1620_v54 = vsub.f32 %v1499_v57, %v4575_v51  ;;  %v1621_v15 = vsub.f32 %v4568_v42, %v4575_v51 }
 0x278   :  { %vm1568_vm14 = vmand %vm1541_vm6, %vm1557_vm10  ;;  %v2426_v35 = vsel %vm1567_vm13, 1.0, %v4057_v1  ;;  %v1609_v36 = vmul.f32 2.5, %v1599_v30  ;;  %v1610_v52 = vmul.f32 2.5, %v1600_v31  ;;  %v1611_v37 = vmul.f32 2.5, %v4601_v23 }
 0x279   :  { %vm1569_vm15 = vmand %vm1542_vm7, %vm1558_vm11  ;;  %v2427_v39 = vsel %vm1568_vm14, 1.0, %v4057_v1  ;;  %v1612_v43 = vmul.f32 2.5, %v4604_v33  ;;  %v1629_v46 = vmul.f32 2.5, %v1619_v34  ;;  %v1630_v44 = vmul.f32 2.5, %v1620_v54 }
 0x27a   :  { %v2428_v28 = vsel %vm1569_vm15, 1.0, %v4057_v1  ;;  %v1631_v50 = vmul.f32 2.5, %v1621_v15  ;;  %v1639_v32 = vmul.f32 %v2425_v47, %v1609_v36  ;;  %v1640_v41 = vmul.f32 %v2426_v35, %v1610_v52 }
 0x27b   :  { %v1641_v48 = vmul.f32 %v2427_v39, %v1611_v37  ;;  %v1642_v49 = vmul.f32 %v2428_v28, %v1612_v43  ;;  %v1649_v55 = vmul.f32 %v2426_v35, %v1629_v46  ;;  %v1650_v29 = vmul.f32 %v2427_v39, %v1630_v44  ;;  %v4654_v35 = vld [vmem:[#allocation11 + $0x28] sm:$0xff] }
 0x27c   :  { %v1651_v45 = vmul.f32 %v2428_v28, %v1631_v50  ;;  %v1669_v58 = vmul.f32 1.25, %v1599_v30  ;;  %v1670_v40 = vmul.f32 1.25, %v1600_v31  ;;  %v1678_v63 = vmul.f32 1.25, %v1620_v54 }
 0x27d   :  { %v1659_v61 = vadd.f32 %v1649_v55, %v1639_v32  ;;  %v1660_v62 = vadd.f32 %v1650_v29, %v1640_v41  ;;  %v1679_v3 = vmul.f32 1.25, %v1621_v15  ;;  %v1714_v24 = vmul.f32 0.8333333, %v1599_v30  ;;  %v4668_v55 = vld [vmem:[#allocation11 + $0x30] sm:$0xff]  ;;  %v4670_v29 = vld [vmem:[#allocation11 + $0x38] sm:$0xff] }
 0x27e   :  { %v1661_v60 = vadd.f32 %v1651_v45, %v1641_v48  ;;  %vm1543_vm1 = vcmp.ge.f32.partialorder %v4575_v51, %v4568_v42  ;;  %vm1559_vm2 = vcmp.lt.f32.partialorder %v4575_v51, %v4571_v19  ;;  %v1722_v8 = vmul.f32 0.8333333, %v1621_v15  ;;  %v4652_v15 = vld [vmem:[#allocation11 + $0x20] sm:$0xff] }
 0x27f   :  { %v1687_v4 = vmul.f32 %v1669_v58, %v1659_v61  ;;  %v1688_v7 = vmul.f32 %v1670_v40, %v1660_v62  ;;  %v1696_v56 = vmul.f32 %v1678_v63, %v1660_v62  ;;  %vm1570_vm3 = vmand %vm1543_vm1, %vm1559_vm2  ;;  %v1622_v53 = vsub.f32 %v4571_v19, %v4575_v51 }
 0x280   :  { %v1697_v6 = vmul.f32 %v1679_v3, %v1661_v60  ;;  %v1671_v22 = vmul.f32 1.25, %v4601_v23  ;;  %v2423_v5 = vmul.f32 -1.442695, %v4575_v51  ;;  %v2429_v14 = vsel %vm1570_vm3, 1.0, %v4057_v1  ;;  %v4699_v3 = vld [vmem:[#allocation11 + $0x48] sm:$0xff] }
 0x281   :  { %v1705_v11 = vadd.f32 %v1696_v56, %v1687_v4  ;;  %vm1544_vm4 = vcmp.ge.f32.partialorder %v4575_v51, %v4571_v19  ;;  %v1632_v57 = vmul.f32 2.5, %v1622_v53  ;;  %v1715_v25 = vmul.f32 0.8333333, %v1600_v31 }
 0x282   :  { %v1706_v17 = vadd.f32 %v1697_v6, %v1688_v7  ;;  %v1689_v13 = vmul.f32 %v1671_v22, %v1661_v60  ;;  %v3616_v47 = vpack.c.bf16 %v4635_v10, %v4633_v9  ;;  %vm1560_vm5 = vcmp.lt.f32.partialorder %v4575_v51, %v4580_v26  ;;  %v4697_v60 = vld [vmem:[#allocation11 + $0x40] sm:$0xff] }
 0x283   :  { %v1730_v30 = vmul.f32 %v1714_v24, %v1705_v11  ;;  %v4650_v34 = vsub.f32 %v4575_v51, %v4568_v42  ;;  %v1652_v36 = vmul.f32 %v2429_v14, %v1632_v57  ;;  %vm1571_vm6 = vmand %vm1544_vm4, %vm1560_vm5  ;;  %v1623_v31 = vsub.f32 %v4580_v26, %v4575_v51 }
 0x284   :  { %v1738_v54 = vmul.f32 %v1722_v8, %v1706_v17  ;;  %v1731_v52 = vmul.f32 %v1715_v25, %v1706_v17  ;;  %3856 = vpow2.f32 %v2423_v5  ;;  %v1680_v37 = vmul.f32 1.25, %v1622_v53 }
 0x285   :  { %v2430_v39 = vsel %vm1571_vm6, 1.0, %v4057_v1  ;;  %v1613_v43 = vmul.f32 2.5, %v4650_v34  ;;  %v1662_v42 = vadd.f32 %v1652_v36, %v1642_v49  ;;  %v1633_v44 = vmul.f32 2.5, %v1623_v31 }
 0x286   :  { %v1746_v46 = vadd.f32 %v1738_v54, %v1730_v30  ;;  %v1672_v28 = vmul.f32 1.25, %v4604_v33  ;;  %v3619_v50 = vpack.c.bf16 %v4654_v35, %v4652_v15  ;;  %v4664_v41 = vrot.slane %v1467_v38, %v4208_v12 }
 0x287   :  { %v1643_v32 = vmul.f32 %v2429_v14, %v1613_v43  ;;  %v1482_v48 = vcombine.high %v4587_v27, %v4587_v27  ;;  %v1698_v45 = vmul.f32 %v1680_v37, %v1662_v42  ;;  %v1723_v49 = vmul.f32 0.8333333, %v1622_v53 }
 0x288   :  { %3090 = vmatmul.mubr.f32.vlgmr.msra.gmra.mrb[0].mxu1 %v1746_v46  ;;  %v1653_v58 = vmul.f32 %v2430_v39, %v1633_v44  ;;  %v1690_v61 = vmul.f32 %v1672_v28, %v1662_v42  ;;  %v1681_v12 = vmul.f32 1.25, %v1623_v31  ;;  %v1716_v38 = vmul.f32 0.8333333, %v4601_v23 }
 0x289   :  { %3614 = vmatpush3.bf16.msra.mxu1 %v3613_v21  ;;  %3124 = vmatprep.mubr.msk.f32.mxu1 %vm4056_vm0, %v4057_v1  ;;  %vm1545_vm7 = vcmp.ge.f32.partialorder %v4575_v51, %v4580_v26  ;;  %vm1561_vm8 = vcmp.lt.f32.partialorder %v4575_v51, %v4583_v16  ;;  %v1707_v27 = vadd.f32 %v1698_v45, %v1689_v13  ;;  %v1673_v40 = vmul.f32 1.25, %v4650_v34 }
 0x28a   :  { %3615 = vmatprep.subr.bf16.mxu1 %v4055_v0  ;;  %v1663_v62 = vadd.f32 %v1653_v58, %v1643_v32  ;;  %vm1572_vm9 = vmand %vm1545_vm7, %vm1561_vm8  ;;  %v4685_v18 = vsub.f32 %v4575_v51, %v4571_v19  ;;  %v1624_v2 = vsub.f32 %v4583_v16, %v4575_v51  ;;  %v3622_v21 = vpack.c.bf16 %v4670_v29, %v4668_v55 }
 0x28b   :  { %v2431_v23 = vsel %vm1572_vm9, 1.0, %v4057_v1  ;;  %v4695_v63 = vrot.slane %v4664_v41, %v4212_v20  ;;  %v1739_v19 = vmul.f32 %v1723_v49, %v1707_v27  ;;  %v1732_v4 = vmul.f32 %v1716_v38, %v1707_v27 }
 0x28c   :  { %v1699_v24 = vmul.f32 %v1681_v12, %v1663_v62  ;;  %v1614_v7 = vmul.f32 2.5, %v4685_v18  ;;  %v1724_v56 = vmul.f32 0.8333333, %v1623_v31  ;;  %v1634_v6 = vmul.f32 2.5, %v1624_v2  ;;  %v1269_v31 = vld [vmem:[#allocation11 + $0x58] sm:$0xff] }
 0x28d   :  { %3617 = vmatpush3.bf16.msra.mxu1 %v3616_v47  ;;  %v1691_v8 = vmul.f32 %v1673_v40, %v1663_v62  ;;  %v4703_v9 = vrot.slane %v1482_v48, %v4212_v20  ;;  %v4706_v10 = vadd.f32 %v1739_v19, %v1731_v52  ;;  %v1717_v11 = vmul.f32 0.8333333, %v4604_v33 }
 0x28e   :  { %3618 = vmatprep.subr.bf16.mxu1 %v4055_v0  ;;  %v1708_v53 = vadd.f32 %v1699_v24, %v1690_v61  ;;  %v1644_v22 = vmul.f32 %v2430_v39, %v1614_v7  ;;  %v3857_v5 = vpop.eup %3856  ;;  %v3625_v14 = vpack.c.bf16 %v4699_v3, %v4697_v60  ;;  %v1654_v17 = vmul.f32 %v2431_v23, %v1634_v6 }
 0x28f   :  { %vm1546_vm10 = vcmp.ge.f32.partialorder %v4575_v51, %v4583_v16  ;;  %v1483_v57 = vcombine.high %v4664_v41, %v4664_v41  ;;  %vm1562_vm11 = vcmp.lt.f32.partialorder %v4575_v51, %v4625_v59  ;;  %v4719_v30 = vsub.f32 %v4575_v51, %v4580_v26  ;;  %v1268_v26 = vld [vmem:[#allocation11 + $0x50] sm:$0xff] }
 0x290   :  { %v1740_v13 = vmul.f32 %v1724_v56, %v1708_v53  ;;  %v1733_v25 = vmul.f32 %v1717_v11, %v1708_v53  ;;  %v1664_v33 = vadd.f32 %v1654_v17, %v1644_v22  ;;  %v1682_v47 = vmul.f32 1.25, %v1624_v2  ;;  %vm1573_vm12 = vmand %vm1546_vm10, %vm1562_vm11 }
 0x291   :  { %3620 = vmatpush3.bf16.msra.mxu1 %v3619_v50  ;;  %v1625_v54 = vsub.f32 %v4625_v59, %v4575_v51  ;;  %v1674_v15 = vmul.f32 1.25, %v4685_v18  ;;  %v2432_v36 = vsel %vm1573_vm12, 1.0, %v4057_v1  ;;  %v1615_v52 = vmul.f32 2.5, %v4719_v30 }
 0x292   :  { %3621 = vmatprep.subr.bf16.mxu1 %v4055_v0  ;;  %v4725_v35 = vadd.f32 %v1740_v13, %v1732_v4  ;;  %vm1547_vm13 = vcmp.ge.f32.partialorder %v4575_v51, %v4625_v59  ;;  %v1405_v37 = vadd.f32 1.0, %v3857_v5  ;;  %v1700_v39 = vmul.f32 %v1682_v47, %v1664_v33 }
 0x293   :  { %v1725_v43 = vmul.f32 0.8333333, %v1624_v2  ;;  %v1635_v46 = vmul.f32 2.5, %v1625_v54  ;;  %v1645_v42 = vmul.f32 %v2431_v23, %v1615_v52  ;;  %v1692_v44 = vmul.f32 %v1674_v15, %v1664_v33  ;;  %v1271_v23 = vld [vmem:[#allocation11 + $0x68] sm:$0xff] }
 0x294   :  { %v1718_v28 = vmul.f32 0.8333333, %v4650_v34  ;;  %vm1563_vm14 = vcmp.lt.f32.partialorder %v4575_v51, %v4695_v63  ;;  %v1709_v50 = vadd.f32 %v1700_v39, %v1691_v8  ;;  %v4736_v41 = vsub.f32 %v4575_v51, %v4583_v16 }
 0x295   :  { %3623 = vmatpush3.bf16.msra.mxu1 %v3622_v21  ;;  %v1655_v32 = vmul.f32 %v2432_v36, %v1635_v46  ;;  %vm1574_vm15 = vmand %vm1547_vm13, %vm1563_vm14  ;;  %v1626_v48 = vsub.f32 %v4695_v63, %v4575_v51  ;;  %v3628_v55 = vpack.c.bf16 %v1269_v31, %v1268_v26  ;;  %v1683_v29 = vmul.f32 1.25, %v1625_v54  ;;  %v1290_v31 = vld [vmem:[#allocation13 + $0x80] sm:$0xff] }
 0x296   :  { %3624 = vmatprep.subr.bf16.mxu1 %v4055_v0  ;;  %v2433_v34 = vsel %vm1574_vm15, 1.0, %v4057_v1  ;;  %v1553_v45 = vrot.slane %v1483_v57, %v4212_v20  ;;  %v1741_v49 = vmul.f32 %v1725_v43, %v1709_v50  ;;  %v1734_v61 = vmul.f32 %v1718_v28, %v1709_v50  ;;  %v1270_v20 = vld [vmem:[#allocation11 + $0x60] sm:$0xff] }
 0x297   :  { %v1665_v58 = vadd.f32 %v1655_v32, %v1645_v42  ;;  %v1675_v12 = vmul.f32 1.25, %v4719_v30  ;;  %3858 = vrcp.f32 %v1405_v37  ;;  %v1616_v16 = vmul.f32 2.5, %v4736_v41  ;;  %v1291_v37 = vld [vmem:[#allocation13 + $0x88] sm:$0xff] }
 0x298   :  { %v1636_v38 = vmul.f32 2.5, %v1626_v48  ;;  %vm1548_vm1 = vcmp.ge.f32.partialorder %v4575_v51, %v4695_v63  ;;  %v4747_v27 = vadd.f32 %v1741_v49, %v1733_v25  ;;  %v1726_v2 = vmul.f32 0.8333333, %v1625_v54 }
 0x299   :  { %3626 = vmatpush3.bf16.msra.mxu1 %v3625_v14  ;;  %v1701_v62 = vmul.f32 %v1683_v29, %v1665_v58  ;;  %v1693_v21 = vmul.f32 %v1675_v12, %v1665_v58  ;;  %v1646_v40 = vmul.f32 %v2432_v36, %v1616_v16  ;;  %vm1564_vm2 = vcmp.lt.f32.partialorder %v4575_v51, %v4703_v9  ;;  %v1273_v14 = vld [vmem:[#allocation11 + $0x78] sm:$0xff]  ;;  %v1292_v12 = vld [vmem:[#allocation13 + $0x90] sm:$0xff] }
 0x29a   :  { %3627 = vmatprep.subr.bf16.mxu1 %v4055_v0  ;;  %v1656_v60 = vmul.f32 %v2433_v34, %v1636_v38  ;;  %v1607_v3 = vsub.f32 %v4575_v51, %v4625_v59  ;;  %v1684_v24 = vmul.f32 1.25, %v1626_v48  ;;  %v1719_v4 = vmul.f32 0.8333333, %v4685_v18  ;;  %vm1575_vm3 = vmand %vm1548_vm1, %vm1564_vm2  ;;  %v1272_v18 = vld [vmem:[#allocation11 + $0x70] sm:$0xff]  ;;  %v1293_v16 = vld [vmem:[#allocation13 + $0x98] sm:$0xff] }
 0x29b   :  { %v1710_v19 = vadd.f32 %v1701_v62, %v1692_v44  ;;  %v1627_v7 = vsub.f32 %v4703_v9, %v4575_v51  ;;  %v2434_v6 = vsel %vm1575_vm3, 1.0, %v4057_v1  ;;  %v1676_v53 = vmul.f32 1.25, %v4736_v41 }
 0x29c   :  { %v1666_v56 = vadd.f32 %v1656_v60, %v1646_v40  ;;  %v1617_v8 = vmul.f32 2.5, %v1607_v3  ;;  %v3631_v22 = vpack.c.bf16 %v1271_v23, %v1270_v20  ;;  %v1727_v57 = vmul.f32 0.8333333, %v1626_v48 }
 0x29d   :  { %3629 = vmatpush3.bf16.msra.mxu1 %v3628_v55  ;;  %v1742_v59 = vmul.f32 %v1726_v2, %v1710_v19  ;;  %v1735_v11 = vmul.f32 %v1719_v4, %v1710_v19  ;;  %v1637_v5 = vmul.f32 2.5, %v1627_v7  ;;  %v1720_v54 = vmul.f32 0.8333333, %v4719_v30  ;;  %v1296_v4 = vld [vmem:[#allocation13 + $0xb0] sm:$0xff] }
 0x29e   :  { %3630 = vmatprep.subr.bf16.mxu1 %v4055_v0  ;;  %v1702_v17 = vmul.f32 %v1684_v24, %v1666_v56  ;;  %v1647_v13 = vmul.f32 %v2433_v34, %v1617_v8  ;;  %v1694_v25 = vmul.f32 %v1676_v53, %v1666_v56  ;;  %vm1549_vm4 = vcmp.ge.f32.partialorder %v4575_v51, %v4703_v9  ;;  %v1298_v8 = vld [vmem:[#allocation13 + $0xc0] sm:$0xff]  ;;  %v1299_v53 = vld [vmem:[#allocation13 + $0xc8] sm:$0xff] }
 0x29f   :  { %v4763_v33 = vadd.f32 %v1742_v59, %v1734_v61  ;;  %v1657_v47 = vmul.f32 %v2434_v6, %v1637_v5  ;;  %vm1565_vm5 = vcmp.lt.f32.partialorder %v4575_v51, %v1553_v45  ;;  %v1608_v36 = vsub.f32 %v4575_v51, %v4695_v63  ;;  %v1300_v59 = vld [vmem:[#allocation13 + $0xd0] sm:$0xff] }
 0x2a0   :  { %v1711_v15 = vadd.f32 %v1702_v17, %v1693_v21  ;;  %v1628_v52 = vsub.f32 %v1553_v45, %v4575_v51  ;;  %v3634_v26 = vpack.c.bf16 %v1273_v14, %v1272_v18  ;;  %v1685_v43 = vmul.f32 1.25, %v1627_v7  ;;  %vm1576_vm6 = vmand %vm1549_vm4, %vm1565_vm5  ;;  %v1302_v18 = vld [vmem:[#allocation13 + $0xe0] sm:$0xff]  ;;  %v1303_v14 = vld [vmem:[#allocation13 + $0xe8] sm:$0xff] }
 0x2a1   :  { %3632 = vmatpush3.bf16.msra.mxu1 %v3631_v22  ;;  %v1667_v39 = vadd.f32 %v1657_v47, %v1647_v13  ;;  %v1677_v46 = vmul.f32 1.25, %v1607_v3  ;;  %v3859_v30 = vpop.eup %3858  ;;  %v2435_v44 = vsel %vm1576_vm6, 1.0, %v4057_v1  ;;  %v1618_v28 = vmul.f32 2.5, %v1608_v36  ;;  %v1305_v13 = vld [vmem:[#allocation13 + $0xf8] sm:$0xff]  ;;  %v1306_v47 = vld [vmem:[#allocation13 + $0x100] sm:$0xff]  ;;  %v1308_v36 = vld [vmem:[#allocation13 + $0x110] sm:$0xff] }
 0x2a2   :  { %3633 = vmatprep.subr.bf16.mxu1 %v4055_v0  ;;  %v1743_v9 = vmul.f32 %v1727_v57, %v1711_v15  ;;  %v1736_v42 = vmul.f32 %v1720_v54, %v1711_v15  ;;  %v1638_v63 = vmul.f32 2.5, %v1628_v52  ;;  %v3637_v32 = vpack.c.bf16 %v1291_v37, %v1290_v31  ;;  %v1304_v57 = vld [vmem:[#allocation13 + $0xf0] sm:$0xff]  ;;  %v1307_v54 = vld [vmem:[#allocation13 + $0x108] sm:$0xff]  ;;  %v1310_v31 = vld [vmem:[#allocation13 + $0x120] sm:$0xff] }
 0x2a3   :  { %v1703_v50 = vmul.f32 %v1685_v43, %v1667_v39  ;;  %v1648_v55 = vmul.f32 %v2434_v6, %v1618_v28  ;;  %v1695_v29 = vmul.f32 %v1677_v46, %v1667_v39  ;;  %v1728_v45 = vmul.f32 0.8333333, %v1627_v7  ;;  %v1297_v7 = vld [vmem:[#allocation13 + $0xb8] sm:$0xff]  ;;  %v1311_v37 = vld [vmem:[#allocation13 + $0x128] sm:$0xff]  ;;  %v1312_v43 = vld [vmem:[#allocation13 + $0x130] sm:$0xff] }
 0x2a4   :  { %v4774_v48 = vadd.f32 %v1743_v9, %v1735_v11  ;;  %v1658_v49 = vmul.f32 %v2435_v44, %v1638_v63  ;;  %v1721_v58 = vmul.f32 0.8333333, %v4736_v41  ;;  %v1408_v61 = vmul.f32 %v3859_v30, %v4575_v51  ;;  %v1294_v51 = vld [vmem:[#allocation13 + $0xa0] sm:$0xff]  ;;  %v1295_v41 = vld [vmem:[#allocation13 + $0xa8] sm:$0xff]  ;;  %v1301_v11 = vld [vmem:[#allocation13 + $0xd8] sm:$0xff] }
 0x2a5   :  { %3635 = vmatpush3.bf16.msra.mxu1 %v3634_v26  ;;  %v1712_v34 = vadd.f32 %v1703_v50, %v1694_v25  ;;  %v1686_v2 = vmul.f32 1.25, %v1628_v52  ;;  %v3640_v20 = vpack.c.bf16 %v1293_v16, %v1292_v12  ;;  %v1729_v3 = vmul.f32 0.8333333, %v1628_v52  ;;  %v1309_v52 = vld [vmem:[#allocation13 + $0x118] sm:$0xff]  ;;  %v1315_v9 = vld [vmem:[#allocation13 + $0x148] sm:$0xff]  ;;  %v1316_v44 = vld [vmem:[#allocation13 + $0x150] sm:$0xff] }
 0x2a6   :  { %3636 = vmatprep.subr.bf16.mxu1 %v4055_v0  ;;  %v1668_v62 = vadd.f32 %v1658_v49, %v1648_v55  ;;  %v3643_v19 = vpack.c.bf16 %v1295_v41, %v1294_v51  ;;  %v3646_v6 = vpack.c.bf16 %v1297_v7, %v1296_v4  ;;  %v3649_v22 = vpack.c.bf16 %v1299_v53, %v1298_v8  ;;  %v1313_v46 = vld [vmem:[#allocation13 + $0x138] sm:$0xff]  ;;  %v1318_v63 = vld [vmem:[#allocation13 + $0x160] sm:$0xff]  ;;  %v1324_v12 = vld [vmem:[#allocation13 + $0x190] sm:$0xff] }
 0x2a7   :  { %v1744_v38 = vmul.f32 %v1728_v45, %v1712_v34  ;;  %v1737_v21 = vmul.f32 %v1721_v58, %v1712_v34  ;;  %v3652_v5 = vpack.c.bf16 %v1301_v11, %v1300_v59  ;;  %v3655_v17 = vpack.c.bf16 %v1303_v14, %v1302_v18  ;;  %v1317_v28 = vld [vmem:[#allocation13 + $0x158] sm:$0xff]  ;;  %v1322_v49 = vld [vmem:[#allocation13 + $0x180] sm:$0xff]  ;;  %v1323_v58 = vld [vmem:[#allocation13 + $0x188] sm:$0xff] }
 0x2a8   :  { %3125 = vmatmul.mubr.f32.vlgmr.msra.gmra.mrb[0].mxu1 %v1408_v61  ;;  %v1704_v40 = vmul.f32 %v1686_v2, %v1668_v62  ;;  %v3658_v25 = vpack.c.bf16 %v1305_v13, %v1304_v57  ;;  %v3661_v15 = vpack.c.bf16 %v1307_v54, %v1306_v47  ;;  %v3664_v26 = vpack.c.bf16 %v1309_v52, %v1308_v36  ;;  %v1321_v34 = vld [vmem:[#allocation13 + $0x178] sm:$0xff]  ;;  %v1326_v62 = vld [vmem:[#allocation13 + $0x1a0] sm:$0xff]  ;;  %v1327_v2 = vld [vmem:[#allocation13 + $0x1a8] sm:$0xff] }
 0x2a9   :  { %3638 = vmatpush3.bf16.msra.mxu1 %v3637_v32  ;;  %3159 = vmatprep.mubr.msk.f32.mxu1 %vm4056_vm0, %v4057_v1  ;;  %v4781_v23 = vadd.f32 %v1744_v38, %v1736_v42  ;;  %v3667_v39 = vpack.c.bf16 %v1311_v37, %v1310_v31  ;;  %v3670_v30 = vpack.c.bf16 %v1313_v46, %v1312_v43  ;;  %v1319_v32 = vld [vmem:[#allocation13 + $0x168] sm:$0xff]  ;;  %v1325_v16 = vld [vmem:[#allocation13 + $0x198] sm:$0xff]  ;;  %v1334_v4 = vld [vmem:[#allocation13 + $0x1e0] sm:$0xff] }
 0x2aa   :  { %3639 = vmatprep.subr.bf16.mxu1 %v4055_v0  ;;  %v1713_v60 = vadd.f32 %v1704_v40, %v1695_v29  ;;  %v3676_v50 = vpack.c.bf16 %v1317_v28, %v1316_v44  ;;  %v3679_v55 = vpack.c.bf16 %v1319_v32, %v1318_v63  ;;  %v1320_v29 = vld [vmem:[#allocation13 + $0x170] sm:$0xff]  ;;  %v3685_v61 = vpack.c.bf16 %v1323_v58, %v1322_v49  ;;  %v1329_v40 = vld [vmem:[#allocation13 + $0x1b8] sm:$0xff]  ;;  %v1331_v41 = vld [vmem:[#allocation13 + $0x1c8] sm:$0xff] }
 0x2ab   :  { %v3682_v45 = vpack.c.bf16 %v1321_v34, %v1320_v29  ;;  %v3688_v38 = vpack.c.bf16 %v1325_v16, %v1324_v12  ;;  %v1335_v7 = vld [vmem:[#allocation13 + $0x1e8] sm:$0xff]  ;;  %v1336_v8 = vld [vmem:[#allocation13 + $0x1f0] sm:$0xff]  ;;  %v1337_v53 = vld [vmem:[#allocation13 + $0x1f8] sm:$0xff] }
 0x2ac   :  { %v1745_v24 = vmul.f32 %v1729_v3, %v1713_v60  ;;  %v1332_v3 = vld [vmem:[#allocation13 + $0x1d0] sm:$0xff]  ;;  %v1338_v59 = vld [vmem:[#allocation13 + $0x200] sm:$0xff]  ;;  %v1339_v11 = vld [vmem:[#allocation13 + $0x208] sm:$0xff] }
 0x2ad   :  { %3641 = vmatpush3.bf16.msra.mxu1 %v3640_v20  ;;  %v1328_v20 = vld [vmem:[#allocation13 + $0x1b0] sm:$0xff]  ;;  %v1341_v14 = vld [vmem:[#allocation13 + $0x218] sm:$0xff]  ;;  %v1342_v57 = vld [vmem:[#allocation13 + $0x220] sm:$0xff] }
 0x2ae   :  { %3642 = vmatprep.subr.bf16.mxu1 %v4055_v0  ;;  %v4785_v56 = vadd.f32 %v1745_v24, %v1737_v21  ;;  %v3691_v21 = vpack.c.bf16 %v1327_v2, %v1326_v62  ;;  %v3694_v51 = vpack.c.bf16 %v1329_v40, %v1328_v20  ;;  %v1340_v18 = vld [vmem:[#allocation13 + $0x210] sm:$0xff]  ;;  %v1343_v13 = vld [vmem:[#allocation13 + $0x228] sm:$0xff]  ;;  %v1345_v54 = vld [vmem:[#allocation13 + $0x238] sm:$0xff] }
 0x2af   :  { %v1344_v47 = vld [vmem:[#allocation13 + $0x230] sm:$0xff]  ;;  %v1347_v36 = vld [vmem:[#allocation13 + $0x248] sm:$0xff]  ;;  %v1349_v31 = vld [vmem:[#allocation13 + $0x258] sm:$0xff] }
 0x2b0   :  { %v1351_v43 = vld [vmem:[#allocation13 + $0x268] sm:$0xff]  ;;  %v1357_v63 = vld [vmem:[#allocation13 + $0x298] sm:$0xff]  ;;  %v1364_v16 = vld [vmem:[#allocation13 + $0x2d0] sm:$0xff] }
 0x2b1   :  { %3644 = vmatpush3.bf16.msra.mxu1 %v3643_v19  ;;  %v1333_v19 = vld [vmem:[#allocation13 + $0x1d8] sm:$0xff]  ;;  %v1355_v44 = vld [vmem:[#allocation13 + $0x288] sm:$0xff]  ;;  %v1366_v2 = vld [vmem:[#allocation13 + $0x2e0] sm:$0xff] }
 0x2b2   :  { %3645 = vmatprep.subr.bf16.mxu1 %v4055_v0  ;;  %v3700_v24 = vpack.c.bf16 %v1333_v19, %v1332_v3  ;;  %v1359_v29 = vld [vmem:[#allocation13 + $0x2a8] sm:$0xff]  ;;  %v1361_v49 = vld [vmem:[#allocation13 + $0x2b8] sm:$0xff]  ;;  %v1368_v40 = vld [vmem:[#allocation13 + $0x2f0] sm:$0xff] }
 0x2b3   :  { %v1372_v19 = vld [vmem:[#allocation13 + $0x310] sm:$0xff] }
 0x2b5   :  { %3647 = vmatpush3.bf16.msra.mxu1 %v3646_v6  ;;  %v3703_v6 = vpack.c.bf16 %v1335_v7, %v1334_v4  ;;  %v1374_v7 = vld [vmem:[#allocation13 + $0x320] sm:$0xff] }
 0x2b6   :  { %3648 = vmatprep.subr.bf16.mxu1 %v4055_v0 }
 0x2b9   :  { %3650 = vmatpush3.bf16.msra.mxu1 %v3649_v22  ;;  %v3706_v22 = vpack.c.bf16 %v1337_v53, %v1336_v8  ;;  %v1376_v53 = vld [vmem:[#allocation13 + $0x330] sm:$0xff] }
 0x2ba   :  { %3651 = vmatprep.subr.bf16.mxu1 %v4055_v0 }
 0x2bd   :  { %3653 = vmatpush3.bf16.msra.mxu1 %v3652_v5  ;;  %v3709_v5 = vpack.c.bf16 %v1339_v11, %v1338_v59  ;;  %v1379_v11 = vld [vmem:[#allocation13 + $0x348] sm:$0xff] }
 0x2be   :  { %3654 = vmatprep.subr.bf16.mxu1 %v4055_v0 }
 0x2c1   :  { %3656 = vmatpush3.bf16.msra.mxu1 %v3655_v17  ;;  %v3712_v17 = vpack.c.bf16 %v1341_v14, %v1340_v18  ;;  %v1380_v18 = vld [vmem:[#allocation13 + $0x350] sm:$0xff]  ;;  %v1381_v14 = vld [vmem:[#allocation13 + $0x358] sm:$0xff] }
 0x2c2   :  { %3657 = vmatprep.subr.bf16.mxu1 %v4055_v0 }
 0x2c5   :  { %3659 = vmatpush3.bf16.msra.mxu1 %v3658_v25  ;;  %v3715_v25 = vpack.c.bf16 %v1343_v13, %v1342_v57  ;;  %v1382_v57 = vld [vmem:[#allocation13 + $0x360] sm:$0xff]  ;;  %v1383_v13 = vld [vmem:[#allocation13 + $0x368] sm:$0xff] }
 0x2c6   :  { %3660 = vmatprep.subr.bf16.mxu1 %v4055_v0 }
 0x2c8   :  { %3160 = vmatmul.mubr.f32.vlgmr.msra.gmra.mrb[0].mxu1 %v4706_v10  ;;  %v1314_v10 = vld [vmem:[#allocation13 + $0x140] sm:$0xff] }
 0x2c9   :  { %3662 = vmatpush3.bf16.msra.mxu1 %v3661_v15  ;;  %3194 = vmatprep.mubr.msk.f32.mxu1 %vm4056_vm0, %v4057_v1  ;;  %v3673_v42 = vpack.c.bf16 %v1315_v9, %v1314_v10  ;;  %v3718_v15 = vpack.c.bf16 %v1345_v54, %v1344_v47  ;;  %v1353_v10 = vld [vmem:[#allocation13 + $0x278] sm:$0xff]  ;;  %v1384_v47 = vld [vmem:[#allocation13 + $0x370] sm:$0xff] }
 0x2ca   :  { %3663 = vmatprep.subr.bf16.mxu1 %v4055_v0  ;;  %v1385_v54 = vld [vmem:[#allocation13 + $0x378] sm:$0xff] }
 0x2cd   :  { %3665 = vmatpush3.bf16.msra.mxu1 %v3664_v26  ;;  %v1348_v26 = vld [vmem:[#allocation13 + $0x250] sm:$0xff] }
 0x2ce   :  { %3666 = vmatprep.subr.bf16.mxu1 %v4055_v0  ;;  %v3724_v37 = vpack.c.bf16 %v1349_v31, %v1348_v26  ;;  %v1388_v26 = vld [vmem:[#allocation13 + $0x390] sm:$0xff]  ;;  %v1389_v31 = vld [vmem:[#allocation13 + $0x398] sm:$0xff] }
 0x2d1   :  { %3668 = vmatpush3.bf16.msra.mxu1 %v3667_v39  ;;  %v1350_v39 = vld [vmem:[#allocation13 + $0x260] sm:$0xff] }
 0x2d2   :  { %3669 = vmatprep.subr.bf16.mxu1 %v4055_v0  ;;  %v3727_v46 = vpack.c.bf16 %v1351_v43, %v1350_v39  ;;  %v1390_v39 = vld [vmem:[#allocation13 + $0x3a0] sm:$0xff]  ;;  %v1391_v43 = vld [vmem:[#allocation13 + $0x3a8] sm:$0xff] }
 0x2d5   :  { %3671 = vmatpush3.bf16.msra.mxu1 %v3670_v30  ;;  %v1352_v30 = vld [vmem:[#allocation13 + $0x270] sm:$0xff] }
 0x2d6   :  { %3672 = vmatprep.subr.bf16.mxu1 %v4055_v0  ;;  %v3730_v9 = vpack.c.bf16 %v1353_v10, %v1352_v30  ;;  %v1392_v30 = vld [vmem:[#allocation13 + $0x3b0] sm:$0xff]  ;;  %v1393_v10 = vld [vmem:[#allocation13 + $0x3b8] sm:$0xff] }
 0x2d9   :  { %3674 = vmatpush3.bf16.msra.mxu1 %v3673_v42  ;;  %v1354_v42 = vld [vmem:[#allocation13 + $0x280] sm:$0xff] }
 0x2da   :  { %3675 = vmatprep.subr.bf16.mxu1 %v4055_v0  ;;  %v3733_v28 = vpack.c.bf16 %v1355_v44, %v1354_v42  ;;  %v1395_v42 = vld [vmem:[#allocation13 + $0x3c8] sm:$0xff] }
 0x2dd   :  { %3677 = vmatpush3.bf16.msra.mxu1 %v3676_v50  ;;  %v1356_v50 = vld [vmem:[#allocation13 + $0x290] sm:$0xff] }
 0x2de   :  { %3678 = vmatprep.subr.bf16.mxu1 %v4055_v0  ;;  %v3736_v32 = vpack.c.bf16 %v1357_v63, %v1356_v50  ;;  %v1398_v63 = vld [vmem:[#allocation13 + $0x3e0] sm:$0xff] }
 0x2e1   :  { %3680 = vmatpush3.bf16.msra.mxu1 %v3679_v55  ;;  %v1358_v55 = vld [vmem:[#allocation13 + $0x2a0] sm:$0xff] }
 0x2e2   :  { %3681 = vmatprep.subr.bf16.mxu1 %v4055_v0  ;;  %v3739_v34 = vpack.c.bf16 %v1359_v29, %v1358_v55  ;;  %v1400_v29 = vld [vmem:[#allocation13 + $0x3f0] sm:$0xff] }
 0x2e5   :  { %3683 = vmatpush3.bf16.msra.mxu1 %v3682_v45  ;;  %v1360_v45 = vld [vmem:[#allocation13 + $0x2b0] sm:$0xff] }
 0x2e6   :  { %3684 = vmatprep.subr.bf16.mxu1 %v4055_v0  ;;  %v3742_v58 = vpack.c.bf16 %v1361_v49, %v1360_v45 }
 0x2e8   :  { %3195 = vmatmul.mubr.f32.vlgmr.msra.gmra.mrb[0].mxu1 %v4725_v35  ;;  %v1330_v35 = vld [vmem:[#allocation13 + $0x1c0] sm:$0xff] }
 0x2e9   :  { %3686 = vmatpush3.bf16.msra.mxu1 %v3685_v61  ;;  %3229 = vmatprep.mubr.msk.f32.mxu1 %vm4056_vm0, %v4057_v1  ;;  %v3697_v60 = vpack.c.bf16 %v1331_v41, %v1330_v35  ;;  %v1363_v61 = vld [vmem:[#allocation13 + $0x2c8] sm:$0xff]  ;;  %v1370_v41 = vld [vmem:[#allocation13 + $0x300] sm:$0xff] }
 0x2ea   :  { %3687 = vmatprep.subr.bf16.mxu1 %v4055_v0 }
 0x2ed   :  { %3689 = vmatpush3.bf16.msra.mxu1 %v3688_v38  ;;  %v1365_v38 = vld [vmem:[#allocation13 + $0x2d8] sm:$0xff] }
 0x2ee   :  { %3690 = vmatprep.subr.bf16.mxu1 %v4055_v0  ;;  %v3748_v62 = vpack.c.bf16 %v1365_v38, %v1364_v16 }
 0x2f1   :  { %3692 = vmatpush3.bf16.msra.mxu1 %v3691_v21  ;;  %v1367_v21 = vld [vmem:[#allocation13 + $0x2e8] sm:$0xff] }
 0x2f2   :  { %3693 = vmatprep.subr.bf16.mxu1 %v4055_v0  ;;  %v3751_v20 = vpack.c.bf16 %v1367_v21, %v1366_v2 }
 0x2f5   :  { %3695 = vmatpush3.bf16.msra.mxu1 %v3694_v51  ;;  %v1369_v51 = vld [vmem:[#allocation13 + $0x2f8] sm:$0xff] }
 0x2f6   :  { %3696 = vmatprep.subr.bf16.mxu1 %v4055_v0  ;;  %v3754_v35 = vpack.c.bf16 %v1369_v51, %v1368_v40 }
 0x2f9   :  { %3698 = vmatpush3.bf16.msra.mxu1 %v3697_v60  ;;  %v1371_v60 = vld [vmem:[#allocation13 + $0x308] sm:$0xff] }
 0x2fa   :  { %3699 = vmatprep.subr.bf16.mxu1 %v4055_v0  ;;  %v3757_v3 = vpack.c.bf16 %v1371_v60, %v1370_v41 }
 0x2fd   :  { %3701 = vmatpush3.bf16.msra.mxu1 %v3700_v24  ;;  %v1373_v24 = vld [vmem:[#allocation13 + $0x318] sm:$0xff] }
 0x2fe   :  { %3702 = vmatprep.subr.bf16.mxu1 %v4055_v0  ;;  %v3760_v4 = vpack.c.bf16 %v1373_v24, %v1372_v19 }
 0x301   :  { %3704 = vmatpush3.bf16.msra.mxu1 %v3703_v6  ;;  %v1375_v6 = vld [vmem:[#allocation13 + $0x328] sm:$0xff] }
 0x302   :  { %3705 = vmatprep.subr.bf16.mxu1 %v4055_v0  ;;  %v3763_v8 = vpack.c.bf16 %v1375_v6, %v1374_v7 }
 0x305   :  { %3707 = vmatpush3.bf16.msra.mxu1 %v3706_v22  ;;  %v1377_v22 = vld [vmem:[#allocation13 + $0x338] sm:$0xff] }
 0x306   :  { %3708 = vmatprep.subr.bf16.mxu1 %v4055_v0  ;;  %v3766_v59 = vpack.c.bf16 %v1377_v22, %v1376_v53 }
 0x308   :  { %3230 = vmatmul.mubr.f32.vlgmr.msra.gmra.mrb[0].mxu1 %v4747_v27  ;;  %v1346_v27 = vld [vmem:[#allocation13 + $0x240] sm:$0xff] }
 0x309   :  { %3710 = vmatpush3.bf16.msra.mxu1 %v3709_v5  ;;  %3264 = vmatprep.mubr.msk.f32.mxu1 %vm4056_vm0, %v4057_v1  ;;  %v3721_v52 = vpack.c.bf16 %v1347_v36, %v1346_v27  ;;  %v1386_v27 = vld [vmem:[#allocation13 + $0x380] sm:$0xff]  ;;  %v1387_v36 = vld [vmem:[#allocation13 + $0x388] sm:$0xff] }
 0x30a   :  { %3711 = vmatprep.subr.bf16.mxu1 %v4055_v0 }
 0x30d   :  { %3713 = vmatpush3.bf16.msra.mxu1 %v3712_v17  ;;  %v3772_v17 = vpack.c.bf16 %v1381_v14, %v1380_v18 }
 0x30e   :  { %3714 = vmatprep.subr.bf16.mxu1 %v4055_v0 }
 0x311   :  { %3716 = vmatpush3.bf16.msra.mxu1 %v3715_v25  ;;  %v3775_v25 = vpack.c.bf16 %v1383_v13, %v1382_v57 }
 0x312   :  { %3717 = vmatprep.subr.bf16.mxu1 %v4055_v0 }
 0x315   :  { %3719 = vmatpush3.bf16.msra.mxu1 %v3718_v15  ;;  %v3778_v15 = vpack.c.bf16 %v1385_v54, %v1384_v47 }
 0x316   :  { %3720 = vmatprep.subr.bf16.mxu1 %v4055_v0 }
 0x319   :  { %3722 = vmatpush3.bf16.msra.mxu1 %v3721_v52  ;;  %v3781_v52 = vpack.c.bf16 %v1387_v36, %v1386_v27 }
 0x31a   :  { %3723 = vmatprep.subr.bf16.mxu1 %v4055_v0 }
 0x31d   :  { %3725 = vmatpush3.bf16.msra.mxu1 %v3724_v37  ;;  %v3784_v37 = vpack.c.bf16 %v1389_v31, %v1388_v26 }
 0x31e   :  { %3726 = vmatprep.subr.bf16.mxu1 %v4055_v0 }
 0x321   :  { %3728 = vmatpush3.bf16.msra.mxu1 %v3727_v46  ;;  %v3787_v46 = vpack.c.bf16 %v1391_v43, %v1390_v39 }
 0x322   :  { %3729 = vmatprep.subr.bf16.mxu1 %v4055_v0 }
 0x325   :  { %3731 = vmatpush3.bf16.msra.mxu1 %v3730_v9  ;;  %v3790_v9 = vpack.c.bf16 %v1393_v10, %v1392_v30 }
 0x326   :  { %3732 = vmatprep.subr.bf16.mxu1 %v4055_v0 }
 0x328   :  { %3265 = vmatmul.mubr.f32.vlgmr.msra.gmra.mrb[0].mxu1 %v4763_v33  ;;  %v1362_v33 = vld [vmem:[#allocation13 + $0x2c0] sm:$0xff] }
 0x329   :  { %3734 = vmatpush3.bf16.msra.mxu1 %v3733_v28  ;;  %3299 = vmatprep.mubr.msk.f32.mxu1 %vm4056_vm0, %v4057_v1  ;;  %v3745_v12 = vpack.c.bf16 %v1363_v61, %v1362_v33  ;;  %v1397_v28 = vld [vmem:[#allocation13 + $0x3d8] sm:$0xff] }
 0x32a   :  { %3735 = vmatprep.subr.bf16.mxu1 %v4055_v0 }
 0x32d   :  { %3737 = vmatpush3.bf16.msra.mxu1 %v3736_v32  ;;  %v1399_v32 = vld [vmem:[#allocation13 + $0x3e8] sm:$0xff] }
 0x32e   :  { %3738 = vmatprep.subr.bf16.mxu1 %v4055_v0  ;;  %v3799_v55 = vpack.c.bf16 %v1399_v32, %v1398_v63 }
 0x331   :  { %3740 = vmatpush3.bf16.msra.mxu1 %v3739_v34  ;;  %v1401_v34 = vld [vmem:[#allocation13 + $0x3f8] sm:$0xff] }
 0x332   :  { %3741 = vmatprep.subr.bf16.mxu1 %v4055_v0  ;;  %v3802_v45 = vpack.c.bf16 %v1401_v34, %v1400_v29 }
 0x335   :  { %3743 = vmatpush3.bf16.msra.mxu1 %v3742_v58 }
 0x336   :  { %3744 = vmatprep.subr.bf16.mxu1 %v4055_v0 }
 0x339   :  { %3746 = vmatpush3.bf16.msra.mxu1 %v3745_v12 }
 0x33a   :  { %3747 = vmatprep.subr.bf16.mxu1 %v4055_v0 }
 0x33d   :  { %3749 = vmatpush3.bf16.msra.mxu1 %v3748_v62 }
 0x33e   :  { %3750 = vmatprep.subr.bf16.mxu1 %v4055_v0 }
 0x341   :  { %3752 = vmatpush3.bf16.msra.mxu1 %v3751_v20 }
 0x342   :  { %3753 = vmatprep.subr.bf16.mxu1 %v4055_v0 }
 0x345   :  { %3755 = vmatpush3.bf16.msra.mxu1 %v3754_v35 }
 0x346   :  { %3756 = vmatprep.subr.bf16.mxu1 %v4055_v0 }
 0x348   :  { %3300 = vmatmul.mubr.f32.vlgmr.msra.gmra.mrb[0].mxu1 %v4774_v48  ;;  %v1378_v48 = vld [vmem:[#allocation13 + $0x340] sm:$0xff] }
 0x349   :  { %3758 = vmatpush3.bf16.msra.mxu1 %v3757_v3  ;;  %3334 = vmatprep.mubr.msk.f32.mxu1 %vm4056_vm0, %v4057_v1  ;;  %v3769_v5 = vpack.c.bf16 %v1379_v11, %v1378_v48 }
 0x34a   :  { %3759 = vmatprep.subr.bf16.mxu1 %v4055_v0 }
 0x34d   :  { %3761 = vmatpush3.bf16.msra.mxu1 %v3760_v4 }
 0x34e   :  { %3762 = vmatprep.subr.bf16.mxu1 %v4055_v0 }
 0x351   :  { %3764 = vmatpush3.bf16.msra.mxu1 %v3763_v8 }
 0x352   :  { %3765 = vmatprep.subr.bf16.mxu1 %v4055_v0 }
 0x355   :  { %3767 = vmatpush3.bf16.msra.mxu1 %v3766_v59 }
 0x356   :  { %3768 = vmatprep.subr.bf16.mxu1 %v4055_v0 }
 0x359   :  { %3770 = vmatpush3.bf16.msra.mxu1 %v3769_v5 }
 0x35a   :  { %3771 = vmatprep.subr.bf16.mxu1 %v4055_v0 }
 0x35d   :  { %3773 = vmatpush3.bf16.msra.mxu1 %v3772_v17 }
 0x35e   :  { %3774 = vmatprep.subr.bf16.mxu1 %v4055_v0 }
 0x361   :  { %3776 = vmatpush3.bf16.msra.mxu1 %v3775_v25 }
 0x362   :  { %3777 = vmatprep.subr.bf16.mxu1 %v4055_v0 }
 0x365   :  { %3779 = vmatpush3.bf16.msra.mxu1 %v3778_v15 }
 0x366   :  { %3780 = vmatprep.subr.bf16.mxu1 %v4055_v0 }
 0x368   :  { %3335 = vmatmul.mubr.f32.vlgmr.msra.gmra.mrb[0].mxu1 %v4781_v23  ;;  %v1394_v23 = vld [vmem:[#allocation13 + $0x3c0] sm:$0xff] }
 0x369   :  { %3782 = vmatpush3.bf16.msra.mxu1 %v3781_v52  ;;  %3369 = vmatprep.mubr.msk.f32.mxu1 %vm4056_vm0, %v4057_v1  ;;  %v3793_v44 = vpack.c.bf16 %v1395_v42, %v1394_v23  ;;  %v1396_v1 = vld [vmem:[#allocation13 + $0x3d0] sm:$0xff] }
 0x36a   :  { %3783 = vmatprep.subr.bf16.mxu1 %v4055_v0  ;;  %v3796_v50 = vpack.c.bf16 %v1397_v28, %v1396_v1 }
 0x36d   :  { %3785 = vmatpush3.bf16.msra.mxu1 %v3784_v37 }
 0x36e   :  { %3786 = vmatprep.subr.bf16.mxu1 %v4055_v0 }
 0x371   :  { %3788 = vmatpush3.bf16.msra.mxu1 %v3787_v46 }
 0x372   :  { %3789 = vmatprep.subr.bf16.mxu1 %v4055_v0 }
 0x375   :  { %3791 = vmatpush3.bf16.msra.mxu1 %v3790_v9 }
 0x376   :  { %3792 = vmatprep.subr.bf16.mxu1 %v4055_v0 }
 0x379   :  { %3794 = vmatpush3.bf16.msra.mxu1 %v3793_v44 }
 0x37a   :  { %3795 = vmatprep.subr.bf16.mxu1 %v4055_v0 }
 0x37d   :  { %3797 = vmatpush3.bf16.msra.mxu1 %v3796_v50 }
 0x37e   :  { %3798 = vmatprep.subr.bf16.mxu1 %v4055_v0 }
 0x381   :  { %3800 = vmatpush3.bf16.msra.mxu1 %v3799_v55 }
 0x382   :  { %3801 = vmatprep.subr.bf16.mxu1 %v4055_v0 }
 0x385   :  { %3803 = vmatpush3.bf16.msra.mxu1 %v3802_v45 }
 0x388   :  { %3370 = vmatmul.mubr.f32.vlgmr.msra.gmra.mrb[0].mxu1 %v4785_v56 }
 0x45b   :  { %v2386_v49 = vpop.f32.mrb[0].mxu1 }
 0x45c   :  { %2391 = vst [vmem:[#allocation14] sm:$0xff] %v2386_v49  ;;  %v3371_v58 = vpop.f32.mrb[1].mxu1 }
 0x45d   :  { %4025 = shalt.err (!%p4022_p4)
}
 0x45e   :  { %s4026_s3 = scalar_lea.hbm %s4878_s7, 128 }
 0x45f   :  { %p4027_p5 = scmp.ne.s32.totalorder %s4878_s7, %s4026_s3  ;;  %p4030_p6 = scmp.lt.u32.totalorder %s4026_s3, %s4878_s7 }
 0x461   :  { %p4032_p7 = pnand %p4030_p6, %p4027_p5 }
 0x463   :  { %4035 = shalt.err (!%p4032_p7)
}
 0x464   :  { %2401 = dma.vmem_to_hbm [thread:$0]  %s2399_s11, 128, %s4878_s7, [#allocation4]  }
 0x465   :  { %4044 = dma.done.wait [#allocation4], 128  }
 0x466   :  { %4045 = vsyncadd [#allocation4], 4294967168 }
 0x467   :  { %2405 = vsyncpa [#allocation3], 1 }
 0x468   :  { %2406 = vsyncpa [#allocation6], 1 }
 0x469   :  { %2407 = vsyncpa [#allocation9], 1 }
 0x46a   :  { %2408 = vsyncpa [#allocation12], 1 }
 0x46b   :  { %2409 = vsyncpa [#allocation4], 1 }

</bundles_post_ra>
